<compile_context>
chip_gen: v7x
topology: tpu7x:2x2x1
jax: 0.10.0
libtpu: 0.0.40
codegen_flags: <defaults>
</compile_context>

<pallas_src>
import jax
import jax.numpy as jnp
from jax.experimental import pallas as pl
from jax.experimental.pallas import tpu as pltpu

EPS = 1e-5          # nn.BatchNorm2d default eps
NEG_SLOPE = 0.01    # nn.LeakyReLU default negative_slope


# ----------------------------------------------------------------------------
# Kernel 1: fused (im2col-matmul conv) + BatchNorm2d (batch stats) + LeakyReLU
#   Grid over output channels (N). Full M (= B*Ho*Wo) lives in one block, so
#   the per-channel batch statistics are exact for every N tile.
# ----------------------------------------------------------------------------
def _conv_bn_lrelu_kernel(x_ref, w_ref, b_ref, g_ref, beta_ref, o_ref):
    # x: [M, K] bf16 patches; w: [K, tn] bf16; b/g/beta: [1, tn] f32
    y = jnp.dot(x_ref[...], w_ref[...], preferred_element_type=jnp.float32)
    y = y + b_ref[...]
    # Single-pass batch statistics over rows (== all of B, Ho, Wo).
    mean = jnp.mean(y, axis=0, keepdims=True)
    mean_sq = jnp.mean(y * y, axis=0, keepdims=True)
    var = jnp.maximum(mean_sq - mean * mean, 0.0)
    z = (y - mean) * jax.lax.rsqrt(var + EPS) * g_ref[...] + beta_ref[...]
    o_ref[...] = jnp.where(z >= 0.0, z, NEG_SLOPE * z).astype(o_ref.dtype)


def conv_bn_lrelu(patches, w, b, gamma, beta, *, tn=256):
    M, K = patches.shape
    N = w.shape[1]
    tn = min(tn, N)
    assert N % tn == 0 and tn % 128 == 0
    return pl.pallas_call(
        _conv_bn_lrelu_kernel,
        out_shape=jax.ShapeDtypeStruct((M, N), jnp.bfloat16),
        grid_spec=pltpu.PrefetchScalarGridSpec(
            num_scalar_prefetch=0,
            grid=(N // tn,),
            in_specs=[
                pl.BlockSpec((M, K), lambda j: (0, 0)),
                pl.BlockSpec((K, tn), lambda j: (0, j)),
                pl.BlockSpec((1, tn), lambda j: (0, j)),
                pl.BlockSpec((1, tn), lambda j: (0, j)),
                pl.BlockSpec((1, tn), lambda j: (0, j)),
            ],
            out_specs=pl.BlockSpec((M, tn), lambda j: (0, j)),
        ),
        compiler_params=pltpu.CompilerParams(
            dimension_semantics=("parallel",)),   # v7x: shard N tiles across TCs
    )(patches, w, b, gamma, beta)


# ----------------------------------------------------------------------------
# Kernel 2: Linear (K-tiled, lane-aligned tiles) + Sigmoid
# ----------------------------------------------------------------------------
def _fc_sigmoid_kernel(x_ref, w_ref, b_ref, o_ref, acc_ref):
    k = pl.program_id(0)

    @pl.when(k == 0)
    def _():
        acc_ref[...] = jnp.zeros_like(acc_ref)

    acc_ref[...] += jnp.dot(x_ref[...], w_ref[...],
                            preferred_element_type=jnp.float32)

    @pl.when(k == pl.num_programs(0) - 1)
    def _():
        z = acc_ref[...] + b_ref[...]
        p = pl.reciprocal(1.0 + jnp.exp(-z), approx=True)   # EUP exp + vrcp
        o_ref[...] = jnp.minimum(p, 1.0)  # guard approx-recip overshoot above 1.0


def fc_sigmoid(x, w, b, *, tk=6272):
    B, K = x.shape
    N = w.shape[1]
    assert K % tk == 0 and tk % 128 == 0   # lane-aligned K tiles (25088/4 = 6272)
    return pl.pallas_call(
        _fc_sigmoid_kernel,
        out_shape=jax.ShapeDtypeStruct((B, N), jnp.float32),
        grid_spec=pltpu.PrefetchScalarGridSpec(
            num_scalar_prefetch=0,
            grid=(K // tk,),
            in_specs=[
                pl.BlockSpec((B, tk), lambda k: (0, k)),
                pl.BlockSpec((tk, N), lambda k: (k, 0)),
                pl.BlockSpec((1, N), lambda k: (0, 0)),
            ],
            out_specs=pl.BlockSpec((B, N), lambda k: (0, 0)),
            scratch_shapes=[pltpu.VMEM((B, N), jnp.float32)],
        ),
        compiler_params=pltpu.CompilerParams(
            dimension_semantics=("arbitrary",)),
    )(x, w, b)


# ----------------------------------------------------------------------------
# JAX glue: NHWC im2col for Conv2d(kernel=3, stride=2, pad=1), parameter setup
# ----------------------------------------------------------------------------
def im2col_nhwc(x, ksize=3, stride=2, pad=1):
    # x: [B, H, W, C] -> patches [B*Ho*Wo, ksize*ksize*C], column order (kh, kw, c)
    B, H, W, C = x.shape
    Ho = (H + 2 * pad - ksize) // stride + 1
    Wo = (W + 2 * pad - ksize) // stride + 1
    xp = jnp.pad(x, ((0, 0), (pad, pad), (pad, pad), (0, 0)))
    taps = []
    for kh in range(ksize):
        for kw in range(ksize):
            taps.append(xp[:, kh:kh + stride * Ho:stride,
                           kw:kw + stride * Wo:stride, :])     # [B, Ho, Wo, C]
    col = jnp.concatenate(taps, axis=-1)                       # [B, Ho, Wo, 9*C]
    return col.reshape(B * Ho * Wo, ksize * ksize * C), Ho, Wo


def init_params(key):
    ks = jax.random.split(key, 8)
    f32, bf16 = jnp.float32, jnp.bfloat16
    # Generate weights in PyTorch layout, then permute ONCE to the NHWC/im2col
    # layouts consumed by the kernels.
    w1_pt = 0.1 * jax.random.normal(ks[0], (128, 1, 3, 3), f32)    # [Cout,Cin,kh,kw]
    b1 = 0.1 * jax.random.normal(ks[1], (128,), f32)
    g1 = 1.0 + 0.1 * jax.random.normal(ks[2], (128,), f32)
    bt1 = 0.1 * jax.random.normal(ks[3], (128,), f32)
    w2_pt = 0.05 * jax.random.normal(ks[4], (512, 128, 3, 3), f32)
    b2 = 0.1 * jax.random.normal(ks[5], (512,), f32)
    g2 = 1.0 + 0.1 * jax.random.normal(ks[6], (512,), f32)
    bt2 = 0.1 * jax.random.normal(ks[7], (512,), f32)
    kw_, kb_ = jax.random.split(jax.random.fold_in(key, 99))
    wfc_pt = 0.01 * jax.random.normal(kw_, (128, 512 * 7 * 7), f32)  # [out, (c,h,w)]
    bfc = 0.1 * jax.random.normal(kb_, (128,), f32)

    def conv_w_to_mat(w_pt):
        # [Cout, Cin, kh, kw] -> [(kh, kw, cin), Cout] matching im2col column order
        co, ci, kh, kw = w_pt.shape
        return w_pt.transpose(2, 3, 1, 0).reshape(kh * kw * ci, co)

    # PyTorch flattens (C, H, W); our NHWC flatten is (H, W, C) -> permute rows once.
    wfc = wfc_pt.reshape(128, 512, 7, 7).transpose(2, 3, 1, 0).reshape(7 * 7 * 512, 128)

    return {
        "w1": conv_w_to_mat(w1_pt).astype(bf16), "b1": b1.reshape(1, 128),
        "g1": g1.reshape(1, 128), "bt1": bt1.reshape(1, 128),
        "w2": conv_w_to_mat(w2_pt).astype(bf16), "b2": b2.reshape(1, 512),
        "g2": g2.reshape(1, 512), "bt2": bt2.reshape(1, 512),
        "wfc": wfc.astype(bf16), "bfc": bfc.reshape(1, 128),
    }


def encoder_forward(x, p):
    # x: [B, 1, 28, 28] NCHW (PyTorch interface). Convert once to NHWC bf16;
    # everything downstream stays NHWC (no inter-stage transposes).
    B = x.shape[0]
    x = x.transpose(0, 2, 3, 1).astype(jnp.bfloat16)             # [B, 28, 28, 1]
    # --- Conv(1->128, s2) + BN + LeakyReLU ---
    p1, ho1, wo1 = im2col_nhwc(x)                                # [B*196, 9] bf16
    c1 = conv_bn_lrelu(p1, p["w1"], p["b1"], p["g1"], p["bt1"], tn=128)
    c1 = c1.reshape(B, ho1, wo1, 128)                            # NHWC bf16
    # --- Conv(128->512, s2) + BN + LeakyReLU ---
    p2, ho2, wo2 = im2col_nhwc(c1)                               # [B*49, 1152] bf16
    c2 = conv_bn_lrelu(p2, p["w2"], p["b2"], p["g2"], p["bt2"], tn=256)
    # (h, w, c) flatten matches the row-permuted wfc.
    flat = c2.reshape(B, ho2 * wo2 * 512)                        # [B, 25088] bf16
    # --- Linear(25088, 128) + Sigmoid ---
    return fc_sigmoid(flat, p["wfc"], p["bfc"], tk=6272)         # [B, 128] f32


if __name__ == "__main__":
    key = jax.random.PRNGKey(0)
    kx, kp = jax.random.split(key)
    # Spatial 28x28 is implied by the fc input size (28 -> 14 -> 7, 7*7*512).
    x = jax.random.normal(kx, (2, 1, 28, 28), jnp.float32)
    params = init_params(kp)

    out = jax.jit(encoder_forward)(x, params)
    out = jax.block_until_ready(out)

    assert out.shape == (2, 128)
    assert bool(jnp.all(jnp.isfinite(out)))
    assert bool(jnp.all((out >= 0.0) & (out <= 1.0)))  # sigmoid range
    print("KERNEL_OK")
</pallas_src>

<mosaic_0001>
module attributes {stable_mosaic.version = 11 : i64} {
  func.func @_conv_bn_lrelu_kernel(%arg0: i32, %arg1: memref<392x9xbf16, #tpu.memory_space<vmem>>, %arg2: memref<9x128xbf16, #tpu.memory_space<vmem>>, %arg3: memref<1x128xf32, #tpu.memory_space<vmem>>, %arg4: memref<1x128xf32, #tpu.memory_space<vmem>>, %arg5: memref<1x128xf32, #tpu.memory_space<vmem>>, %arg6: memref<392x128xbf16, #tpu.memory_space<vmem>>) attributes {dimension_semantics = [#tpu.dimension_semantics<parallel>], iteration_bounds = array<i64: 1>, scalar_prefetch = 0 : i64, scratch_operands = 0 : i64, tpu.core_type = #tpu.core_type<tc>, window_params = [{pipeline_mode = #tpu.pipeline_mode<synchronous>, transform_indices = @transform_0, window_bounds = array<i64: 392, 9>}, {transform_indices = @transform_1, window_bounds = array<i64: 9, 128>}, {transform_indices = @transform_2, window_bounds = array<i64: 1, 128>}, {transform_indices = @transform_3, window_bounds = array<i64: 1, 128>}, {transform_indices = @transform_4, window_bounds = array<i64: 1, 128>}, {transform_indices = @transform_5, window_bounds = array<i64: 392, 128>}]} {
    %c0 = arith.constant 0 : index
    %c0_0 = arith.constant 0 : index
    %0 = vector.load %arg1[%c0, %c0_0] : memref<392x9xbf16, #tpu.memory_space<vmem>>, vector<392x9xbf16>
    %c0_1 = arith.constant 0 : index
    %c0_2 = arith.constant 0 : index
    %1 = vector.load %arg2[%c0_1, %c0_2] : memref<9x128xbf16, #tpu.memory_space<vmem>>, vector<9x128xbf16>
    %cst = arith.constant dense<0.000000e+00> : vector<392x128xf32>
    %2 = tpu.matmul %0, %1, %cst {dimension_numbers = #tpu.dot_dimension_numbers<[1], [0], [0], [1], [0, 0, 1, 1], [], []>} : vector<392x9xbf16>, vector<9x128xbf16>, vector<392x128xf32> -> vector<392x128xf32>
    %c0_3 = arith.constant 0 : index
    %c0_4 = arith.constant 0 : index
    %3 = vector.load %arg3[%c0_3, %c0_4] : memref<1x128xf32, #tpu.memory_space<vmem>>, vector<1x128xf32>
    %4 = vector.broadcast %3 : vector<1x128xf32> to vector<392x128xf32>
    %5 = arith.addf %2, %4 : vector<392x128xf32>
    %cst_5 = arith.constant dense<0.000000e+00> : vector<128xf32>
    %6 = vector.multi_reduction <add>, %5, %cst_5 [0] : vector<392x128xf32> to vector<128xf32>
    %7 = vector.shape_cast %6 : vector<128xf32> to vector<1x128xf32>
    %cst_6 = arith.constant 3.920000e+02 : f32
    %8 = vector.broadcast %cst_6 : f32 to vector<1x128xf32>
    %9 = arith.divf %7, %8 : vector<1x128xf32>
    %10 = arith.mulf %5, %5 : vector<392x128xf32>
    %cst_7 = arith.constant dense<0.000000e+00> : vector<128xf32>
    %11 = vector.multi_reduction <add>, %10, %cst_7 [0] : vector<392x128xf32> to vector<128xf32>
    %12 = vector.shape_cast %11 : vector<128xf32> to vector<1x128xf32>
    %cst_8 = arith.constant 3.920000e+02 : f32
    %13 = vector.broadcast %cst_8 : f32 to vector<1x128xf32>
    %14 = arith.divf %12, %13 : vector<1x128xf32>
    %15 = arith.mulf %9, %9 : vector<1x128xf32>
    %16 = arith.subf %14, %15 : vector<1x128xf32>
    %cst_9 = arith.constant 0.000000e+00 : f32
    %17 = vector.broadcast %cst_9 : f32 to vector<1x128xf32>
    %18 = arith.maximumf %16, %17 : vector<1x128xf32>
    %19 = vector.broadcast %9 : vector<1x128xf32> to vector<392x128xf32>
    %20 = arith.subf %5, %19 : vector<392x128xf32>
    %cst_10 = arith.constant 9.99999974E-6 : f32
    %21 = vector.broadcast %cst_10 : f32 to vector<1x128xf32>
    %22 = arith.addf %18, %21 : vector<1x128xf32>
    %23 = math.rsqrt %22 : vector<1x128xf32>
    %24 = vector.broadcast %23 : vector<1x128xf32> to vector<392x128xf32>
    %25 = arith.mulf %20, %24 : vector<392x128xf32>
    %c0_11 = arith.constant 0 : index
    %c0_12 = arith.constant 0 : index
    %26 = vector.load %arg4[%c0_11, %c0_12] : memref<1x128xf32, #tpu.memory_space<vmem>>, vector<1x128xf32>
    %27 = vector.broadcast %26 : vector<1x128xf32> to vector<392x128xf32>
    %28 = arith.mulf %25, %27 : vector<392x128xf32>
    %c0_13 = arith.constant 0 : index
    %c0_14 = arith.constant 0 : index
    %29 = vector.load %arg5[%c0_13, %c0_14] : memref<1x128xf32, #tpu.memory_space<vmem>>, vector<1x128xf32>
    %30 = vector.broadcast %29 : vector<1x128xf32> to vector<392x128xf32>
    %31 = arith.addf %28, %30 : vector<392x128xf32>
    %cst_15 = arith.constant 0.000000e+00 : f32
    %32 = vector.broadcast %cst_15 : f32 to vector<392x128xf32>
    %33 = arith.cmpf oge, %31, %32 : vector<392x128xf32>
    %cst_16 = arith.constant 0.00999999977 : f32
    %34 = vector.broadcast %cst_16 : f32 to vector<392x128xf32>
    %35 = arith.mulf %34, %31 : vector<392x128xf32>
    %36 = arith.select %33, %31, %35 : vector<392x128xi1>, vector<392x128xf32>
    %37 = arith.truncf %36 : vector<392x128xf32> to vector<392x128xbf16>
    %c0_17 = arith.constant 0 : index
    %c0_18 = arith.constant 0 : index
    %38 = vector.load %arg6[%c0_17, %c0_18] : memref<392x128xbf16, #tpu.memory_space<vmem>>, vector<392x128xbf16>
    tpu.vector_store %arg6[%c0_17, %c0_18], %37 {strides = array<i32>} : memref<392x128xbf16, #tpu.memory_space<vmem>>, vector<392x128xbf16>,
    return
  }
  func.func @transform_0(%arg0: i32) -> (i32, i32) {
    %c0_i32 = arith.constant 0 : i32
    %c0_i32_0 = arith.constant 0 : i32
    %c0_i32_1 = arith.constant 0 : i32
    return %c0_i32, %c0_i32_0 : i32, i32
  }
  func.func @transform_1(%arg0: i32) -> (i32, i32) {
    %c0_i32 = arith.constant 0 : i32
    %c0_i32_0 = arith.constant 0 : i32
    return %c0_i32, %arg0 : i32, i32
  }
  func.func @transform_2(%arg0: i32) -> (i32, i32) {
    %c0_i32 = arith.constant 0 : i32
    %c0_i32_0 = arith.constant 0 : i32
    return %c0_i32, %arg0 : i32, i32
  }
  func.func @transform_3(%arg0: i32) -> (i32, i32) {
    %c0_i32 = arith.constant 0 : i32
    %c0_i32_0 = arith.constant 0 : i32
    return %c0_i32, %arg0 : i32, i32
  }
  func.func @transform_4(%arg0: i32) -> (i32, i32) {
    %c0_i32 = arith.constant 0 : i32
    %c0_i32_0 = arith.constant 0 : i32
    return %c0_i32, %arg0 : i32, i32
  }
  func.func @transform_5(%arg0: i32) -> (i32, i32) {
    %c0_i32 = arith.constant 0 : i32
    %c0_i32_0 = arith.constant 0 : i32
    return %c0_i32, %arg0 : i32, i32
  }
}

module attributes {stable_mosaic.version = 11 : i64} {
  func.func @_conv_bn_lrelu_kernel(%arg0: i32, %arg1: memref<98x1152xbf16, #tpu.memory_space<vmem>>, %arg2: memref<1152x256xbf16, #tpu.memory_space<vmem>>, %arg3: memref<1x256xf32, #tpu.memory_space<vmem>>, %arg4: memref<1x256xf32, #tpu.memory_space<vmem>>, %arg5: memref<1x256xf32, #tpu.memory_space<vmem>>, %arg6: memref<98x256xbf16, #tpu.memory_space<vmem>>) attributes {dimension_semantics = [#tpu.dimension_semantics<parallel>], iteration_bounds = array<i64: 2>, scalar_prefetch = 0 : i64, scratch_operands = 0 : i64, tpu.core_type = #tpu.core_type<tc>, window_params = [{pipeline_mode = #tpu.pipeline_mode<synchronous>, transform_indices = @transform_0, window_bounds = array<i64: 98, 1152>}, {transform_indices = @transform_1, window_bounds = array<i64: 1152, 256>}, {transform_indices = @transform_2, window_bounds = array<i64: 1, 256>}, {transform_indices = @transform_3, window_bounds = array<i64: 1, 256>}, {transform_indices = @transform_4, window_bounds = array<i64: 1, 256>}, {transform_indices = @transform_5, window_bounds = array<i64: 98, 256>}]} {
    %c0 = arith.constant 0 : index
    %c0_0 = arith.constant 0 : index
    %0 = vector.load %arg1[%c0, %c0_0] : memref<98x1152xbf16, #tpu.memory_space<vmem>>, vector<98x1152xbf16>
    %c0_1 = arith.constant 0 : index
    %c0_2 = arith.constant 0 : index
    %1 = vector.load %arg2[%c0_1, %c0_2] : memref<1152x256xbf16, #tpu.memory_space<vmem>>, vector<1152x256xbf16>
    %cst = arith.constant dense<0.000000e+00> : vector<98x256xf32>
    %2 = tpu.matmul %0, %1, %cst {dimension_numbers = #tpu.dot_dimension_numbers<[1], [0], [0], [1], [0, 0, 1, 1], [], []>} : vector<98x1152xbf16>, vector<1152x256xbf16>, vector<98x256xf32> -> vector<98x256xf32>
    %c0_3 = arith.constant 0 : index
    %c0_4 = arith.constant 0 : index
    %3 = vector.load %arg3[%c0_3, %c0_4] : memref<1x256xf32, #tpu.memory_space<vmem>>, vector<1x256xf32>
    %4 = vector.broadcast %3 : vector<1x256xf32> to vector<98x256xf32>
    %5 = arith.addf %2, %4 : vector<98x256xf32>
    %cst_5 = arith.constant dense<0.000000e+00> : vector<256xf32>
    %6 = vector.multi_reduction <add>, %5, %cst_5 [0] : vector<98x256xf32> to vector<256xf32>
    %7 = vector.shape_cast %6 : vector<256xf32> to vector<1x256xf32>
    %cst_6 = arith.constant 9.800000e+01 : f32
    %8 = vector.broadcast %cst_6 : f32 to vector<1x256xf32>
    %9 = arith.divf %7, %8 : vector<1x256xf32>
    %10 = arith.mulf %5, %5 : vector<98x256xf32>
    %cst_7 = arith.constant dense<0.000000e+00> : vector<256xf32>
    %11 = vector.multi_reduction <add>, %10, %cst_7 [0] : vector<98x256xf32> to vector<256xf32>
    %12 = vector.shape_cast %11 : vector<256xf32> to vector<1x256xf32>
    %cst_8 = arith.constant 9.800000e+01 : f32
    %13 = vector.broadcast %cst_8 : f32 to vector<1x256xf32>
    %14 = arith.divf %12, %13 : vector<1x256xf32>
    %15 = arith.mulf %9, %9 : vector<1x256xf32>
    %16 = arith.subf %14, %15 : vector<1x256xf32>
    %cst_9 = arith.constant 0.000000e+00 : f32
    %17 = vector.broadcast %cst_9 : f32 to vector<1x256xf32>
    %18 = arith.maximumf %16, %17 : vector<1x256xf32>
    %19 = vector.broadcast %9 : vector<1x256xf32> to vector<98x256xf32>
    %20 = arith.subf %5, %19 : vector<98x256xf32>
    %cst_10 = arith.constant 9.99999974E-6 : f32
    %21 = vector.broadcast %cst_10 : f32 to vector<1x256xf32>
    %22 = arith.addf %18, %21 : vector<1x256xf32>
    %23 = math.rsqrt %22 : vector<1x256xf32>
    %24 = vector.broadcast %23 : vector<1x256xf32> to vector<98x256xf32>
    %25 = arith.mulf %20, %24 : vector<98x256xf32>
    %c0_11 = arith.constant 0 : index
    %c0_12 = arith.constant 0 : index
    %26 = vector.load %arg4[%c0_11, %c0_12] : memref<1x256xf32, #tpu.memory_space<vmem>>, vector<1x256xf32>
    %27 = vector.broadcast %26 : vector<1x256xf32> to vector<98x256xf32>
    %28 = arith.mulf %25, %27 : vector<98x256xf32>
    %c0_13 = arith.constant 0 : index
    %c0_14 = arith.constant 0 : index
    %29 = vector.load %arg5[%c0_13, %c0_14] : memref<1x256xf32, #tpu.memory_space<vmem>>, vector<1x256xf32>
    %30 = vector.broadcast %29 : vector<1x256xf32> to vector<98x256xf32>
    %31 = arith.addf %28, %30 : vector<98x256xf32>
    %cst_15 = arith.constant 0.000000e+00 : f32
    %32 = vector.broadcast %cst_15 : f32 to vector<98x256xf32>
    %33 = arith.cmpf oge, %31, %32 : vector<98x256xf32>
    %cst_16 = arith.constant 0.00999999977 : f32
    %34 = vector.broadcast %cst_16 : f32 to vector<98x256xf32>
    %35 = arith.mulf %34, %31 : vector<98x256xf32>
    %36 = arith.select %33, %31, %35 : vector<98x256xi1>, vector<98x256xf32>
    %37 = arith.truncf %36 : vector<98x256xf32> to vector<98x256xbf16>
    %c0_17 = arith.constant 0 : index
    %c0_18 = arith.constant 0 : index
    %38 = vector.load %arg6[%c0_17, %c0_18] : memref<98x256xbf16, #tpu.memory_space<vmem>>, vector<98x256xbf16>
    tpu.vector_store %arg6[%c0_17, %c0_18], %37 {strides = array<i32>} : memref<98x256xbf16, #tpu.memory_space<vmem>>, vector<98x256xbf16>,
    return
  }
  func.func @transform_0(%arg0: i32) -> (i32, i32) {
    %c0_i32 = arith.constant 0 : i32
    %c0_i32_0 = arith.constant 0 : i32
    %c0_i32_1 = arith.constant 0 : i32
    return %c0_i32, %c0_i32_0 : i32, i32
  }
  func.func @transform_1(%arg0: i32) -> (i32, i32) {
    %c0_i32 = arith.constant 0 : i32
    %c0_i32_0 = arith.constant 0 : i32
    return %c0_i32, %arg0 : i32, i32
  }
  func.func @transform_2(%arg0: i32) -> (i32, i32) {
    %c0_i32 = arith.constant 0 : i32
    %c0_i32_0 = arith.constant 0 : i32
    return %c0_i32, %arg0 : i32, i32
  }
  func.func @transform_3(%arg0: i32) -> (i32, i32) {
    %c0_i32 = arith.constant 0 : i32
    %c0_i32_0 = arith.constant 0 : i32
    return %c0_i32, %arg0 : i32, i32
  }
  func.func @transform_4(%arg0: i32) -> (i32, i32) {
    %c0_i32 = arith.constant 0 : i32
    %c0_i32_0 = arith.constant 0 : i32
    return %c0_i32, %arg0 : i32, i32
  }
  func.func @transform_5(%arg0: i32) -> (i32, i32) {
    %c0_i32 = arith.constant 0 : i32
    %c0_i32_0 = arith.constant 0 : i32
    return %c0_i32, %arg0 : i32, i32
  }
}

module attributes {stable_mosaic.version = 11 : i64} {
  func.func @_fc_sigmoid_kernel(%arg0: i32, %arg1: memref<2x6272xbf16, #tpu.memory_space<vmem>>, %arg2: memref<6272x128xbf16, #tpu.memory_space<vmem>>, %arg3: memref<1x128xf32, #tpu.memory_space<vmem>>, %arg4: memref<2x128xf32, #tpu.memory_space<vmem>>, %arg5: memref<2x128xf32, #tpu.memory_space<vmem>>) attributes {dimension_semantics = [#tpu.dimension_semantics<arbitrary>], iteration_bounds = array<i64: 4>, scalar_prefetch = 0 : i64, scratch_operands = 1 : i64, tpu.core_type = #tpu.core_type<tc>, window_params = [{transform_indices = @transform_0, window_bounds = array<i64: 2, 6272>}, {transform_indices = @transform_1, window_bounds = array<i64: 6272, 128>}, {pipeline_mode = #tpu.pipeline_mode<synchronous>, transform_indices = @transform_2, window_bounds = array<i64: 1, 128>}, {pipeline_mode = #tpu.pipeline_mode<synchronous>, transform_indices = @transform_3, window_bounds = array<i64: 2, 128>}]} {
    %c0_i32 = arith.constant 0 : i32
    %0 = arith.cmpi eq, %arg0, %c0_i32 : i32
    %1 = arith.extui %0 : i1 to i32
    %c0_i32_0 = arith.constant 0 : i32
    %2 = arith.cmpi ne, %1, %c0_i32_0 : i32
    scf.if %2 {
      %cst_9 = arith.constant 0.000000e+00 : f32
      %12 = vector.broadcast %cst_9 : f32 to vector<2x128xf32>
      %c0_10 = arith.constant 0 : index
      %c0_11 = arith.constant 0 : index
      %13 = vector.load %arg5[%c0_10, %c0_11] : memref<2x128xf32, #tpu.memory_space<vmem>>, vector<2x128xf32>
      tpu.vector_store %arg5[%c0_10, %c0_11], %12 {strides = array<i32>} : memref<2x128xf32, #tpu.memory_space<vmem>>, vector<2x128xf32>,
    } else {
    }
    %c0 = arith.constant 0 : index
    %c0_1 = arith.constant 0 : index
    %3 = vector.load %arg5[%c0, %c0_1] : memref<2x128xf32, #tpu.memory_space<vmem>>, vector<2x128xf32>
    %c0_2 = arith.constant 0 : index
    %c0_3 = arith.constant 0 : index
    %4 = vector.load %arg1[%c0_2, %c0_3] : memref<2x6272xbf16, #tpu.memory_space<vmem>>, vector<2x6272xbf16>
    %c0_4 = arith.constant 0 : index
    %c0_5 = arith.constant 0 : index
    %5 = vector.load %arg2[%c0_4, %c0_5] : memref<6272x128xbf16, #tpu.memory_space<vmem>>, vector<6272x128xbf16>
    %cst = arith.constant dense<0.000000e+00> : vector<2x128xf32>
    %6 = tpu.matmul %4, %5, %cst {dimension_numbers = #tpu.dot_dimension_numbers<[1], [0], [0], [1], [0, 0, 1, 1], [], []>} : vector<2x6272xbf16>, vector<6272x128xbf16>, vector<2x128xf32> -> vector<2x128xf32>
    %7 = arith.addf %3, %6 : vector<2x128xf32>
    %c0_6 = arith.constant 0 : index
    %c0_7 = arith.constant 0 : index
    %8 = vector.load %arg5[%c0_6, %c0_7] : memref<2x128xf32, #tpu.memory_space<vmem>>, vector<2x128xf32>
    tpu.vector_store %arg5[%c0_6, %c0_7], %7 {strides = array<i32>} : memref<2x128xf32, #tpu.memory_space<vmem>>, vector<2x128xf32>,
    %c3_i32 = arith.constant 3 : i32
    %9 = arith.cmpi eq, %arg0, %c3_i32 : i32
    %10 = arith.extui %9 : i1 to i32
    %c0_i32_8 = arith.constant 0 : i32
    %11 = arith.cmpi ne, %10, %c0_i32_8 : i32
    scf.if %11 {
      %c0_9 = arith.constant 0 : index
      %c0_10 = arith.constant 0 : index
      %12 = vector.load %arg5[%c0_9, %c0_10] : memref<2x128xf32, #tpu.memory_space<vmem>>, vector<2x128xf32>
      %c0_11 = arith.constant 0 : index
      %c0_12 = arith.constant 0 : index
      %13 = vector.load %arg3[%c0_11, %c0_12] : memref<1x128xf32, #tpu.memory_space<vmem>>, vector<1x128xf32>
      %14 = vector.broadcast %13 : vector<1x128xf32> to vector<2x128xf32>
      %15 = arith.addf %12, %14 : vector<2x128xf32>
      %cst_13 = arith.constant 0.000000e+00 : f32
      %16 = vector.broadcast %cst_13 : f32 to vector<2x128xf32>
      %17 = arith.subf %16, %15 : vector<2x128xf32>
      %18 = math.exp %17 : vector<2x128xf32>
      %cst_14 = arith.constant 1.000000e+00 : f32
      %19 = vector.broadcast %cst_14 : f32 to vector<2x128xf32>
      %20 = arith.addf %19, %18 : vector<2x128xf32>
      %21 = tpu.reciprocal %20 {approx = true} : vector<2x128xf32> -> vector<2x128xf32>
      %cst_15 = arith.constant 1.000000e+00 : f32
      %22 = vector.broadcast %cst_15 : f32 to vector<2x128xf32>
      %23 = arith.minimumf %21, %22 : vector<2x128xf32>
      %c0_16 = arith.constant 0 : index
      %c0_17 = arith.constant 0 : index
      %24 = vector.load %arg4[%c0_16, %c0_17] : memref<2x128xf32, #tpu.memory_space<vmem>>, vector<2x128xf32>
      tpu.vector_store %arg4[%c0_16, %c0_17], %23 {strides = array<i32>} : memref<2x128xf32, #tpu.memory_space<vmem>>, vector<2x128xf32>,
    } else {
    }
    return
  }
  func.func @transform_0(%arg0: i32) -> (i32, i32) {
    %c0_i32 = arith.constant 0 : i32
    %c0_i32_0 = arith.constant 0 : i32
    return %c0_i32, %arg0 : i32, i32
  }
  func.func @transform_1(%arg0: i32) -> (i32, i32) {
    %c0_i32 = arith.constant 0 : i32
    %c0_i32_0 = arith.constant 0 : i32
    return %arg0, %c0_i32 : i32, i32
  }
  func.func @transform_2(%arg0: i32) -> (i32, i32) {
    %c0_i32 = arith.constant 0 : i32
    %c0_i32_0 = arith.constant 0 : i32
    %c0_i32_1 = arith.constant 0 : i32
    return %c0_i32, %c0_i32_0 : i32, i32
  }
  func.func @transform_3(%arg0: i32) -> (i32, i32) {
    %c0_i32 = arith.constant 0 : i32
    %c0_i32_0 = arith.constant 0 : i32
    %c0_i32_1 = arith.constant 0 : i32
    return %c0_i32, %c0_i32_0 : i32, i32
  }
}

</mosaic_0001>

<bundles_post_ra>
// kernel: encoder_forward.3
= control target key start
LH: loop header
LB: loop body
LE: loop exit
PB: predicated region body
PF: predicated region fallthrough
CT: control target
= control target key end

     0   :  { %10 = vsyncpa [#allocation3], 0  ;;  %s3216_s0 = inlined_call_operand.vmem [shape: bf16[392,9], index: 0, kind: input, shape index: {}]   ;;  %s3217_s1 = inlined_call_operand.hbm [shape: bf16[9,128], index: 1, kind: input, shape index: {}]   ;;  %s3218_s2 = inlined_call_operand.hbm [shape: f32[1,128], index: 2, kind: input, shape index: {}]   ;;  %s3219_s3 = inlined_call_operand.hbm [shape: f32[1,128], index: 3, kind: input, shape index: {}]   ;;  %s3220_s4 = inlined_call_operand.hbm [shape: f32[1,128], index: 4, kind: input, shape index: {}]   ;;  %s3221_s5 = inlined_call_operand.vmem [shape: bf16[392,128], index: 5, kind: output, shape index: {}]  }
   0x1   :  { %11 = vsyncpa [#allocation5], 0 }
   0x2   :  { %12 = vsyncpa [#allocation8], 0  ;;  %s1902_s18 = smov [#allocation4]   ;;  %s1903_s20 = smov [#allocation2]  }
   0x3   :  { %s33_s19 = sshll.u32 %s1902_s18, 4  ;;  %s20_s21 = sshll.u32 %s1903_s20, 4  ;;  %s34_s19 = int_to_ptr.vmem [resolvable:$true] %s33_s19  ;;  %s1941_s21 = int_to_ptr.vmem [resolvable:$true] %s20_s21 }
   0x4   :  { %s1808_s24 = scalar_lea.hbm %s3218_s2, 16 }
   0x5   :  { %p1809_p0 = scmp.ne.s32.totalorder %s3218_s2, %s1808_s24  ;;  %p1812_p1 = scmp.lt.u32.totalorder %s1808_s24, %s3218_s2 }
   0x7   :  { %p1814_p2 = pnand %p1812_p1, %p1809_p0 }
   0x9   :  { %1817 = shalt.err (!%p1814_p2)
}
   0xa   :  { %s1818_s29 = scalar_lea.vmem %s34_s19, 16  ;;  %s1822_s30 = scalar_lea.vmem %s34_s19, 32 }
   0xb   :  { %p1819_p3 = scmp.ne.s32.totalorder %s34_s19, %s1818_s29  ;;  %p1823_p4 = scmp.lt.s32.totalorder %s34_s19, %s34_s19 }
   0xc   :  { %p1824_p5 = scmp.lt.s32.totalorder %s1822_s30, %s1818_s29 }
   0xe   :  { %p1825_p6 = por %p1824_p5, %p1823_p4 }
  0x10   :  { %p1826_p7 = pnand %p1825_p6, %p1819_p3 }
  0x12   :  { %1829 = shalt.err (!%p1826_p7)
}
  0x13   :  { %36 = dma.hbm_to_vmem [thread:$0]  %s3218_s2, 16, %s34_s19, [#allocation5]  }
  0x14   :  { %s1830_s10 = scalar_lea.hbm %s3217_s1, 128 }
  0x15   :  { %p1831_p8 = scmp.ne.s32.totalorder %s3217_s1, %s1830_s10  ;;  %p1834_p9 = scmp.lt.u32.totalorder %s1830_s10, %s3217_s1 }
  0x17   :  { %p1836_p10 = pnand %p1834_p9, %p1831_p8 }
  0x19   :  { %1839 = shalt.err (!%p1836_p10)
}
  0x1a   :  { %s1840_s15 = scalar_lea.vmem %s1941_s21, 128  ;;  %p1845_p12 = scmp.lt.s32.totalorder %s1941_s21, %s1941_s21 }
  0x1b   :  { %p1841_p11 = scmp.ne.s32.totalorder %s1941_s21, %s1840_s15  ;;  %p1846_p13 = scmp.lt.s32.totalorder %s1840_s15, %s1840_s15 }
  0x1d   :  { %p1847_p0 = por %p1846_p13, %p1845_p12 }
  0x1f   :  { %p1848_p1 = pnand %p1847_p0, %p1841_p11 }
  0x21   :  { %1851 = shalt.err (!%p1848_p1)
}
  0x22   :  { %s1904_s2 = smov 64   ;;  %s1905_s16 = smov 4  }
  0x23   :  { %26 = dma.hbm_to_vmem [thread:$0]  %s3217_s1, 128, %s1941_s21, [#allocation3], %s1904_s2, %s1904_s2, %s1905_s16  }
  0x24   :  { %s1906_s19 = smov [#allocation6]   ;;  %s1907_s22 = smov [#allocation7]  }
  0x25   :  { %s43_s20 = sshll.u32 %s1906_s19, 4  ;;  %s53_s23 = sshll.u32 %s1907_s22, 4  ;;  %s44_s20 = int_to_ptr.vmem [resolvable:$true] %s43_s20  ;;  %s54_s23 = int_to_ptr.vmem [resolvable:$true] %s53_s23 }
  0x26   :  { %s1852_s26 = scalar_lea.hbm %s3219_s3, 16 }
  0x27   :  { %p1853_p2 = scmp.ne.s32.totalorder %s3219_s3, %s1852_s26  ;;  %p1856_p3 = scmp.lt.u32.totalorder %s1852_s26, %s3219_s3 }
  0x29   :  { %p1858_p4 = pnand %p1856_p3, %p1853_p2 }
  0x2b   :  { %1861 = shalt.err (!%p1858_p4)
}
  0x2c   :  { %s1862_s1 = scalar_lea.vmem %s44_s20, 16  ;;  %s1866_s21 = scalar_lea.vmem %s44_s20, 32 }
  0x2d   :  { %p1863_p5 = scmp.ne.s32.totalorder %s44_s20, %s1862_s1  ;;  %p1867_p6 = scmp.lt.s32.totalorder %s44_s20, %s44_s20 }
  0x2e   :  { %p1868_p7 = scmp.lt.s32.totalorder %s1866_s21, %s1862_s1 }
  0x30   :  { %p1869_p8 = por %p1868_p7, %p1867_p6 }
  0x32   :  { %p1870_p9 = pnand %p1869_p8, %p1863_p5 }
  0x34   :  { %1873 = shalt.err (!%p1870_p9)
}
  0x35   :  { %46 = dma.hbm_to_vmem [thread:$0]  %s3219_s3, 16, %s44_s20, [#allocation5]  }
  0x36   :  { %s1874_s10 = scalar_lea.hbm %s3220_s4, 16 }
  0x37   :  { %p1875_p10 = scmp.ne.s32.totalorder %s3220_s4, %s1874_s10  ;;  %p1878_p11 = scmp.lt.u32.totalorder %s1874_s10, %s3220_s4 }
  0x39   :  { %p1880_p12 = pnand %p1878_p11, %p1875_p10 }
  0x3b   :  { %1883 = shalt.err (!%p1880_p12)
}
  0x3c   :  { %s1884_s15 = scalar_lea.vmem %s54_s23, 16  ;;  %s1888_s2 = scalar_lea.vmem %s54_s23, 32 }
  0x3d   :  { %p1885_p13 = scmp.ne.s32.totalorder %s54_s23, %s1884_s15  ;;  %p1889_p0 = scmp.lt.s32.totalorder %s54_s23, %s54_s23 }
  0x3e   :  { %p1890_p1 = scmp.lt.s32.totalorder %s1888_s2, %s1884_s15 }
  0x40   :  { %p1891_p2 = por %p1890_p1, %p1889_p0 }
  0x42   :  { %p1892_p3 = pnand %p1891_p2, %p1885_p13 }
  0x44   :  { %1895 = shalt.err (!%p1892_p3)
}
  0x45   :  { %56 = dma.hbm_to_vmem [thread:$0]  %s3220_s4, 16, %s54_s23, [#allocation8]  }
  0x46   :  { %1896 = dma.done.wait [#allocation3], 128  }
  0x47   :  { %1897 = vsyncadd [#allocation3], 4294967168 }
  0x48   :  { %1898 = dma.done.wait [#allocation5], 32  }
  0x49   :  { %1899 = vsyncadd [#allocation5], 4294967264 }
  0x4a   :  { %1900 = dma.done.wait [#allocation8], 16  }
  0x4b   :  { %1901 = vsyncadd [#allocation8], 4294967280  ;;  %vm332_vm0 = vcmask 1043456   ;;  %v1908_v0 = vmov 0.0   ;;  %vm1909_vm1 = vmmov 0   ;;  %vm333_vm2 = vcmask 1044480  }
  0x4c   :  { %1667 = vmatprep.subr.bf16.mxu0 %v1908_v0  ;;  %1769 = vmatprep.subr.bf16.mxu1 %v1908_v0  ;;  %v1910_v1 = vmov 65535   ;;  %v1780_v4 = vld [vmem:[#allocation2] sm:$0x1f]   ;;  %vm256_vm3 = vcmask 72704   ;;  %v1788_v7 = vld [vmem:[%s3216_s0 + $0x68] sm:$0xff]   ;;  %v1790_v9 = vld [vmem:[%s3216_s0 + $0x70] sm:$0xff]  }
  0x4d   :  { %1669 = vmatprep.mubr.msk.bf16.mxu0 %vm1909_vm1, %v1908_v0  ;;  %1721 = vmatprep.mubr.msk.bf16.mxu1 %vm1909_vm1, %v1908_v0  ;;  %v334_v2 = vsel %vm332_vm0, 4294967295, %v1910_v1  ;;  %v1781_v6 = vld [vmem:[%s3216_s0] sm:$0xff]   ;;  %v1782_v8 = vld [vmem:[%s3216_s0 + $0x8] sm:$0xff]   ;;  %v1783_v10 = vld [vmem:[%s3216_s0 + $0x10] sm:$0xff]  }
  0x4e   :  { %v335_v3 = vsel %vm333_vm2, %v334_v2, 0  ;;  %v1792_v11 = vld [vmem:[%s3216_s0 + $0x78] sm:$0xff]   ;;  %v1794_v13 = vld [vmem:[%s3216_s0 + $0x80] sm:$0xff]   ;;  %v1796_v15 = vld [vmem:[%s3216_s0 + $0x88] sm:$0xff]  }
  0x4f   :  { %v337_v5 = vand.u32 %v1780_v4, %v335_v3  ;;  %v1784_v12 = vld [vmem:[%s3216_s0 + $0x18] sm:$0xff]   ;;  %v1785_v14 = vld [vmem:[%s3216_s0 + $0x20] sm:$0xff]   ;;  %v1786_v16 = vld [vmem:[%s3216_s0 + $0x28] sm:$0xff]  }
  0x50   :  { %v1798_v17 = vld [vmem:[%s3216_s0 + $0x90] sm:$0xff]   ;;  %v1800_v19 = vld [vmem:[%s3216_s0 + $0x98] sm:$0xff]   ;;  %v1801_v21 = vld [vmem:[%s3216_s0 + $0xa0] sm:$0xff]  }
  0x51   :  { %1668 = vmatpush3.bf16.msra.mxu0 %v337_v5  ;;  %1770 = vmatpush3.bf16.msra.mxu1 %v337_v5  ;;  %v1787_v18 = vld [vmem:[%s3216_s0 + $0x30] sm:$0xff]   ;;  %v1789_v20 = vld [vmem:[%s3216_s0 + $0x38] sm:$0xff]   ;;  %v1791_v22 = vld [vmem:[%s3216_s0 + $0x40] sm:$0xff]  }
  0x52   :  { %v1802_v23 = vld [vmem:[%s3216_s0 + $0xa8] sm:$0xff]   ;;  %v1803_v25 = vld [vmem:[%s3216_s0 + $0xb0] sm:$0xff]   ;;  %v1804_v27 = vld [vmem:[%s3216_s0 + $0xb8] sm:$0xff]  }
  0x53   :  { %v1793_v24 = vld [vmem:[%s3216_s0 + $0x48] sm:$0xff]   ;;  %v1795_v26 = vld [vmem:[%s3216_s0 + $0x50] sm:$0xff]   ;;  %v1797_v28 = vld [vmem:[%s3216_s0 + $0x58] sm:$0xff]  }
  0x54   :  { %1670 = vmatmul.mubr.msk.bf16.vlgmr.msra.gmra.mrb[0].mxu0 %vm256_vm3, %v1781_v6  ;;  %1722 = vmatmul.mubr.msk.bf16.vlgmr.msra.gmra.mrb[0].mxu1 %vm256_vm3, %v1788_v7  ;;  %v1805_v29 = vld [vmem:[%s3216_s0 + $0xc0] ss:$0 sps:$4 sm:$0xff]   ;;  %v2160_v55 = vld [vmem:[#allocation4] ss:$0 sm:$0xff] }
  0x55   :  { %1673 = vmatprep.mubr.msk.bf16.mxu0 %vm1909_vm1, %v1908_v0  ;;  %1725 = vmatprep.mubr.msk.bf16.mxu1 %vm1909_vm1, %v1908_v0  ;;  %v1799_v30 = vld [vmem:[%s3216_s0 + $0x60] sm:$0xff]  }
  0x5c   :  { %1674 = vmatmul.mubr.msk.bf16.gmra.mrb[4].mxu0 %vm256_vm3, %v1782_v8  ;;  %1726 = vmatmul.mubr.msk.bf16.gmra.mrb[4].mxu1 %vm256_vm3, %v1790_v9 }
  0x5d   :  { %1677 = vmatprep.mubr.msk.bf16.mxu0 %vm1909_vm1, %v1908_v0  ;;  %1729 = vmatprep.mubr.msk.bf16.mxu1 %vm1909_vm1, %v1908_v0 }
  0x64   :  { %1678 = vmatmul.mubr.msk.bf16.gmra.mrb[8].mxu0 %vm256_vm3, %v1783_v10  ;;  %1730 = vmatmul.mubr.msk.bf16.gmra.mrb[8].mxu1 %vm256_vm3, %v1792_v11 }
  0x65   :  { %1681 = vmatprep.mubr.msk.bf16.mxu0 %vm1909_vm1, %v1908_v0  ;;  %1733 = vmatprep.mubr.msk.bf16.mxu1 %vm1909_vm1, %v1908_v0 }
  0x6c   :  { %1682 = vmatmul.mubr.msk.bf16.gmra.mrb[12].mxu0 %vm256_vm3, %v1784_v12  ;;  %1734 = vmatmul.mubr.msk.bf16.gmra.mrb[12].mxu1 %vm256_vm3, %v1794_v13 }
  0x6d   :  { %1685 = vmatprep.mubr.msk.bf16.mxu0 %vm1909_vm1, %v1908_v0  ;;  %1737 = vmatprep.mubr.msk.bf16.mxu1 %vm1909_vm1, %v1908_v0 }
  0x74   :  { %1686 = vmatmul.mubr.msk.bf16.gmra.mrb[16].mxu0 %vm256_vm3, %v1785_v14  ;;  %1738 = vmatmul.mubr.msk.bf16.gmra.mrb[16].mxu1 %vm256_vm3, %v1796_v15 }
  0x75   :  { %1689 = vmatprep.mubr.msk.bf16.mxu0 %vm1909_vm1, %v1908_v0  ;;  %1741 = vmatprep.mubr.msk.bf16.mxu1 %vm1909_vm1, %v1908_v0 }
  0x7c   :  { %1690 = vmatmul.mubr.msk.bf16.gmra.mrb[20].mxu0 %vm256_vm3, %v1786_v16  ;;  %1742 = vmatmul.mubr.msk.bf16.gmra.mrb[20].mxu1 %vm256_vm3, %v1798_v17 }
  0x7d   :  { %1693 = vmatprep.mubr.msk.bf16.mxu0 %vm1909_vm1, %v1908_v0  ;;  %1745 = vmatprep.mubr.msk.bf16.mxu1 %vm1909_vm1, %v1908_v0 }
  0x84   :  { %1694 = vmatmul.mubr.msk.bf16.gmra.mrb[24].mxu0 %vm256_vm3, %v1787_v18  ;;  %1746 = vmatmul.mubr.msk.bf16.gmra.mrb[24].mxu1 %vm256_vm3, %v1800_v19 }
  0x85   :  { %1697 = vmatprep.mubr.msk.bf16.mxu0 %vm1909_vm1, %v1908_v0  ;;  %1749 = vmatprep.mubr.msk.bf16.mxu1 %vm1909_vm1, %v1908_v0 }
  0x8c   :  { %1698 = vmatmul.mubr.msk.bf16.gmra.mrb[28].mxu0 %vm256_vm3, %v1789_v20  ;;  %1750 = vmatmul.mubr.msk.bf16.gmra.mrb[28].mxu1 %vm256_vm3, %v1801_v21 }
  0x8d   :  { %1701 = vmatprep.mubr.msk.bf16.mxu0 %vm1909_vm1, %v1908_v0  ;;  %1753 = vmatprep.mubr.msk.bf16.mxu1 %vm1909_vm1, %v1908_v0 }
  0x94   :  { %1702 = vmatmul.mubr.msk.bf16.gmra.mrb[32].mxu0 %vm256_vm3, %v1791_v22  ;;  %1754 = vmatmul.mubr.msk.bf16.gmra.mrb[32].mxu1 %vm256_vm3, %v1802_v23 }
  0x95   :  { %1705 = vmatprep.mubr.msk.bf16.mxu0 %vm1909_vm1, %v1908_v0  ;;  %1757 = vmatprep.mubr.msk.bf16.mxu1 %vm1909_vm1, %v1908_v0 }
  0x9c   :  { %1706 = vmatmul.mubr.msk.bf16.gmra.mrb[36].mxu0 %vm256_vm3, %v1793_v24  ;;  %1758 = vmatmul.mubr.msk.bf16.gmra.mrb[36].mxu1 %vm256_vm3, %v1803_v25 }
  0x9d   :  { %1709 = vmatprep.mubr.msk.bf16.mxu0 %vm1909_vm1, %v1908_v0  ;;  %1761 = vmatprep.mubr.msk.bf16.mxu1 %vm1909_vm1, %v1908_v0 }
  0xa4   :  { %1710 = vmatmul.mubr.msk.bf16.gmra.mrb[40].mxu0 %vm256_vm3, %v1795_v26  ;;  %1762 = vmatmul.mubr.msk.bf16.gmra.mrb[40].mxu1 %vm256_vm3, %v1804_v27 }
  0xa5   :  { %1713 = vmatprep.mubr.msk.bf16.mxu0 %vm1909_vm1, %v1908_v0  ;;  %1765 = vmatprep.mubr.msk.bf16.mxu1 %vm1909_vm1, %v1908_v0 }
  0xac   :  { %1714 = vmatmul.mubr.msk.bf16.gmra.mrb[44].mxu0 %vm256_vm3, %v1797_v28  ;;  %1766 = vmatmul.mubr.msk.bf16.gmra.mrb[44].mxu1 %vm256_vm3, %v1805_v29 }
  0xad   :  { %1717 = vmatprep.mubr.msk.bf16.mxu0 %vm1909_vm1, %v1908_v0 }
  0xb4   :  { %1718 = vmatmul.mubr.msk.bf16.gmra.mrb[48].mxu0 %vm256_vm3, %v1799_v30 }
 0x127   :  { %v373_v31 = vpop.f32.mrb[0].mxu0  ;;  %v2148_v35 = vpop.f32.mrb[0].mxu1 }
 0x128   :  { %v1671_v32 = vpop.f32.mrb[1].mxu0  ;;  %v1723_v36 = vpop.f32.mrb[1].mxu1  ;;  %v2166_v60 = vadd.f32 %v2160_v55, %v373_v31 }
 0x129   :  { %v376_v33 = vpop.f32.mrb[2].mxu0  ;;  %v2150_v37 = vpop.f32.mrb[2].mxu1 }
 0x12a   :  { %v1672_v34 = vpop.f32.mrb[3].mxu0  ;;  %v1724_v38 = vpop.f32.mrb[3].mxu1  ;;  %v2163_v57 = vadd.f32 %v2160_v55, %v376_v33  ;;  %v627_v4 = vmul.f32 %v2166_v60, %v2166_v60 }
 0x12c   :  { %v628_v1 = vmul.f32 %v2163_v57, %v2163_v57  ;;  %v571_v5 = vadd.f32 %v2163_v57, %v2166_v60 }
 0x12e   :  { %v676_v9 = vadd.f32 %v628_v1, %v627_v4 }
 0x12f   :  { %v381_v39 = vpop.f32.mrb[4].mxu0  ;;  %v2152_v43 = vpop.f32.mrb[4].mxu1 }
 0x130   :  { %v1675_v40 = vpop.f32.mrb[5].mxu0  ;;  %v1727_v44 = vpop.f32.mrb[5].mxu1  ;;  %v2169_v61 = vadd.f32 %v2160_v55, %v381_v39 }
 0x131   :  { %v384_v41 = vpop.f32.mrb[6].mxu0  ;;  %v2154_v45 = vpop.f32.mrb[6].mxu1 }
 0x132   :  { %v1676_v42 = vpop.f32.mrb[7].mxu0  ;;  %v1728_v46 = vpop.f32.mrb[7].mxu1  ;;  %v629_v6 = vmul.f32 %v2169_v61, %v2169_v61  ;;  %v2184_v7 = vadd.f32 %v2160_v55, %v384_v41  ;;  %v572_v10 = vadd.f32 %v571_v5, %v2169_v61 }
 0x134   :  { %v677_v14 = vadd.f32 %v676_v9, %v629_v6  ;;  %v630_v15 = vmul.f32 %v2184_v7, %v2184_v7  ;;  %v573_v19 = vadd.f32 %v572_v10, %v2184_v7 }
 0x136   :  { %v678_v24 = vadd.f32 %v677_v14, %v630_v15 }
 0x137   :  { %v389_v47 = vpop.f32.mrb[8].mxu0  ;;  %v2156_v51 = vpop.f32.mrb[8].mxu1 }
 0x138   :  { %v1679_v48 = vpop.f32.mrb[9].mxu0  ;;  %v1731_v52 = vpop.f32.mrb[9].mxu1  ;;  %v2188_v11 = vadd.f32 %v2160_v55, %v389_v47 }
 0x139   :  { %v392_v49 = vpop.f32.mrb[10].mxu0  ;;  %v2158_v53 = vpop.f32.mrb[10].mxu1 }
 0x13a   :  { %v1680_v50 = vpop.f32.mrb[11].mxu0  ;;  %v1732_v54 = vpop.f32.mrb[11].mxu1  ;;  %v631_v20 = vmul.f32 %v2188_v11, %v2188_v11  ;;  %v2198_v21 = vadd.f32 %v2160_v55, %v392_v49  ;;  %v574_v25 = vadd.f32 %v573_v19, %v2188_v11 }
 0x13c   :  { %v679_v28 = vadd.f32 %v678_v24, %v631_v20  ;;  %v632_v29 = vmul.f32 %v2198_v21, %v2198_v21  ;;  %v575_v32 = vadd.f32 %v574_v25, %v2198_v21 }
 0x13e   :  { %v680_v40 = vadd.f32 %v679_v28, %v632_v29 }
 0x13f   :  { %v397_v56 = vpop.f32.mrb[12].mxu0  ;;  %v2171_v63 = vpop.f32.mrb[12].mxu1 }
 0x140   :  { %v1683_v58 = vpop.f32.mrb[13].mxu0  ;;  %v1735_v0 = vpop.f32.mrb[13].mxu1  ;;  %v2204_v26 = vadd.f32 %v2160_v55, %v397_v56 }
 0x141   :  { %v400_v59 = vpop.f32.mrb[14].mxu0  ;;  %v2175_v2 = vpop.f32.mrb[14].mxu1 }
 0x142   :  { %v1684_v62 = vpop.f32.mrb[15].mxu0  ;;  %v1736_v3 = vpop.f32.mrb[15].mxu1  ;;  %v633_v33 = vmul.f32 %v2204_v26, %v2204_v26  ;;  %v2212_v34 = vadd.f32 %v2160_v55, %v400_v59  ;;  %v576_v41 = vadd.f32 %v575_v32, %v2204_v26 }
 0x144   :  { %v681_v47 = vadd.f32 %v680_v40, %v633_v33  ;;  %v634_v48 = vmul.f32 %v2212_v34, %v2212_v34  ;;  %v577_v50 = vadd.f32 %v576_v41, %v2212_v34 }
 0x146   :  { %v682_v59 = vadd.f32 %v681_v47, %v634_v48 }
 0x147   :  { %v405_v8 = vpop.f32.mrb[16].mxu0  ;;  %v2192_v17 = vpop.f32.mrb[16].mxu1 }
 0x148   :  { %v1687_v12 = vpop.f32.mrb[17].mxu0  ;;  %v1739_v18 = vpop.f32.mrb[17].mxu1  ;;  %v2218_v42 = vadd.f32 %v2160_v55, %v405_v8 }
 0x149   :  { %v408_v13 = vpop.f32.mrb[18].mxu0  ;;  %v2200_v22 = vpop.f32.mrb[18].mxu1 }
 0x14a   :  { %v1688_v16 = vpop.f32.mrb[19].mxu0  ;;  %v1740_v23 = vpop.f32.mrb[19].mxu1  ;;  %v635_v52 = vmul.f32 %v2218_v42, %v2218_v42  ;;  %v2228_v54 = vadd.f32 %v2160_v55, %v408_v13  ;;  %v578_v62 = vadd.f32 %v577_v50, %v2218_v42 }
 0x14c   :  { %v683_v5 = vadd.f32 %v682_v59, %v635_v52  ;;  %v636_v6 = vmul.f32 %v2228_v54, %v2228_v54  ;;  %v579_v10 = vadd.f32 %v578_v62, %v2228_v54 }
 0x14e   :  { %v684_v15 = vadd.f32 %v683_v5, %v636_v6 }
 0x14f   :  { %v413_v27 = vpop.f32.mrb[20].mxu0  ;;  %v2214_v38 = vpop.f32.mrb[20].mxu1 }
 0x150   :  { %v1691_v30 = vpop.f32.mrb[21].mxu0  ;;  %v1743_v39 = vpop.f32.mrb[21].mxu1  ;;  %v2232_v0 = vadd.f32 %v2160_v55, %v413_v27 }
 0x151   :  { %v416_v31 = vpop.f32.mrb[22].mxu0  ;;  %v2220_v44 = vpop.f32.mrb[22].mxu1 }
 0x152   :  { %v1692_v36 = vpop.f32.mrb[23].mxu0  ;;  %v1744_v46 = vpop.f32.mrb[23].mxu1  ;;  %v637_v12 = vmul.f32 %v2232_v0, %v2232_v0  ;;  %v2244_v13 = vadd.f32 %v2160_v55, %v416_v31  ;;  %v580_v16 = vadd.f32 %v579_v10, %v2232_v0 }
 0x154   :  { %v685_v23 = vadd.f32 %v684_v15, %v637_v12  ;;  %v638_v24 = vmul.f32 %v2244_v13, %v2244_v13  ;;  %v581_v29 = vadd.f32 %v580_v16, %v2244_v13 }
 0x156   :  { %v686_v36 = vadd.f32 %v685_v23, %v638_v24 }
 0x157   :  { %v421_v49 = vpop.f32.mrb[24].mxu0  ;;  %v2234_v3 = vpop.f32.mrb[24].mxu1 }
 0x158   :  { %v1695_v56 = vpop.f32.mrb[25].mxu0  ;;  %v1747_v4 = vpop.f32.mrb[25].mxu1  ;;  %v2248_v18 = vadd.f32 %v2160_v55, %v421_v49 }
 0x159   :  { %v424_v58 = vpop.f32.mrb[26].mxu0  ;;  %v2238_v8 = vpop.f32.mrb[26].mxu1 }
 0x15a   :  { %v1696_v1 = vpop.f32.mrb[27].mxu0  ;;  %v1748_v9 = vpop.f32.mrb[27].mxu1  ;;  %v639_v30 = vmul.f32 %v2248_v18, %v2248_v18  ;;  %v2258_v31 = vadd.f32 %v2160_v55, %v424_v58  ;;  %v582_v39 = vadd.f32 %v581_v29, %v2248_v18 }
 0x15c   :  { %v687_v46 = vadd.f32 %v686_v36, %v639_v30  ;;  %v640_v47 = vmul.f32 %v2258_v31, %v2258_v31  ;;  %v583_v50 = vadd.f32 %v582_v39, %v2258_v31 }
 0x15e   :  { %v688_v1 = vadd.f32 %v687_v46, %v640_v47 }
 0x15f   :  { %v429_v14 = vpop.f32.mrb[28].mxu0  ;;  %v2252_v27 = vpop.f32.mrb[28].mxu1 }
 0x160   :  { %v1699_v19 = vpop.f32.mrb[29].mxu0  ;;  %v1751_v28 = vpop.f32.mrb[29].mxu1  ;;  %v2264_v40 = vadd.f32 %v2160_v55, %v429_v14 }
 0x161   :  { %v432_v20 = vpop.f32.mrb[30].mxu0  ;;  %v2260_v32 = vpop.f32.mrb[30].mxu1 }
 0x162   :  { %v1700_v25 = vpop.f32.mrb[31].mxu0  ;;  %v1752_v33 = vpop.f32.mrb[31].mxu1  ;;  %v641_v52 = vmul.f32 %v2264_v40, %v2264_v40  ;;  %v2272_v56 = vadd.f32 %v2160_v55, %v432_v20  ;;  %v584_v4 = vadd.f32 %v583_v50, %v2264_v40 }
 0x164   :  { %v689_v10 = vadd.f32 %v688_v1, %v641_v52  ;;  %v642_v12 = vmul.f32 %v2272_v56, %v2272_v56  ;;  %v585_v15 = vadd.f32 %v584_v4, %v2272_v56 }
 0x166   :  { %v690_v24 = vadd.f32 %v689_v10, %v642_v12 }
 0x167   :  { %v437_v41 = vpop.f32.mrb[32].mxu0  ;;  %v2274_v59 = vpop.f32.mrb[32].mxu1 }
 0x168   :  { %v1703_v48 = vpop.f32.mrb[33].mxu0  ;;  %v1755_v62 = vpop.f32.mrb[33].mxu1  ;;  %v2278_v5 = vadd.f32 %v2160_v55, %v437_v41 }
 0x169   :  { %v440_v49 = vpop.f32.mrb[34].mxu0  ;;  %v2280_v6 = vpop.f32.mrb[34].mxu1 }
 0x16a   :  { %v1704_v58 = vpop.f32.mrb[35].mxu0  ;;  %v1756_v9 = vpop.f32.mrb[35].mxu1  ;;  %v643_v16 = vmul.f32 %v2278_v5, %v2278_v5  ;;  %v2288_v19 = vadd.f32 %v2160_v55, %v440_v49  ;;  %v586_v25 = vadd.f32 %v585_v15, %v2278_v5 }
 0x16c   :  { %v691_v36 = vadd.f32 %v690_v24, %v643_v16  ;;  %v644_v39 = vmul.f32 %v2288_v19, %v2288_v19  ;;  %v587_v47 = vadd.f32 %v586_v25, %v2288_v19 }
 0x16e   :  { %v692_v52 = vadd.f32 %v691_v36, %v644_v39 }
 0x16f   :  { %v445_v14 = vpop.f32.mrb[36].mxu0  ;;  %v2294_v30 = vpop.f32.mrb[36].mxu1 }
 0x170   :  { %v1707_v20 = vpop.f32.mrb[37].mxu0  ;;  %v2292_v28 = vadd.f32 %v2160_v55, %v445_v14  ;;  %v1759_v33 = vpop.f32.mrb[37].mxu1 }
 0x171   :  { %v448_v23 = vpop.f32.mrb[38].mxu0  ;;  %v2298_v41 = vpop.f32.mrb[38].mxu1 }
 0x172   :  { %v1708_v29 = vpop.f32.mrb[39].mxu0  ;;  %v1760_v46 = vpop.f32.mrb[39].mxu1  ;;  %v645_v48 = vmul.f32 %v2292_v28, %v2292_v28  ;;  %v2304_v49 = vadd.f32 %v2160_v55, %v448_v23  ;;  %v588_v58 = vadd.f32 %v587_v47, %v2292_v28 }
 0x174   :  { %v693_v9 = vadd.f32 %v692_v52, %v645_v48  ;;  %v646_v10 = vmul.f32 %v2304_v49, %v2304_v49  ;;  %v589_v16 = vadd.f32 %v588_v58, %v2304_v49 }
 0x176   :  { %v694_v29 = vadd.f32 %v693_v9, %v646_v10 }
 0x177   :  { %v453_v50 = vpop.f32.mrb[40].mxu0  ;;  %v2312_v14 = vpop.f32.mrb[40].mxu1 }
 0x178   :  { %v2308_v62 = vadd.f32 %v2160_v55, %v453_v50  ;;  %v1711_v1 = vpop.f32.mrb[41].mxu0  ;;  %v1763_v15 = vpop.f32.mrb[41].mxu1 }
 0x179   :  { %v456_v4 = vpop.f32.mrb[42].mxu0  ;;  %v2320_v24 = vpop.f32.mrb[42].mxu1 }
 0x17a   :  { %v1712_v12 = vpop.f32.mrb[43].mxu0  ;;  %v647_v20 = vmul.f32 %v2308_v62, %v2308_v62  ;;  %v2318_v23 = vadd.f32 %v2160_v55, %v456_v4  ;;  %v1764_v25 = vpop.f32.mrb[43].mxu1  ;;  %v590_v33 = vadd.f32 %v589_v16, %v2308_v62 }
 0x17c   :  { %v695_v39 = vadd.f32 %v694_v29, %v647_v20  ;;  %v648_v46 = vmul.f32 %v2318_v23, %v2318_v23  ;;  %v591_v52 = vadd.f32 %v590_v33, %v2318_v23 }
 0x17e   :  { %v696_v12 = vadd.f32 %v695_v39, %v648_v46 }
 0x17f   :  { %v461_v36 = vpop.f32.mrb[44].mxu0  ;;  %v2334_v9 = vpop.f32.mrb[44].mxu1 }
 0x180   :  { %v2326_v47 = vadd.f32 %v2160_v55, %v461_v36  ;;  %v1715_v48 = vpop.f32.mrb[45].mxu0  ;;  %v1767_v10 = vpop.f32.mrb[45].mxu1 }
 0x181   :  { %v464_v50 = vpop.f32.mrb[46].mxu0  ;;  %v568_v16 = vpop.f32.mrb[46].mxu1 }
 0x182   :  { %v649_v58 = vmul.f32 %v2326_v47, %v2326_v47  ;;  %v2332_v1 = vadd.f32 %v2160_v55, %v464_v50  ;;  %v1716_v4 = vpop.f32.mrb[47].mxu0  ;;  %v592_v15 = vadd.f32 %v591_v52, %v2326_v47  ;;  %v1768_v20 = vpop.f32.mrb[47].mxu1 }
 0x183   :  { %v2345_v4 = vadd.f32 %v2160_v55, %v2148_v35 }
 0x184   :  { %v697_v25 = vadd.f32 %v696_v12, %v649_v58  ;;  %v650_v29 = vmul.f32 %v2332_v1, %v2332_v1  ;;  %v593_v36 = vadd.f32 %v592_v15, %v2332_v1  ;;  %v2355_v15 = vadd.f32 %v2160_v55, %v2150_v37 }
 0x186   :  { %v698_v46 = vadd.f32 %v697_v25, %v650_v29  ;;  %v653_v25 = vmul.f32 %v2345_v4, %v2345_v4  ;;  %v2364_v29 = vadd.f32 %v2160_v55, %v2152_v43  ;;  %v654_v37 = vmul.f32 %v2355_v15, %v2355_v15 }
 0x187   :  { %v469_v33 = vpop.f32.mrb[48].mxu0  ;;  %v2378_v43 = vadd.f32 %v2160_v55, %v2156_v51  ;;  %v2392_v51 = vadd.f32 %v2160_v55, %v2171_v63  ;;  %v2406_v63 = vadd.f32 %v2160_v55, %v2192_v17  ;;  %v2420_v17 = vadd.f32 %v2160_v55, %v2214_v38 }
 0x188   :  { %v2341_v48 = vadd.f32 %v2160_v55, %v469_v33  ;;  %v1719_v50 = vpop.f32.mrb[49].mxu0  ;;  %v2434_v38 = vadd.f32 %v2160_v55, %v2234_v3 }
 0x189   :  { %v472_v39 = vpop.f32.mrb[50].mxu0  ;;  %v2371_v50 = vadd.f32 %v2160_v55, %v2154_v45  ;;  %3260 = vst [vmem:[#allocation13_spill] sm:$0xff] %v2378_v43  ;;  %v2385_v45 = vadd.f32 %v2160_v55, %v2158_v53  ;;  %3262 = vst [vmem:[#allocation15_spill] sm:$0xff] %v2392_v51  ;;  %v2399_v53 = vadd.f32 %v2160_v55, %v2175_v2 }
 0x18a   :  { %v594_v52 = vadd.f32 %v593_v36, %v2341_v48  ;;  %v651_v58 = vmul.f32 %v2341_v48, %v2341_v48  ;;  %v2351_v10 = vadd.f32 %v2160_v55, %v472_v39  ;;  %v1720_v12 = vpop.f32.mrb[51].mxu0  ;;  %3264 = vst [vmem:[#allocation17_spill] sm:$0xff] %v2406_v63  ;;  %v2413_v2 = vadd.f32 %v2160_v55, %v2200_v22 }
 0x18b   :  { %3259 = vst [vmem:[#allocation12_spill] sm:$0xff] %v2371_v50  ;;  %3261 = vst [vmem:[#allocation14_spill] sm:$0xff] %v2385_v45  ;;  %v2427_v22 = vadd.f32 %v2160_v55, %v2220_v44 }
 0x18c   :  { %v699_v16 = vadd.f32 %v698_v46, %v651_v58  ;;  %v595_v20 = vadd.f32 %v594_v52, %v2351_v10  ;;  %v652_v35 = vmul.f32 %v2351_v10, %v2351_v10  ;;  %v655_v52 = vmul.f32 %v2364_v29, %v2364_v29  ;;  %3263 = vst [vmem:[#allocation16_spill] sm:$0xff] %v2399_v53 }
 0x18e   :  { %v596_v33 = vadd.f32 %v595_v20, %v2345_v4  ;;  %v700_v36 = vadd.f32 %v699_v16, %v652_v35  ;;  %v656_v16 = vmul.f32 %v2371_v50, %v2371_v50 }
 0x190   :  { %v597_v39 = vadd.f32 %v596_v33, %v2355_v15  ;;  %v701_v46 = vadd.f32 %v700_v36, %v653_v25  ;;  %v657_v25 = vmul.f32 %v2378_v43, %v2378_v43 }
 0x192   :  { %v598_v58 = vadd.f32 %v597_v39, %v2364_v29  ;;  %v702_v12 = vadd.f32 %v701_v46, %v654_v37  ;;  %v658_v37 = vmul.f32 %v2385_v45, %v2385_v45 }
 0x194   :  { %v599_v20 = vadd.f32 %v598_v58, %v2371_v50  ;;  %v703_v35 = vadd.f32 %v702_v12, %v655_v52  ;;  %v659_v52 = vmul.f32 %v2392_v51, %v2392_v51 }
 0x196   :  { %v600_v33 = vadd.f32 %v599_v20, %v2378_v43  ;;  %v704_v36 = vadd.f32 %v703_v35, %v656_v16  ;;  %v660_v16 = vmul.f32 %v2399_v53, %v2399_v53 }
 0x198   :  { %v601_v39 = vadd.f32 %v600_v33, %v2385_v45  ;;  %v705_v46 = vadd.f32 %v704_v36, %v657_v25  ;;  %v661_v25 = vmul.f32 %v2406_v63, %v2406_v63 }
 0x19a   :  { %v706_v58 = vadd.f32 %v705_v46, %v658_v37  ;;  %v602_v12 = vadd.f32 %v601_v39, %v2392_v51  ;;  %v662_v37 = vmul.f32 %v2413_v2, %v2413_v2 }
 0x19c   :  { %v603_v20 = vadd.f32 %v602_v12, %v2399_v53  ;;  %v707_v35 = vadd.f32 %v706_v58, %v659_v52  ;;  %v663_v52 = vmul.f32 %v2420_v17, %v2420_v17 }
 0x19e   :  { %v604_v33 = vadd.f32 %v603_v20, %v2406_v63  ;;  %v708_v36 = vadd.f32 %v707_v35, %v660_v16  ;;  %v664_v16 = vmul.f32 %v2427_v22, %v2427_v22  ;;  %v2442_v35 = vadd.f32 %v2160_v55, %v2238_v8 }
 0x19f   :  { %v2456_v8 = vadd.f32 %v2160_v55, %v2260_v32  ;;  %v2470_v32 = vadd.f32 %v2160_v55, %v2280_v6 }
 0x1a0   :  { %v605_v39 = vadd.f32 %v604_v33, %v2413_v2  ;;  %v709_v46 = vadd.f32 %v708_v36, %v661_v25  ;;  %v665_v33 = vmul.f32 %v2434_v38, %v2434_v38  ;;  %v2449_v36 = vadd.f32 %v2160_v55, %v2252_v27 }
 0x1a1   :  { %v2463_v27 = vadd.f32 %v2160_v55, %v2274_v59  ;;  %3266 = vst [vmem:[#allocation19_spill] sm:$0xff] %v2470_v32  ;;  %v2477_v59 = vadd.f32 %v2160_v55, %v2294_v30  ;;  %v670_v6 = vmul.f32 %v2470_v32, %v2470_v32  ;;  %v2491_v30 = vadd.f32 %v2160_v55, %v2312_v14 }
 0x1a2   :  { %v606_v58 = vadd.f32 %v605_v39, %v2420_v17  ;;  %v710_v12 = vadd.f32 %v709_v46, %v662_v37  ;;  %v666_v46 = vmul.f32 %v2442_v35, %v2442_v35 }
 0x1a3   :  { %3265 = vst [vmem:[#allocation18_spill] sm:$0xff] %v2463_v27  ;;  %3267 = vst [vmem:[#allocation20_spill] sm:$0xff] %v2477_v59  ;;  %v673_v14 = vmul.f32 %v2491_v30, %v2491_v30 }
 0x1a4   :  { %v607_v20 = vadd.f32 %v606_v58, %v2427_v22  ;;  %v711_v44 = vadd.f32 %v710_v12, %v663_v52  ;;  %v667_v12 = vmul.f32 %v2449_v36, %v2449_v36  ;;  %3269 = vst [vmem:[#allocation22_spill] sm:$0xff] %v2491_v30 }
 0x1a6   :  { %v608_v25 = vadd.f32 %v607_v20, %v2434_v38  ;;  %v712_v3 = vadd.f32 %v711_v44, %v664_v16  ;;  %v668_v44 = vmul.f32 %v2456_v8, %v2456_v8 }
 0x1a8   :  { %v713_v37 = vadd.f32 %v712_v3, %v665_v33  ;;  %v609_v39 = vadd.f32 %v608_v25, %v2442_v35  ;;  %v669_v3 = vmul.f32 %v2463_v27, %v2463_v27 }
 0x1aa   :  { %v714_v52 = vadd.f32 %v713_v37, %v666_v46  ;;  %v610_v58 = vadd.f32 %v609_v39, %v2449_v36  ;;  %v2481_v37 = vadd.f32 %v2160_v55, %v2298_v41 }
 0x1ac   :  { %v715_v16 = vadd.f32 %v714_v52, %v667_v12  ;;  %v611_v20 = vadd.f32 %v610_v58, %v2456_v8  ;;  %3268 = vst [vmem:[#allocation21_spill] sm:$0xff] %v2481_v37  ;;  %v671_v12 = vmul.f32 %v2477_v59, %v2477_v59  ;;  %v672_v41 = vmul.f32 %v2481_v37, %v2481_v37 }
 0x1ae   :  { %v716_v25 = vadd.f32 %v715_v16, %v668_v44  ;;  %v612_v33 = vadd.f32 %v611_v20, %v2463_v27  ;;  %v2498_v44 = vadd.f32 %v2160_v55, %v2320_v24 }
 0x1b0   :  { %v717_v39 = vadd.f32 %v716_v25, %v669_v3  ;;  %v613_v46 = vadd.f32 %v612_v33, %v2470_v32  ;;  %3270 = vst [vmem:[#allocation23_spill] sm:$0xff] %v2498_v44  ;;  %v2502_v25 = vadd.f32 %v2160_v55, %v2334_v9 }
 0x1b2   :  { %v718_v52 = vadd.f32 %v717_v39, %v670_v6  ;;  %v614_v58 = vadd.f32 %v613_v46, %v2477_v59  ;;  %3271 = vst [vmem:[#allocation24_spill] sm:$0xff] %v2502_v25  ;;  %v674_v6 = vmul.f32 %v2498_v44, %v2498_v44  ;;  %v675_v24 = vmul.f32 %v2502_v25, %v2502_v25 }
 0x1b4   :  { %v719_v16 = vadd.f32 %v718_v52, %v671_v12  ;;  %v615_v20 = vadd.f32 %v614_v58, %v2481_v37 }
 0x1b6   :  { %v720_v33 = vadd.f32 %v719_v16, %v672_v41  ;;  %v616_v3 = vadd.f32 %v615_v20, %v2491_v30 }
 0x1b8   :  { %v721_v39 = vadd.f32 %v720_v33, %v673_v14  ;;  %v617_v46 = vadd.f32 %v616_v3, %v2498_v44 }
 0x1ba   :  { %v722_v52 = vadd.f32 %v721_v39, %v674_v6  ;;  %v618_v58 = vadd.f32 %v617_v46, %v2502_v25 }
 0x1bc   :  { %v619_v55 = vrot.slane %v618_v58, 4  ;;  %v723_v9 = vadd.f32 %v722_v52, %v675_v24 }
 0x1be   :  { %v620_v12 = vadd.f32 %v619_v55, %v618_v58  ;;  %v724_v41 = vrot.slane %v723_v9, 4 }
 0x1c0   :  { %v621_v16 = vrot.slane %v620_v12, 2  ;;  %v725_v20 = vadd.f32 %v724_v41, %v723_v9 }
 0x1c2   :  { %v622_v63 = vadd.f32 %v621_v16, %v620_v12  ;;  %v726_v53 = vrot.slane %v725_v20, 2 }
 0x1c4   :  { %v623_v33 = vrot.slane %v622_v63, 1  ;;  %v727_v14 = vadd.f32 %v726_v53, %v725_v20 }
 0x1c6   :  { %v624_v3 = vadd.f32 %v623_v33, %v622_v63  ;;  %v728_v51 = vrot.slane %v727_v14, 1 }
 0x1c8   :  { %v2513_v45 = vmul.f32 0.0025510204, %v624_v3  ;;  %v729_v43 = vadd.f32 %v728_v51, %v727_v14 }
 0x1ca   :  { %v730_v50 = vmul.f32 0.0025510204, %v729_v43  ;;  %v731_v39 = vmul.f32 %v2513_v45, %v2513_v45  ;;  %v734_v14 = vsub.f32 %v2166_v60, %v2513_v45  ;;  %v735_v3 = vsub.f32 %v2163_v57, %v2513_v45 }
 0x1cb   :  { %v738_v16 = vsub.f32 %v2188_v11, %v2513_v45  ;;  %v739_v20 = vsub.f32 %v2198_v21, %v2513_v45  ;;  %v741_v60 = vsub.f32 %v2212_v34, %v2513_v45  ;;  %v742_v57 = vsub.f32 %v2218_v42, %v2513_v45 }
 0x1cc   :  { %v732_v46 = vsub.f32 %v730_v50, %v731_v39  ;;  %v736_v39 = vsub.f32 %v2169_v61, %v2513_v45  ;;  %v743_v61 = vsub.f32 %v2228_v54, %v2513_v45  ;;  %v745_v11 = vsub.f32 %v2244_v13, %v2513_v45 }
 0x1cd   :  { %v746_v21 = vsub.f32 %v2248_v18, %v2513_v45  ;;  %v748_v34 = vsub.f32 %v2264_v40, %v2513_v45  ;;  %v749_v42 = vsub.f32 %v2272_v56, %v2513_v45  ;;  %v750_v54 = vsub.f32 %v2278_v5, %v2513_v45 }
 0x1ce   :  { %v733_v6 = vmax.f32 %v732_v46, 0.0  ;;  %v737_v46 = vsub.f32 %v2184_v7, %v2513_v45  ;;  %v744_v7 = vsub.f32 %v2232_v0, %v2513_v45  ;;  %v751_v0 = vsub.f32 %v2288_v19, %v2513_v45 }
 0x1cf   :  { %v752_v13 = vsub.f32 %v2292_v28, %v2513_v45  ;;  %v753_v18 = vsub.f32 %v2304_v49, %v2513_v45  ;;  %v755_v40 = vsub.f32 %v2318_v23, %v2513_v45  ;;  %v756_v56 = vsub.f32 %v2326_v47, %v2513_v45  ;;  %v3272_v47 = vld [vmem:[#allocation12_spill] sm:$0xff] }
 0x1d0   :  { %v783_v33 = vadd.f32 1e-05, %v733_v6  ;;  %v740_v6 = vsub.f32 %v2204_v26, %v2513_v45  ;;  %v747_v26 = vsub.f32 %v2258_v31, %v2513_v45  ;;  %v754_v31 = vsub.f32 %v2308_v62, %v2513_v45 }
 0x1d1   :  { %v757_v5 = vsub.f32 %v2332_v1, %v2513_v45  ;;  %v758_v19 = vsub.f32 %v2341_v48, %v2513_v45  ;;  %v759_v28 = vsub.f32 %v2351_v10, %v2513_v45  ;;  %v760_v49 = vsub.f32 %v2345_v4, %v2513_v45  ;;  %v3273_v1 = vld [vmem:[#allocation13_spill] sm:$0xff]  ;;  %v3274_v48 = vld [vmem:[#allocation14_spill] sm:$0xff]  ;;  %v3275_v10 = vld [vmem:[#allocation15_spill] sm:$0xff] }
 0x1d2   :  { %1806 = vrsqrt.f32 %v783_v33  ;;  %v761_v62 = vsub.f32 %v2355_v15, %v2513_v45  ;;  %v762_v23 = vsub.f32 %v2364_v29, %v2513_v45  ;;  %v763_v33 = vsub.f32 %v3272_v47, %v2513_v45  ;;  %v3276_v4 = vld [vmem:[#allocation16_spill] sm:$0xff]  ;;  %v3277_v15 = vld [vmem:[#allocation17_spill] sm:$0xff] }
 0x1d3   :  { %v764_v41 = vsub.f32 %v3273_v1, %v2513_v45  ;;  %v765_v9 = vsub.f32 %v3274_v48, %v2513_v45  ;;  %v766_v55 = vsub.f32 %v3275_v10, %v2513_v45  ;;  %v767_v58 = vsub.f32 %v3276_v4, %v2513_v45 }
 0x1d4   :  { %v768_v50 = vsub.f32 %v3277_v15, %v2513_v45 }
 0x1dc   :  { %v1807_v12 = vpop.eup %1806 }
 0x1dd   :  { %v785_v29 = vmul.f32 %v1807_v12, %v734_v14  ;;  %v786_v51 = vmul.f32 %v1807_v12, %v735_v3  ;;  %v787_v43 = vmul.f32 %v1807_v12, %v736_v39  ;;  %v788_v47 = vmul.f32 %v1807_v12, %v737_v46 }
 0x1de   :  { %v789_v63 = vmul.f32 %v1807_v12, %v738_v16  ;;  %v790_v53 = vmul.f32 %v1807_v12, %v739_v20  ;;  %v791_v1 = vmul.f32 %v1807_v12, %v740_v6  ;;  %v792_v52 = vmul.f32 %v1807_v12, %v741_v60 }
 0x1df   :  { %v793_v24 = vmul.f32 %v1807_v12, %v742_v57  ;;  %v794_v25 = vmul.f32 %v1807_v12, %v743_v61  ;;  %v795_v48 = vmul.f32 %v1807_v12, %v744_v7  ;;  %v796_v44 = vmul.f32 %v1807_v12, %v745_v11 }
 0x1e0   :  { %v797_v30 = vmul.f32 %v1807_v12, %v746_v21  ;;  %v798_v10 = vmul.f32 %v1807_v12, %v747_v26  ;;  %v799_v37 = vmul.f32 %v1807_v12, %v748_v34  ;;  %v800_v59 = vmul.f32 %v1807_v12, %v749_v42 }
 0x1e1   :  { %v801_v4 = vmul.f32 %v1807_v12, %v750_v54  ;;  %v802_v32 = vmul.f32 %v1807_v12, %v751_v0  ;;  %v803_v27 = vmul.f32 %v1807_v12, %v752_v13  ;;  %v804_v15 = vmul.f32 %v1807_v12, %v753_v18 }
 0x1e2   :  { %v805_v14 = vmul.f32 %v1807_v12, %v754_v31  ;;  %v806_v3 = vmul.f32 %v1807_v12, %v755_v40  ;;  %v807_v39 = vmul.f32 %v1807_v12, %v756_v56  ;;  %v808_v46 = vmul.f32 %v1807_v12, %v757_v5  ;;  %v3285_v56 = vld [vmem:[#allocation18_spill] sm:$0xff] }
 0x1e3   :  { %v809_v16 = vmul.f32 %v1807_v12, %v758_v19  ;;  %v810_v20 = vmul.f32 %v1807_v12, %v759_v28  ;;  %v811_v6 = vmul.f32 %v1807_v12, %v760_v49  ;;  %v812_v60 = vmul.f32 %v1807_v12, %v761_v62  ;;  %v3287_v19 = vld [vmem:[#allocation19_spill] sm:$0xff]  ;;  %v3289_v49 = vld [vmem:[#allocation20_spill] sm:$0xff] }
 0x1e4   :  { %v813_v57 = vmul.f32 %v1807_v12, %v762_v23  ;;  %v814_v61 = vmul.f32 %v1807_v12, %v763_v33  ;;  %v815_v7 = vmul.f32 %v1807_v12, %v764_v41  ;;  %v816_v11 = vmul.f32 %v1807_v12, %v765_v9  ;;  %v3291_v23 = vld [vmem:[#allocation21_spill] sm:$0xff] }
 0x1e5   :  { %v817_v21 = vmul.f32 %v1807_v12, %v766_v55  ;;  %v818_v26 = vmul.f32 %v1807_v12, %v767_v58  ;;  %v819_v34 = vmul.f32 %v1807_v12, %v768_v50  ;;  %v3278_v42 = vsub.f32 %v2413_v2, %v2513_v45 }
 0x1e6   :  { %v3279_v0 = vsub.f32 %v2420_v17, %v2513_v45  ;;  %v3280_v18 = vsub.f32 %v2427_v22, %v2513_v45  ;;  %v3281_v40 = vsub.f32 %v2434_v38, %v2513_v45  ;;  %v3282_v58 = vsub.f32 %v2442_v35, %v2513_v45 }
 0x1e7   :  { %v820_v54 = vmul.f32 %v1807_v12, %v3278_v42  ;;  %v3283_v2 = vsub.f32 %v2449_v36, %v2513_v45  ;;  %v3284_v17 = vsub.f32 %v2456_v8, %v2513_v45  ;;  %v3286_v22 = vsub.f32 %v3285_v56, %v2513_v45  ;;  %v3293_v42 = vld [vmem:[#allocation22_spill] sm:$0xff] }
 0x1e8   :  { %v821_v13 = vmul.f32 %v1807_v12, %v3279_v0  ;;  %v822_v31 = vmul.f32 %v1807_v12, %v3280_v18  ;;  %v823_v41 = vmul.f32 %v1807_v12, %v3281_v40  ;;  %v824_v50 = vmul.f32 %v1807_v12, %v3282_v58  ;;  %v3295_v18 = vld [vmem:[#allocation23_spill] sm:$0xff] }
 0x1e9   :  { %v825_v55 = vmul.f32 %v1807_v12, %v3283_v2  ;;  %v826_v9 = vmul.f32 %v1807_v12, %v3284_v17  ;;  %v827_v5 = vmul.f32 %v1807_v12, %v3286_v22  ;;  %v3288_v38 = vsub.f32 %v3287_v19, %v2513_v45  ;;  %v3297_v2 = vld [vmem:[#allocation24_spill] sm:$0xff]  ;;  %v1398_v22 = vld [vmem:[#allocation6] ss:$0 sm:$0xff] }
 0x1ea   :  { %v3290_v35 = vsub.f32 %v3289_v49, %v2513_v45  ;;  %v3292_v36 = vsub.f32 %v3291_v23, %v2513_v45  ;;  %v3294_v8 = vsub.f32 %v3293_v42, %v2513_v45  ;;  %v3296_v40 = vsub.f32 %v3295_v18, %v2513_v45 }
 0x1eb   :  { %v828_v28 = vmul.f32 %v1807_v12, %v3288_v38  ;;  %v3298_v17 = vsub.f32 %v3297_v2, %v2513_v45  ;;  %v841_v19 = vmul.f32 %v1398_v22, %v785_v29  ;;  %v842_v38 = vmul.f32 %v1398_v22, %v786_v51 }
 0x1ec   :  { %v829_v62 = vmul.f32 %v1807_v12, %v3290_v35  ;;  %v830_v33 = vmul.f32 %v1807_v12, %v3292_v36  ;;  %v831_v0 = vmul.f32 %v1807_v12, %v3294_v8  ;;  %v832_v58 = vmul.f32 %v1807_v12, %v3296_v40 }
 0x1ed   :  { %v833_v56 = vmul.f32 %v1807_v12, %v3298_v17  ;;  %v843_v49 = vmul.f32 %v1398_v22, %v787_v43  ;;  %v844_v35 = vmul.f32 %v1398_v22, %v788_v47  ;;  %v845_v23 = vmul.f32 %v1398_v22, %v789_v63 }
 0x1ee   :  { %v846_v36 = vmul.f32 %v1398_v22, %v790_v53  ;;  %v847_v42 = vmul.f32 %v1398_v22, %v791_v1  ;;  %v848_v8 = vmul.f32 %v1398_v22, %v792_v52  ;;  %v849_v18 = vmul.f32 %v1398_v22, %v793_v24 }
 0x1ef   :  { %v850_v40 = vmul.f32 %v1398_v22, %v794_v25  ;;  %v851_v2 = vmul.f32 %v1398_v22, %v795_v48  ;;  %v852_v45 = vmul.f32 %v1398_v22, %v796_v44  ;;  %v853_v12 = vmul.f32 %v1398_v22, %v797_v30 }
 0x1f0   :  { %v854_v17 = vmul.f32 %v1398_v22, %v798_v10  ;;  %v855_v29 = vmul.f32 %v1398_v22, %v799_v37  ;;  %v856_v51 = vmul.f32 %v1398_v22, %v800_v59  ;;  %v857_v43 = vmul.f32 %v1398_v22, %v801_v4 }
 0x1f1   :  { %v858_v47 = vmul.f32 %v1398_v22, %v802_v32  ;;  %v859_v63 = vmul.f32 %v1398_v22, %v803_v27  ;;  %v860_v53 = vmul.f32 %v1398_v22, %v804_v15  ;;  %v861_v1 = vmul.f32 %v1398_v22, %v805_v14 }
 0x1f2   :  { %v862_v52 = vmul.f32 %v1398_v22, %v806_v3  ;;  %v863_v24 = vmul.f32 %v1398_v22, %v807_v39  ;;  %v864_v25 = vmul.f32 %v1398_v22, %v808_v46  ;;  %v865_v48 = vmul.f32 %v1398_v22, %v809_v16 }
 0x1f3   :  { %v866_v44 = vmul.f32 %v1398_v22, %v810_v20  ;;  %v867_v30 = vmul.f32 %v1398_v22, %v811_v6  ;;  %v868_v10 = vmul.f32 %v1398_v22, %v812_v60  ;;  %v869_v37 = vmul.f32 %v1398_v22, %v813_v57  ;;  %v2657_v60 = vld [vmem:[#allocation7] ss:$0 sm:$0xff] }
 0x1f4   :  { %v870_v59 = vmul.f32 %v1398_v22, %v814_v61  ;;  %v871_v4 = vmul.f32 %v1398_v22, %v815_v7  ;;  %v872_v32 = vmul.f32 %v1398_v22, %v816_v11  ;;  %v873_v27 = vmul.f32 %v1398_v22, %v817_v21 }
 0x1f5   :  { %v874_v15 = vmul.f32 %v1398_v22, %v818_v26  ;;  %v875_v14 = vmul.f32 %v1398_v22, %v819_v34  ;;  %v876_v3 = vmul.f32 %v1398_v22, %v820_v54  ;;  %v877_v39 = vmul.f32 %v1398_v22, %v821_v13 }
 0x1f6   :  { %v878_v46 = vmul.f32 %v1398_v22, %v822_v31  ;;  %v879_v16 = vmul.f32 %v1398_v22, %v823_v41  ;;  %v880_v20 = vmul.f32 %v1398_v22, %v824_v50  ;;  %v881_v6 = vmul.f32 %v1398_v22, %v825_v55 }
 0x1f7   :  { %v882_v57 = vmul.f32 %v1398_v22, %v826_v9  ;;  %v883_v61 = vmul.f32 %v1398_v22, %v827_v5  ;;  %v884_v7 = vmul.f32 %v1398_v22, %v828_v28  ;;  %v885_v11 = vmul.f32 %v1398_v22, %v829_v62 }
 0x1f8   :  { %v886_v21 = vmul.f32 %v1398_v22, %v830_v33  ;;  %v887_v26 = vmul.f32 %v1398_v22, %v831_v0  ;;  %v888_v34 = vmul.f32 %v1398_v22, %v832_v58  ;;  %v889_v54 = vmul.f32 %v1398_v22, %v833_v56 }
 0x1f9   :  { %v2660_v13 = vadd.f32 %v2657_v60, %v841_v19  ;;  %v2663_v31 = vadd.f32 %v2657_v60, %v842_v38  ;;  %v2666_v41 = vadd.f32 %v2657_v60, %v843_v49  ;;  %v2669_v50 = vadd.f32 %v2657_v60, %v844_v35 }
 0x1fa   :  { %v2672_v55 = vadd.f32 %v2657_v60, %v845_v23  ;;  %v2675_v9 = vadd.f32 %v2657_v60, %v846_v36  ;;  %v2678_v5 = vadd.f32 %v2657_v60, %v847_v42  ;;  %v2681_v28 = vadd.f32 %v2657_v60, %v848_v8 }
 0x1fb   :  { %v2684_v62 = vadd.f32 %v2657_v60, %v849_v18  ;;  %v2687_v33 = vadd.f32 %v2657_v60, %v850_v40  ;;  %v2690_v0 = vadd.f32 %v2657_v60, %v851_v2  ;;  %v2693_v58 = vadd.f32 %v2657_v60, %v852_v45 }
 0x1fc   :  { %v2696_v56 = vadd.f32 %v2657_v60, %v853_v12  ;;  %v2699_v22 = vadd.f32 %v2657_v60, %v854_v17  ;;  %v2702_v19 = vadd.f32 %v2657_v60, %v855_v29  ;;  %v2705_v38 = vadd.f32 %v2657_v60, %v856_v51 }
 0x1fd   :  { %v2708_v49 = vadd.f32 %v2657_v60, %v857_v43  ;;  %v2711_v35 = vadd.f32 %v2657_v60, %v858_v47  ;;  %v2714_v23 = vadd.f32 %v2657_v60, %v859_v63  ;;  %v2717_v36 = vadd.f32 %v2657_v60, %v860_v53 }
 0x1fe   :  { %v2720_v42 = vadd.f32 %v2657_v60, %v861_v1  ;;  %v2723_v8 = vadd.f32 %v2657_v60, %v862_v52  ;;  %v2726_v18 = vadd.f32 %v2657_v60, %v863_v24  ;;  %v2729_v40 = vadd.f32 %v2657_v60, %v864_v25 }
 0x1ff   :  { %v2732_v2 = vadd.f32 %v2657_v60, %v865_v48  ;;  %v2735_v45 = vadd.f32 %v2657_v60, %v866_v44  ;;  %v2738_v12 = vadd.f32 %v2657_v60, %v867_v30  ;;  %v2741_v17 = vadd.f32 %v2657_v60, %v868_v10 }
 0x200   :  { %3299 = vst [vmem:[#allocation12_spill] sm:$0xff] %v2720_v42  ;;  %3300 = vst [vmem:[#allocation13_spill] sm:$0xff] %v2729_v40  ;;  %v2744_v29 = vadd.f32 %v2657_v60, %v869_v37  ;;  %v2747_v51 = vadd.f32 %v2657_v60, %v870_v59  ;;  %v2750_v43 = vadd.f32 %v2657_v60, %v871_v4  ;;  %vm946_vm4 = vcmp.ge.f32.partialorder %v2660_v13, 0.0 }
 0x201   :  { %3301 = vst [vmem:[#allocation14_spill] sm:$0xff] %v2738_v12  ;;  %v2753_v47 = vadd.f32 %v2657_v60, %v872_v32  ;;  %v2756_v63 = vadd.f32 %v2657_v60, %v873_v27  ;;  %v2759_v53 = vadd.f32 %v2657_v60, %v874_v15  ;;  %v2762_v1 = vadd.f32 %v2657_v60, %v875_v14 }
 0x202   :  { %3302 = vst [vmem:[#allocation15_spill] sm:$0xff] %v2747_v51  ;;  %v2765_v52 = vadd.f32 %v2657_v60, %v876_v3  ;;  %v2768_v24 = vadd.f32 %v2657_v60, %v877_v39  ;;  %v2771_v25 = vadd.f32 %v2657_v60, %v878_v46  ;;  %v2774_v48 = vadd.f32 %v2657_v60, %v879_v16 }
 0x203   :  { %v2777_v44 = vadd.f32 %v2657_v60, %v880_v20  ;;  %v2780_v30 = vadd.f32 %v2657_v60, %v881_v6  ;;  %v2783_v10 = vadd.f32 %v2657_v60, %v882_v57  ;;  %v2786_v37 = vadd.f32 %v2657_v60, %v883_v61 }
 0x204   :  { %3303 = vst [vmem:[#allocation16_spill] sm:$0xff] %v2765_v52  ;;  %3304 = vst [vmem:[#allocation17_spill] sm:$0xff] %v2768_v24  ;;  %v2789_v59 = vadd.f32 %v2657_v60, %v884_v7  ;;  %v2792_v4 = vadd.f32 %v2657_v60, %v885_v11  ;;  %v2795_v32 = vadd.f32 %v2657_v60, %v886_v21  ;;  %vm947_vm5 = vcmp.ge.f32.partialorder %v2663_v31, 0.0 }
 0x205   :  { %3305 = vst [vmem:[#allocation18_spill] sm:$0xff] %v2771_v25  ;;  %3306 = vst [vmem:[#allocation19_spill] sm:$0xff] %v2774_v48  ;;  %v2798_v27 = vadd.f32 %v2657_v60, %v887_v26  ;;  %vm948_vm6 = vcmp.ge.f32.partialorder %v2666_v41, 0.0  ;;  %vm949_vm7 = vcmp.ge.f32.partialorder %v2669_v50, 0.0  ;;  %vm950_vm8 = vcmp.ge.f32.partialorder %v2672_v55, 0.0 }
 0x206   :  { %3307 = vst [vmem:[#allocation20_spill] sm:$0xff] %v2777_v44  ;;  %3308 = vst [vmem:[#allocation21_spill] sm:$0xff] %v2780_v30  ;;  %vm951_vm9 = vcmp.ge.f32.partialorder %v2675_v9, 0.0  ;;  %vm952_vm10 = vcmp.ge.f32.partialorder %v2678_v5, 0.0  ;;  %vm953_vm11 = vcmp.ge.f32.partialorder %v2681_v28, 0.0  ;;  %vm954_vm12 = vcmp.ge.f32.partialorder %v2684_v62, 0.0 }
 0x207   :  { %3309 = vst [vmem:[#allocation22_spill] sm:$0xff] %v2783_v10  ;;  %v2810_v15 = vadd.f32 %v2657_v60, %v888_v34  ;;  %vm955_vm13 = vcmp.ge.f32.partialorder %v2687_v33, 0.0  ;;  %v995_v14 = vmul.f32 0.01, %v2660_v13  ;;  %v996_v3 = vmul.f32 0.01, %v2663_v31 }
 0x208   :  { %v997_v39 = vmul.f32 0.01, %v2666_v41  ;;  %v2817_v46 = vadd.f32 %v2657_v60, %v889_v54  ;;  %vm956_vm14 = vcmp.ge.f32.partialorder %v2690_v0, 0.0  ;;  %v998_v16 = vmul.f32 0.01, %v2669_v50 }
 0x209   :  { %3310 = vst [vmem:[#allocation23_spill] sm:$0xff] %v2810_v15  ;;  %v999_v20 = vmul.f32 0.01, %v2672_v55  ;;  %v1000_v6 = vmul.f32 0.01, %v2675_v9  ;;  %vm957_vm15 = vcmp.ge.f32.partialorder %v2693_v58, 0.0  ;;  %v2830_v60 = vsel %vm946_vm4, %v2660_v13, %v995_v14 }
 0x20a   :  { %v1001_v57 = vmul.f32 0.01, %v2678_v5  ;;  %v1002_v61 = vmul.f32 0.01, %v2681_v28  ;;  %v1003_v7 = vmul.f32 0.01, %v2684_v62  ;;  %v2845_v34 = vsel %vm947_vm5, %v2663_v31, %v996_v3 }
 0x20b   :  { %3311 = vst [vmem:[#allocation24_spill] sm:$0xff] %v2830_v60  ;;  %vm958_vm0 = vcmp.ge.f32.partialorder %v2696_v56, 0.0  ;;  %v2834_v11 = vmul.f32 0.01, %v2687_v33  ;;  %v2837_v21 = vmul.f32 0.01, %v2690_v0  ;;  %v2860_v60 = vsel %vm948_vm6, %v2666_v41, %v997_v39 }
 0x20c   :  { %v2840_v26 = vmul.f32 0.01, %v2693_v58  ;;  %3312 = vst [vmem:[#allocation25_spill] sm:$0xff] %v2845_v34  ;;  %vm959_vm1 = vcmp.ge.f32.partialorder %v2699_v22, 0.0  ;;  %v2849_v54 = vmul.f32 0.01, %v2696_v56  ;;  %v2877_v41 = vsel %vm949_vm7, %v2669_v50, %v998_v16 }
 0x20d   :  { %v2852_v13 = vmul.f32 0.01, %v2699_v22  ;;  %v2855_v14 = vmul.f32 0.01, %v2702_v19  ;;  %3313 = vst [vmem:[#allocation26_spill] sm:$0xff] %v2860_v60  ;;  %vm960_vm2 = vcmp.ge.f32.partialorder %v2702_v19, 0.0  ;;  %v2895_v50 = vsel %vm950_vm8, %v2672_v55, %v999_v20 }
 0x20e   :  { %v2866_v31 = vmul.f32 0.01, %v2705_v38  ;;  %v2869_v3 = vmul.f32 0.01, %v2708_v49  ;;  %v2872_v34 = vmul.f32 0.01, %v2711_v35  ;;  %v2913_v55 = vsel %vm951_vm9, %v2675_v9, %v1000_v6 }
 0x20f   :  { %3315 = vst [vmem:[#allocation28_spill] sm:$0xff] %v2877_v41  ;;  %vm963_vm5 = vcmp.ge.f32.partialorder %v2711_v35, 0.0  ;;  %v2884_v39 = vmul.f32 0.01, %v2714_v23  ;;  %v2887_v60 = vmul.f32 0.01, %v2717_v36  ;;  %v2931_v9 = vsel %vm952_vm10, %v2678_v5, %v1001_v57 }
 0x210   :  { %3314 = vst [vmem:[#allocation27_spill] sm:$0xff] %v2872_v34  ;;  %v2890_v34 = vmul.f32 0.01, %v2720_v42  ;;  %3316 = vst [vmem:[#allocation29_spill] sm:$0xff] %v2895_v50  ;;  %vm967_vm7 = vcmp.ge.f32.partialorder %v2723_v8, 0.0  ;;  %vm971_vm8 = vcmp.ge.f32.partialorder %v2735_v45, 0.0 }
 0x211   :  { %v2902_v16 = vmul.f32 0.01, %v2723_v8  ;;  %v2905_v41 = vmul.f32 0.01, %v2726_v18  ;;  %v2908_v42 = vmul.f32 0.01, %v2729_v40 }
 0x212   :  { %3317 = vst [vmem:[#allocation30_spill] sm:$0xff] %v2913_v55  ;;  %v2920_v20 = vmul.f32 0.01, %v2732_v2  ;;  %v2923_v50 = vmul.f32 0.01, %v2735_v45  ;;  %3319 = vst [vmem:[#allocation32_spill] sm:$0xff] %v2931_v9 }
 0x213   :  { %v2926_v40 = vmul.f32 0.01, %v2738_v12  ;;  %vm978_vm3 = vcmp.ge.f32.partialorder %v2756_v63, 0.0  ;;  %v1022_v6 = vmul.f32 0.01, %v2741_v17  ;;  %vm982_vm4 = vcmp.ge.f32.partialorder %v2768_v24, 0.0 }
 0x214   :  { %v1023_v55 = vmul.f32 0.01, %v2744_v29  ;;  %v1024_v12 = vmul.f32 0.01, %v2747_v51  ;;  %v1025_v5 = vmul.f32 0.01, %v2750_v43  ;;  %v2955_v51 = vsel %vm954_vm12, %v2684_v62, %v1003_v7 }
 0x215   :  { %3318 = vst [vmem:[#allocation31_spill] sm:$0xff] %v2926_v40  ;;  %v2943_v40 = vsel %vm953_vm11, %v2681_v28, %v1002_v61  ;;  %v1026_v57 = vmul.f32 0.01, %v2753_v47  ;;  %v1027_v9 = vmul.f32 0.01, %v2756_v63  ;;  %3321 = vst [vmem:[#allocation34_spill] sm:$0xff] %v2955_v51  ;;  %v2968_v62 = vsel %vm955_vm13, %v2687_v33, %v2834_v11 }
 0x216   :  { %3320 = vst [vmem:[#allocation33_spill] sm:$0xff] %v2943_v40  ;;  %vm983_vm11 = vcmp.ge.f32.partialorder %v2771_v25, 0.0  ;;  %v1028_v28 = vmul.f32 0.01, %v2759_v53  ;;  %v1029_v61 = vmul.f32 0.01, %v2762_v1  ;;  %v2981_v33 = vsel %vm956_vm14, %v2690_v0, %v2837_v21 }
 0x217   :  { %v1030_v40 = vmul.f32 0.01, %v2765_v52  ;;  %3322 = vst [vmem:[#allocation35_spill] sm:$0xff] %v2968_v62  ;;  %vm987_vm12 = vcmp.ge.f32.partialorder %v2783_v10, 0.0  ;;  %v1031_v7 = vmul.f32 0.01, %v2768_v24  ;;  %v2994_v0 = vsel %vm957_vm15, %v2693_v58, %v2840_v26 }
 0x218   :  { %v1032_v51 = vmul.f32 0.01, %v2771_v25  ;;  %v1033_v52 = vmul.f32 0.01, %v2774_v48  ;;  %3323 = vst [vmem:[#allocation36_spill] sm:$0xff] %v2981_v33  ;;  %vm991_vm13 = vcmp.ge.f32.partialorder %v2795_v32, 0.0  ;;  %v1057_v58 = vsel %vm959_vm1, %v2699_v22, %v2852_v13 }
 0x219   :  { %vm992_vm10 = vcmp.ge.f32.partialorder %v2798_v27, 0.0  ;;  %vm993_vm9 = vcmp.ge.f32.partialorder %v2810_v15, 0.0  ;;  %vm994_vm6 = vcmp.ge.f32.partialorder %v2817_v46, 0.0  ;;  %v1034_v11 = vmul.f32 0.01, %v2777_v44  ;;  %3324 = vst [vmem:[#allocation37_spill] sm:$0xff] %v2994_v0 }
 0x21a   :  { %v1035_v62 = vmul.f32 0.01, %v2780_v30  ;;  %v1036_v48 = vmul.f32 0.01, %v2783_v10  ;;  %v1037_v21 = vmul.f32 0.01, %v2786_v37  ;;  %v1056_v44 = vsel %vm958_vm0, %v2696_v56, %v2849_v54 }
 0x21b   :  { %v1038_v33 = vmul.f32 0.01, %v2789_v59  ;;  %v1039_v25 = vmul.f32 0.01, %v2792_v4  ;;  %v1040_v30 = vmul.f32 0.01, %v2795_v32  ;;  %v1058_v0 = vsel %vm960_vm2, %v2702_v19, %v2855_v14 }
 0x21c   :  { %v1041_v10 = vmul.f32 0.01, %v2798_v27  ;;  %v1042_v24 = vmul.f32 0.01, %v2810_v15  ;;  %v1043_v26 = vmul.f32 0.01, %v2817_v46 }
 0x21d   :  { %vm3325_vm14 = vcmp.ge.f32.partialorder %v2705_v38, 0.0  ;;  %vm3326_vm15 = vcmp.ge.f32.partialorder %v2708_v49, 0.0  ;;  %v3327_v15 = vld [vmem:[#allocation27_spill] sm:$0xff]  ;;  %vm3328_vm0 = vcmp.ge.f32.partialorder %v2714_v23, 0.0  ;;  %vm3329_vm1 = vcmp.ge.f32.partialorder %v2717_v36, 0.0  ;;  %v3330_v13 = vld [vmem:[#allocation12_spill] sm:$0xff] }
 0x21e   :  { %v1059_v56 = vsel %vm3325_vm14, %v2705_v38, %v2866_v31  ;;  %v1060_v54 = vsel %vm3326_vm15, %v2708_v49, %v2869_v3  ;;  %v1061_v22 = vsel %vm963_vm5, %v2711_v35, %v3327_v15  ;;  %v1062_v19 = vsel %vm3328_vm0, %v2714_v23, %v2884_v39  ;;  %v3333_v15 = vld [vmem:[#allocation13_spill] sm:$0xff]  ;;  %v3337_v14 = vld [vmem:[#allocation14_spill] sm:$0xff]  ;;  %v3341_v3 = vld [vmem:[#allocation15_spill] sm:$0xff] }
 0x21f   :  { %v1063_v38 = vsel %vm3329_vm1, %v2717_v36, %v2887_v60  ;;  %vm3331_vm2 = vcmp.ge.f32.partialorder %v3330_v13, 0.0  ;;  %v1065_v35 = vsel %vm967_vm7, %v2723_v8, %v2902_v16  ;;  %vm3332_vm5 = vcmp.ge.f32.partialorder %v2726_v18, 0.0  ;;  %v3347_v39 = vld [vmem:[#allocation16_spill] sm:$0xff]  ;;  %v3350_v16 = vld [vmem:[#allocation18_spill] sm:$0xff] }
 0x220   :  { %v1064_v49 = vsel %vm3331_vm2, %v3330_v13, %v2890_v34  ;;  %v1066_v23 = vsel %vm3332_vm5, %v2726_v18, %v2905_v41  ;;  %vm3334_vm14 = vcmp.ge.f32.partialorder %v3333_v15, 0.0  ;;  %vm3335_vm15 = vcmp.ge.f32.partialorder %v2732_v2, 0.0  ;;  %v3336_v34 = vld [vmem:[#allocation31_spill] sm:$0xff] }
 0x221   :  { %v1067_v36 = vsel %vm3334_vm14, %v3333_v15, %v2908_v42  ;;  %v1068_v60 = vsel %vm3335_vm15, %v2732_v2, %v2920_v20  ;;  %v1069_v8 = vsel %vm971_vm8, %v2735_v45, %v2923_v50  ;;  %vm3338_vm7 = vcmp.ge.f32.partialorder %v3337_v14, 0.0  ;;  %v3349_v50 = vld [vmem:[#allocation17_spill] sm:$0xff]  ;;  %v3353_v20 = vld [vmem:[#allocation20_spill] sm:$0xff] }
 0x222   :  { %v1070_v18 = vsel %vm3338_vm7, %v3337_v14, %v3336_v34  ;;  %vm3339_vm0 = vcmp.ge.f32.partialorder %v2741_v17, 0.0  ;;  %vm3340_vm1 = vcmp.ge.f32.partialorder %v2744_v29, 0.0  ;;  %vm3342_vm2 = vcmp.ge.f32.partialorder %v3341_v3, 0.0  ;;  %v3368_v15 = vld [vmem:[#allocation32_spill] sm:$0xff]  ;;  %v3370_v34 = vld [vmem:[#allocation34_spill] sm:$0xff]  ;;  %v3371_v14 = vld [vmem:[#allocation35_spill] sm:$0xff] }
 0x223   :  { %v1071_v31 = vsel %vm3339_vm0, %v2741_v17, %v1022_v6  ;;  %v1072_v42 = vsel %vm3340_vm1, %v2744_v29, %v1023_v55  ;;  %v1073_v2 = vsel %vm3342_vm2, %v3341_v3, %v1024_v12  ;;  %vm3343_vm8 = vcmp.ge.f32.partialorder %v2750_v43, 0.0  ;;  %v3351_v55 = vld [vmem:[#allocation19_spill] sm:$0xff]  ;;  %v3357_v6 = vld [vmem:[#allocation22_spill] sm:$0xff]  ;;  %v3372_v3 = vld [vmem:[#allocation36_spill] sm:$0xff] }
 0x224   :  { %v1074_v45 = vsel %vm3343_vm8, %v2750_v43, %v1025_v5  ;;  %vm3344_vm5 = vcmp.ge.f32.partialorder %v2753_v47, 0.0  ;;  %v1076_v17 = vsel %vm978_vm3, %v2756_v63, %v1027_v9  ;;  %vm3345_vm14 = vcmp.ge.f32.partialorder %v2759_v53, 0.0  ;;  %v3355_v9 = vld [vmem:[#allocation21_spill] sm:$0xff] }
 0x225   :  { %v1075_v41 = vsel %vm3344_vm5, %v2753_v47, %v1026_v57  ;;  %v1077_v29 = vsel %vm3345_vm14, %v2759_v53, %v1028_v28  ;;  %vm3346_vm15 = vcmp.ge.f32.partialorder %v2762_v1, 0.0  ;;  %vm3348_vm7 = vcmp.ge.f32.partialorder %v3347_v39, 0.0 }
 0x226   :  { %v1078_v12 = vsel %vm3346_vm15, %v2762_v1, %v1029_v61  ;;  %v1079_v43 = vsel %vm3348_vm7, %v3347_v39, %v1030_v40  ;;  %v1080_v47 = vsel %vm982_vm4, %v3349_v50, %v1031_v7  ;;  %v1081_v63 = vsel %vm983_vm11, %v3350_v16, %v1032_v51  ;;  %v3361_v61 = vld [vmem:[#allocation23_spill] sm:$0xff]  ;;  %v3362_v7 = vld [vmem:[#allocation24_spill] sm:$0xff]  ;;  %v3373_v39 = vld [vmem:[#allocation37_spill] sm:$0xff] }
 0x227   :  { %vm3352_vm3 = vcmp.ge.f32.partialorder %v3351_v55, 0.0  ;;  %vm3354_vm0 = vcmp.ge.f32.partialorder %v3353_v20, 0.0  ;;  %vm3356_vm1 = vcmp.ge.f32.partialorder %v3355_v9, 0.0  ;;  %v1085_v5 = vsel %vm987_vm12, %v3357_v6, %v1036_v48 }
 0x228   :  { %v1082_v53 = vsel %vm3352_vm3, %v3351_v55, %v1033_v52  ;;  %v1083_v1 = vsel %vm3354_vm0, %v3353_v20, %v1034_v11  ;;  %v1084_v40 = vsel %vm3356_vm1, %v3355_v9, %v1035_v62  ;;  %vm3358_vm4 = vcmp.ge.f32.partialorder %v2786_v37, 0.0  ;;  %v3365_v11 = vld [vmem:[#allocation28_spill] sm:$0xff] }
 0x229   :  { %v1086_v51 = vsel %vm3358_vm4, %v2786_v37, %v1037_v21  ;;  %vm3359_vm11 = vcmp.ge.f32.partialorder %v2789_v59, 0.0  ;;  %vm3360_vm2 = vcmp.ge.f32.partialorder %v2792_v4, 0.0  ;;  %v1089_v28 = vsel %vm991_vm13, %v2795_v32, %v1040_v30  ;;  %v3366_v30 = vld [vmem:[#allocation29_spill] sm:$0xff]  ;;  %v3367_v32 = vld [vmem:[#allocation30_spill] sm:$0xff] }
 0x22a   :  { %v1087_v52 = vsel %vm3359_vm11, %v2789_v59, %v1038_v33  ;;  %v1088_v57 = vsel %vm3360_vm2, %v2792_v4, %v1039_v25  ;;  %v1090_v48 = vsel %vm992_vm10, %v2798_v27, %v1041_v10  ;;  %v1091_v37 = vsel %vm993_vm9, %v3361_v61, %v1042_v24  ;;  %v3363_v33 = vld [vmem:[#allocation25_spill] sm:$0xff]  ;;  %v3364_v4 = vld [vmem:[#allocation26_spill] sm:$0xff] }
 0x22b   :  { %v1092_v59 = vsel %vm994_vm6, %v2817_v46, %v1043_v26  ;;  %v1501_v25 = vpack.c.bf16 %v3363_v33, %v3362_v7  ;;  %v1506_v21 = vpack.c.bf16 %v3365_v11, %v3364_v4  ;;  %v1511_v13 = vpack.c.bf16 %v3367_v32, %v3366_v30  ;;  %v3369_v10 = vld [vmem:[#allocation33_spill] sm:$0xff] }
 0x22c   :  { %v1497_v62 = vpack.c.bf16 %v1092_v59, %v1092_v59  ;;  %v1516_v27 = vpack.c.bf16 %v3369_v10, %v3368_v15  ;;  %v1521_v24 = vpack.c.bf16 %v3371_v14, %v3370_v34  ;;  %v1526_v50 = vpack.c.bf16 %v3373_v39, %v3372_v3 }
 0x22d   :  { %v1531_v46 = vpack.c.bf16 %v1057_v58, %v1056_v44  ;;  %1502 = vst [vmem:[%s3221_s5] sm:$0xff] %v1501_v25   ;;  %1618 = vst [vmem:[%s3221_s5 + $0x8] sm:$0xff] %v1506_v21   ;;  %v1536_v26 = vpack.c.bf16 %v1059_v56, %v1058_v0  ;;  %v1541_v16 = vpack.c.bf16 %v1061_v22, %v1060_v54 }
 0x22e   :  { %1619 = vst [vmem:[%s3221_s5 + $0x10] sm:$0xff] %v1511_v13   ;;  %v1546_v55 = vpack.c.bf16 %v1063_v38, %v1062_v19  ;;  %v1551_v20 = vpack.c.bf16 %v1065_v35, %v1064_v49  ;;  %1338 = vst [vmem:[%s3221_s5 + $0xc0] sm:$0xf] %v1497_v62  ;;  %v1556_v44 = vpack.c.bf16 %v1067_v36, %v1066_v23 }
 0x22f   :  { %1620 = vst [vmem:[%s3221_s5 + $0x18] sm:$0xff] %v1516_v27   ;;  %1621 = vst [vmem:[%s3221_s5 + $0x20] sm:$0xff] %v1521_v24   ;;  %v1561_v0 = vpack.c.bf16 %v1069_v8, %v1068_v60  ;;  %v1566_v58 = vpack.c.bf16 %v1071_v31, %v1070_v18  ;;  %v1571_v56 = vpack.c.bf16 %v1073_v2, %v1072_v42 }
 0x230   :  { %1622 = vst [vmem:[%s3221_s5 + $0x28] sm:$0xff] %v1526_v50   ;;  %1623 = vst [vmem:[%s3221_s5 + $0x30] sm:$0xff] %v1531_v46   ;;  %v1576_v54 = vpack.c.bf16 %v1075_v41, %v1074_v45  ;;  %v1581_v22 = vpack.c.bf16 %v1077_v29, %v1076_v17  ;;  %v1586_v19 = vpack.c.bf16 %v1079_v43, %v1078_v12 }
 0x231   :  { %1624 = vst [vmem:[%s3221_s5 + $0x38] sm:$0xff] %v1536_v26   ;;  %1625 = vst [vmem:[%s3221_s5 + $0x40] sm:$0xff] %v1541_v16   ;;  %v1591_v38 = vpack.c.bf16 %v1081_v63, %v1080_v47  ;;  %v1596_v49 = vpack.c.bf16 %v1083_v1, %v1082_v53  ;;  %v1601_v35 = vpack.c.bf16 %v1085_v5, %v1084_v40 }
 0x232   :  { %1626 = vst [vmem:[%s3221_s5 + $0x48] sm:$0xff] %v1546_v55   ;;  %1627 = vst [vmem:[%s3221_s5 + $0x50] sm:$0xff] %v1551_v20   ;;  %v1606_v23 = vpack.c.bf16 %v1087_v52, %v1086_v51  ;;  %v1611_v36 = vpack.c.bf16 %v1089_v28, %v1088_v57  ;;  %v1616_v60 = vpack.c.bf16 %v1091_v37, %v1090_v48 }
 0x233   :  { %1628 = vst [vmem:[%s3221_s5 + $0x58] sm:$0xff] %v1556_v44   ;;  %1629 = vst [vmem:[%s3221_s5 + $0x60] sm:$0xff] %v1561_v0  }
 0x234   :  { %1630 = vst [vmem:[%s3221_s5 + $0x68] sm:$0xff] %v1566_v58   ;;  %1631 = vst [vmem:[%s3221_s5 + $0x70] sm:$0xff] %v1571_v56  }
 0x235   :  { %1632 = vst [vmem:[%s3221_s5 + $0x78] sm:$0xff] %v1576_v54   ;;  %1633 = vst [vmem:[%s3221_s5 + $0x80] sm:$0xff] %v1581_v22  }
 0x236   :  { %1634 = vst [vmem:[%s3221_s5 + $0x88] sm:$0xff] %v1586_v19   ;;  %1635 = vst [vmem:[%s3221_s5 + $0x90] sm:$0xff] %v1591_v38  }
 0x237   :  { %1636 = vst [vmem:[%s3221_s5 + $0x98] sm:$0xff] %v1596_v49   ;;  %1637 = vst [vmem:[%s3221_s5 + $0xa0] sm:$0xff] %v1601_v35  }
 0x238   :  { %1638 = vst [vmem:[%s3221_s5 + $0xa8] sm:$0xff] %v1606_v23   ;;  %1639 = vst [vmem:[%s3221_s5 + $0xb0] sm:$0xff] %v1611_v36  }
 0x239   :  { %1640 = vst [vmem:[%s3221_s5 + $0xb8] sm:$0xff] %v1616_v60  }
 0x23a   :  { %1343 = vsyncpa [#allocation3], 1 }
 0x23b   :  { %1344 = vsyncpa [#allocation5], 1 }
 0x23c   :  { %1345 = vsyncpa [#allocation8], 1 }

// kernel: encoder_forward.4
= control target key start
LH: loop header
LB: loop body
LE: loop exit
PB: predicated region body
PF: predicated region fallthrough
CT: control target
= control target key end

     0   :  { %s4961_s0 = inlined_call_operand.vmem [shape: bf16[98,1152], index: 0, kind: input, shape index: {}]   ;;  %s4962_s1 = inlined_call_operand.hbm [shape: bf16[1152,512], index: 1, kind: input, shape index: {}]   ;;  %s4963_s2 = inlined_call_operand.hbm [shape: f32[1,512], index: 2, kind: input, shape index: {}]   ;;  %s4964_s3 = inlined_call_operand.hbm [shape: f32[1,512], index: 3, kind: input, shape index: {}]   ;;  %s4965_s4 = inlined_call_operand.hbm [shape: f32[1,512], index: 4, kind: input, shape index: {}]   ;;  %s4966_s5 = inlined_call_operand.vmem [shape: bf16[98,512], index: 5, kind: output, shape index: {}]  }
   0x1   :  { %4970 = sst [smem:[#allocation14_spill]] %s4962_s1 }
   0x2   :  { %4971 = sst [smem:[#allocation15_spill]] %s4963_s2 }
   0x3   :  { %10 = vsyncpa [#allocation3], 0 }
   0x4   :  { %12 = vsyncpa [#allocation3 + $0x1], 0 }
   0x5   :  { %13 = vsyncpa [#allocation5], 0 }
   0x6   :  { %15 = vsyncpa [#allocation5 + $0x1], 0 }
   0x7   :  { %16 = vsyncpa [#allocation8], 0 }
   0x8   :  { %18 = vsyncpa [#allocation8 + $0x1], 0  ;;  %s3739_s18 = smov 0   ;;  %s3741_s19 = smov 0  }
   0x9   :  { %s3743_s20 = smov 0   ;;  %s3745_s21 = smov 0  }
   0xa LB: > { %s3758_s22 = sadd.s32 4294967295, %s3699_s21   ;;  %s3761_s23 = sadd.s32 1, %s3699_s21   ;;  %s3699_s21 = sphi %s3745_s21, %s4999_s21   ;;  %s3695_s20 = sphi %s3743_s20, %s4998_s20   ;;  %s3691_s19 = sphi %s3741_s19, %s4997_s19   ;;  %s3687_s18 = sphi %s3739_s18, %s4996_s18  }
   0xb   : > { %s49_s24 = ssub.s32 %s3699_s21, %s3761_s23  ;;  %s52_s25 = sadd.s32 1, %s3695_s20 }
   0xc   : > { %p50_p0 = scmp.eq.s32.totalorder %s49_s24, 0  ;;  %p59_p1 = scmp.ne.s32.totalorder %s3695_s20, %s3691_s19 }
   0xd   : > { %p60_p2 = scmp.eq.s32.totalorder %s3699_s21, 0  ;;  %p65_p3 = scmp.ne.s32.totalorder %s3691_s19, %s3687_s18 }
   0xe   : > { %s3771_s26 = scalar_select %p50_p0, %s3695_s20, %s52_s25  }
   0xf   : > { %p61_p4 = por %p60_p2, %p59_p1  ;;  %p66_p5 = scmp.eq.s32.totalorder %s3758_s22, 0 }
  0x10   : > { %4972 = sst [smem:[#allocation13_spill]] %s3771_s26  ;;  %p167_p6 = scmp.eq.s32.totalorder %s3758_s22, 1 }
  0x11   : > { %p3775_p7 = por %p66_p5, %p65_p3  ;;  %p3193_p8 = scmp.lt.s32.totalorder %s3699_s21, 2 }
  0x12   : > { %p3780_p9 = por %p167_p6, %p59_p1  ;;  %s3785_s29 = sand.u32 1, %s3695_s20  }
  0x13   : > { %s4973_s27 = scalar_select %p3775_p7, 1, 0 }
  0x14   : > { %s4974_s28 = scalar_select %p3780_p9, 1, 0 }
  0x15   : > { %p3787_p10 = pnand %p3193_p8, %p61_p4  ;;  %s217_s6 = sand.u32 1, %s3699_s21  }
  0x16   : > { %s3793_s7 = sshll.u32 %s3785_s29, 1  ;;  %s3796_s8 = sshll.u32 %s3699_s21, 5 }
  0x17   : > { %s4975_s30 = scalar_select %p3787_p10, 1, 0 }
  0x18   : > { %s221_s9 = scalar_lea.vmem [#allocation4], %s3793_s7  ;;  %s4976_s2 = sld [smem:[#allocation15_spill]] }
  0x19   : > { %s229_s10 = sshll.u32 %s221_s9, 4  ;;  %s3807_s14 = scalar_lea.sflag [#allocation5], %s217_s6  ;;  %s3805_s10 = int_to_ptr.vmem [resolvable:$true] %s229_s10 }
  0x1a   : > { %p3813_p12 = pneg %p3787_p10 }
  0x1e   : > { %s3803_s13 = scalar_lea.hbm %s4976_s2, %s3796_s8  ;;  %s3542_s24 = scalar_lea.hbm %s4976_s2, 64 }
  0x1f   : > { %s3537_s15 = scalar_lea.hbm %s3803_s13, 32  ;;  %p3543_p1 = scmp.lt.u32.totalorder %s3803_s13, %s4976_s2 }
  0x20   : > { %p3538_p11 = scmp.ne.s32.totalorder %s3803_s13, %s3537_s15  ;;  %p3544_p2 = scmp.lt.u32.totalorder %s3542_s24, %s3537_s15 }
  0x21   : > { %p3546_p4 = scmp.lt.u32.totalorder %s3537_s15, %s3803_s13 }
  0x22   : > { %p3540_p13 = pnand %p3813_p12, %p3538_p11  ;;  %p3545_p3 = por %p3544_p2, %p3543_p1 }
  0x24   : > { %p3541_p0 = pneg %p3540_p13  ;;  %p3547_p5 = por %p3546_p4, %p3545_p3 }
  0x26   : > { %p3548_p6 = pnand %p3547_p5, %p3541_p0 }
  0x28   : > { %3551 = shalt.err (!%p3548_p6)
}
  0x29   : > { %s3552_s6 = scalar_lea.vmem %s3805_s10, 32  ;;  %s3701_s11 = smov [#allocation4]  }
  0x2a   : > { %p3553_p8 = scmp.ne.s32.totalorder %s3805_s10, %s3552_s6  ;;  %s3557_s12 = sshll.u32 %s3701_s11, 4  ;;  %s3558_s12 = int_to_ptr.vmem [resolvable:$false] %s3557_s12 }
  0x2b   : > { %s3559_s17 = scalar_lea.vmem %s3558_s12, 64  ;;  %p3560_p9 = scmp.lt.s32.totalorder %s3805_s10, %s3558_s12 }
  0x2c   : > { %p3555_p11 = pnand %p3553_p8, %p3813_p12  ;;  %p3561_p7 = scmp.lt.s32.totalorder %s3559_s17, %s3552_s6 }
  0x2e   : > { %p3556_p13 = pneg %p3555_p11  ;;  %p3562_p1 = por %p3561_p7, %p3560_p9 }
  0x30   : > { %p3563_p2 = pnand %p3562_p1, %p3556_p13 }
  0x32   : > { %3566 = shalt.err (!%p3563_p2)
}
  0x33   : > { %3186 = dma.hbm_to_vmem [thread:$0]  (!%p3787_p10), %s3803_s13, 32, %s3805_s10, %s3807_s14  }
  0x34   : > { %p2759_p0 = scmp.ge.s32.totalorder %s3699_s21, 1  ;;  %p272_p3 = scmp.lt.s32.totalorder %s3699_s21, 3 }
  0x35   : > { %s3169_s15 = smul.u32 1152, %s3785_s29  ;;  %s2987_s24 = sshll.u32 %s3699_s21, 7 }
  0x36   : > { %p3840_p4 = pnand %p2759_p0, %p272_p3  ;;  %s4979_s1 = sld [smem:[#allocation14_spill]] }
  0x37   : > { %s200_s11 = scalar_lea.vmem [#allocation2], %s3169_s15  ;;  %s197_s10 = scalar_lea.sflag [#allocation3], %s3785_s29 }
  0x38   : > { %s4978_s18 = scalar_select %p3840_p4, 1, 0 }
  0x39   : > { %s207_s12 = sshll.u32 %s200_s11, 4  ;;  %s3850_s12 = int_to_ptr.vmem [resolvable:$true] %s207_s12 }
  0x3c   : > { %s3848_s6 = scalar_lea.hbm %s4979_s1, %s2987_s24  ;;  %s3572_s25 = scalar_lea.hbm %s4979_s1, 36864 }
  0x3d   : > { %s3567_s13 = scalar_lea.hbm %s3848_s6, 18432  ;;  %p3573_p6 = scmp.lt.u32.totalorder %s3848_s6, %s4979_s1 }
  0x3e   : > { %p3568_p7 = scmp.ne.s32.totalorder %s3848_s6, %s3567_s13  ;;  %p3574_p8 = scmp.lt.u32.totalorder %s3572_s25, %s3567_s13 }
  0x3f   : > { %p3576_p13 = scmp.lt.u32.totalorder %s3567_s13, %s3848_s6 }
  0x40   : > { %p3570_p9 = pnand %p3568_p7, %p3813_p12  ;;  %p3575_p11 = por %p3574_p8, %p3573_p6 }
  0x42   : > { %p3571_p5 = pneg %p3570_p9  ;;  %p3577_p1 = por %p3576_p13, %p3575_p11 }
  0x44   : > { %p3578_p2 = pnand %p3577_p1, %p3571_p5 }
  0x46   : > { %3581 = shalt.err (!%p3578_p2)
}
  0x47   : > { %s3582_s15 = scalar_lea.vmem %s3850_s12, 18432  ;;  %s3702_s11 = smov [#allocation2]  }
  0x48   : > { %p3583_p0 = scmp.ne.s32.totalorder %s3850_s12, %s3582_s15  ;;  %s3587_s21 = sshll.u32 %s3702_s11, 4  ;;  %s3588_s21 = int_to_ptr.vmem [resolvable:$false] %s3587_s21 }
  0x49   : > { %s3589_s17 = scalar_lea.vmem %s3588_s21, 36864  ;;  %p3590_p9 = scmp.lt.s32.totalorder %s3850_s12, %s3588_s21 }
  0x4a   : > { %p3585_p3 = pnand %p3583_p0, %p3813_p12  ;;  %p3591_p4 = scmp.lt.s32.totalorder %s3589_s17, %s3582_s15 }
  0x4c   : > { %p3586_p7 = pneg %p3585_p3  ;;  %p3592_p6 = por %p3591_p4, %p3590_p9 }
  0x4e   : > { %p3593_p8 = pnand %p3592_p6, %p3586_p7 }
  0x50   : > { %3596 = shalt.err (!%p3593_p8)
}
  0x51   : > { %s3703_s13 = smov 256   ;;  %s3704_s25 = smov 128  }
  0x52   : > { %s3705_s24 = smov 8   ;;  %s3880_s15 = scalar_lea.hbm %s4964_s3, %s3796_s8 }
  0x53   : > { %3183 = dma.hbm_to_vmem [thread:$0]  (!%p3787_p10), %s3848_s6, 18432, %s3850_s12, %s197_s10, %s3703_s13, %s3704_s25, %s3705_s24  }
  0x54   : > { %s240_s21 = scalar_lea.vmem [#allocation6], %s3793_s7  ;;  %s3597_s1 = scalar_lea.hbm %s3880_s15, 32 }
  0x55   : > { %s248_s17 = sshll.u32 %s240_s21, 4  ;;  %p3598_p4 = scmp.ne.s32.totalorder %s3880_s15, %s3597_s1  ;;  %s249_s17 = int_to_ptr.vmem [resolvable:$true] %s248_s17 }
  0x56   : > { %s3602_s6 = scalar_lea.hbm %s4964_s3, 64  ;;  %p3603_p13 = scmp.lt.u32.totalorder %s3880_s15, %s4964_s3 }
  0x57   : > { %p3600_p5 = pnand %p3598_p4, %p3813_p12  ;;  %p3604_p1 = scmp.lt.u32.totalorder %s3602_s6, %s3597_s1 }
  0x58   : > { %p3606_p0 = scmp.lt.u32.totalorder %s3597_s1, %s3880_s15 }
  0x59   : > { %p3601_p11 = pneg %p3600_p5  ;;  %p3605_p2 = por %p3604_p1, %p3603_p13 }
  0x5b   : > { %p3607_p3 = por %p3606_p0, %p3605_p2 }
  0x5d   : > { %p3608_p7 = pnand %p3607_p3, %p3601_p11 }
  0x5f   : > { %3611 = shalt.err (!%p3608_p7)
}
  0x60   : > { %s3612_s13 = scalar_lea.vmem %s249_s17, 32  ;;  %s3706_s25 = smov [#allocation6]  }
  0x61   : > { %p3613_p9 = scmp.ne.s32.totalorder %s249_s17, %s3612_s13  ;;  %s3617_s24 = sshll.u32 %s3706_s25, 4  ;;  %s3618_s24 = int_to_ptr.vmem [resolvable:$false] %s3617_s24 }
  0x62   : > { %s3619_s2 = scalar_lea.vmem %s3618_s24, 64  ;;  %p3620_p4 = scmp.lt.s32.totalorder %s249_s17, %s3618_s24 }
  0x63   : > { %p3615_p6 = pnand %p3613_p9, %p3813_p12  ;;  %p3621_p5 = scmp.lt.s32.totalorder %s3619_s2, %s3612_s13 }
  0x65   : > { %p3616_p8 = pneg %p3615_p6  ;;  %p3622_p10 = por %p3621_p5, %p3620_p4 }
  0x67   : > { %p3623_p1 = pnand %p3622_p10, %p3616_p8 }
  0x69   : > { %3626 = shalt.err (!%p3623_p1)
}
  0x6a   : > { %p4980_p13 = scmp.ne.s32.totalorder %s4975_s30, 0  ;;  %s3905_s9 = scalar_lea.hbm %s4965_s4, %s3796_s8 }
  0x6b   : > { %s259_s11 = scalar_lea.vmem [#allocation7], %s3793_s7  ;;  %s256_s6 = scalar_lea.sflag [#allocation8], %s3785_s29 }
  0x6c   : > { %3189 = dma.hbm_to_vmem [thread:$0]  (!%p4980_p13), %s3880_s15, 32, %s249_s17, %s3807_s14  }
  0x6d   : > { %s267_s21 = sshll.u32 %s259_s11, 4  ;;  %s3627_s12 = scalar_lea.hbm %s3905_s9, 32  ;;  %s268_s21 = int_to_ptr.vmem [resolvable:$true] %s267_s21 }
  0x6e   : > { %p3628_p10 = scmp.ne.s32.totalorder %s3905_s9, %s3627_s12  ;;  %s3632_s15 = scalar_lea.hbm %s4965_s4, 64 }
  0x6f   : > { %p3633_p0 = scmp.lt.u32.totalorder %s3905_s9, %s4965_s4  ;;  %p3634_p3 = scmp.lt.u32.totalorder %s3632_s15, %s3627_s12 }
  0x70   : > { %p3630_p11 = pnand %p3628_p10, %p3813_p12  ;;  %p3636_p9 = scmp.lt.u32.totalorder %s3627_s12, %s3905_s9 }
  0x71   : > { %p3635_p7 = por %p3634_p3, %p3633_p0 }
  0x72   : > { %p3631_p2 = pneg %p3630_p11 }
  0x73   : > { %p3637_p6 = por %p3636_p9, %p3635_p7 }
  0x75   : > { %p3638_p8 = pnand %p3637_p6, %p3631_p2 }
  0x77   : > { %3641 = shalt.err (!%p3638_p8)
}
  0x78   : > { %s3642_s29 = scalar_lea.vmem %s268_s21, 32  ;;  %s3707_s7 = smov [#allocation7]  }
  0x79   : > { %p3643_p4 = scmp.ne.s32.totalorder %s268_s21, %s3642_s29  ;;  %s3647_s13 = sshll.u32 %s3707_s7, 4  ;;  %s3648_s13 = int_to_ptr.vmem [resolvable:$false] %s3647_s13 }
  0x7a   : > { %s3649_s25 = scalar_lea.vmem %s3648_s13, 64  ;;  %p3650_p10 = scmp.lt.s32.totalorder %s268_s21, %s3648_s13 }
  0x7b   : > { %p3645_p5 = pnand %p3643_p4, %p3813_p12  ;;  %p3651_p11 = scmp.lt.s32.totalorder %s3649_s25, %s3642_s29 }
  0x7d   : > { %p3646_p1 = pneg %p3645_p5  ;;  %p3652_p13 = por %p3651_p11, %p3650_p10 }
  0x7f   : > { %p3653_p0 = pnand %p3652_p13, %p3646_p1 }
  0x81   : > { %3656 = shalt.err (!%p3653_p0)
}
  0x82   : > { %p4981_p3 = scmp.ne.s32.totalorder %s4975_s30, 0  ;;  %p4982_p2 = scmp.ne.s32.totalorder %s4978_s18, 0 }
  0x83   : > { %s3929_s16 = sand.u32 (!%p4982_p2), 1, %s3691_s19   ;;  %p4983_p12 = scmp.ne.s32.totalorder (!%p4982_p2), %s4973_s27, 0 }
  0x84   : > { %3192 = dma.hbm_to_vmem [thread:$0]  (!%p4981_p3), %s3905_s9, 32, %s268_s21, %s256_s6  }
  0x85   : > { %276 = sbr.rel (%p4982_p2) target bundleno = 664 (0x298), region = 40  ;;  %s279_s2 = scalar_lea.sflag (!%p4982_p2), [#allocation3], %s3929_s16 }
  0x86   : > { %s3170_s24 = smul.u32 (!%p4982_p2), 1152, %s3929_s16 }
  0x88   : > { %s3933_s1 = scalar_lea.vmem (!%p4982_p2), [#allocation2], %s3170_s24 }
  0x8c   : > { %3674 = dma.done.wait (%p4983_p12), %s279_s2, 18432  }
  0x8d   : > { %3676 = vsyncadd (%p4983_p12), %s279_s2, 4294948864  ;;  %s287_s30 = sand.u32 1, %s3758_s22   ;;  %s3941_s18 = sshll.u32 %s3929_s16, 1 }
  0x8e   : > { %s288_s26 = scalar_lea.sflag [#allocation5], %s287_s30  ;;  %s291_s9 = scalar_lea.vmem [#allocation4], %s3941_s18 }
  0x8f   : > { %3678 = dma.done.wait (%p4983_p12), %s288_s26, 64  }
  0x90   : > { %3680 = vsyncadd (%p4983_p12), %s288_s26, 4294967232  ;;  %s300_s11 = scalar_lea.vmem [#allocation6], %s3941_s18  ;;  %s306_s21 = scalar_lea.sflag [#allocation8], %s3929_s16 }
  0x91   : > { %s309_s6 = scalar_lea.vmem [#allocation7], %s3941_s18 }
  0x92   : > { %3682 = dma.done.wait (%p4983_p12), %s306_s21, 32  }
  0x93   : > { %3684 = vsyncadd (%p4983_p12), %s306_s21, 4294967264  ;;  %v3230_v0 = vld [vmem:[%s3933_s1 + $0x4] ss:$8 sps:$4 sm:$0xff]   ;;  %v3234_v2 = vld [vmem:[%s3933_s1] ss:$8 sps:$4 sm:$0xff]   ;;  %vm2121_vm0 = vcmask 1041408  }
  0x94   : > { %v3232_v1 = vld [vmem:[%s3933_s1 + $0x204] ss:$8 sps:$4 sm:$0xff]   ;;  %1605 = vmatprep.subr.bf16.mxu1 %v3230_v0  ;;  %v3235_v3 = vld [vmem:[%s3933_s1 + $0x200] ss:$8 sps:$4 sm:$0xff]   ;;  %v3236_v4 = vld [vmem:[%s3933_s1 + $0x14] ss:$8 sps:$4 sm:$0xff]  }
  0x95   : > { %1807 = vmatprep.subr.bf16.mxu0 %v3232_v1  ;;  %1606 = vmatpush1.bf16.msra.mxu1 %v3234_v2  ;;  %v3238_v5 = vld [vmem:[%s3933_s1 + $0x214] ss:$8 sps:$4 sm:$0xff]   ;;  %v3240_v6 = vld [vmem:[%s3933_s1 + $0x10] ss:$8 sps:$4 sm:$0xff]   ;;  %v3242_v8 = vld [vmem:[%s3933_s1 + $0x24] ss:$8 sps:$4 sm:$0xff]  }
  0x96   : > { %1808 = vmatpush1.bf16.msra.mxu0 %v3235_v3  ;;  %1607 = vmatprep.subr.bf16.mxu1 %v3236_v4  ;;  %v3241_v7 = vld [vmem:[%s3933_s1 + $0x210] ss:$8 sps:$4 sm:$0xff]   ;;  %v3244_v9 = vld [vmem:[%s3933_s1 + $0x224] ss:$8 sps:$4 sm:$0xff]   ;;  %v3246_v10 = vld [vmem:[%s3933_s1 + $0x20] ss:$8 sps:$4 sm:$0xff]  }
  0x97   : > { %1809 = vmatprep.subr.bf16.mxu0 %v3238_v5  ;;  %v3247_v11 = vld [vmem:[%s3933_s1 + $0x220] ss:$8 sps:$4 sm:$0xff]   ;;  %v3248_v12 = vld [vmem:[%s3933_s1 + $0x34] ss:$8 sps:$4 sm:$0xff]   ;;  %v3252_v14 = vld [vmem:[%s3933_s1 + $0x30] ss:$8 sps:$4 sm:$0xff]  }
  0x98   : > { %v3250_v13 = vld [vmem:[%s3933_s1 + $0x234] ss:$8 sps:$4 sm:$0xff]   ;;  %v3253_v15 = vld [vmem:[%s3933_s1 + $0x230] ss:$8 sps:$4 sm:$0xff]   ;;  %v3254_v16 = vld [vmem:[%s3933_s1 + $0x44] ss:$8 sps:$4 sm:$0xff]  }
  0x99   : > { %1608 = vmatpush1.bf16.msra.mxu1 %v3240_v6  ;;  %v3256_v17 = vld [vmem:[%s3933_s1 + $0x244] ss:$8 sps:$4 sm:$0xff]   ;;  %v3258_v18 = vld [vmem:[%s3933_s1 + $0x40] ss:$8 sps:$4 sm:$0xff]   ;;  %v3260_v20 = vld [vmem:[%s3933_s1 + $0x54] ss:$8 sps:$4 sm:$0xff]  }
  0x9a   : > { %1810 = vmatpush1.bf16.msra.mxu0 %v3241_v7  ;;  %1609 = vmatprep.subr.bf16.mxu1 %v3242_v8  ;;  %v3259_v19 = vld [vmem:[%s3933_s1 + $0x240] ss:$8 sps:$4 sm:$0xff]   ;;  %v3262_v21 = vld [vmem:[%s3933_s1 + $0x254] ss:$8 sps:$4 sm:$0xff]   ;;  %v3264_v22 = vld [vmem:[%s3933_s1 + $0x50] ss:$8 sps:$4 sm:$0xff]  }
  0x9b   : > { %1811 = vmatprep.subr.bf16.mxu0 %v3244_v9  ;;  %v3265_v23 = vld [vmem:[%s3933_s1 + $0x250] ss:$8 sps:$4 sm:$0xff]   ;;  %v3266_v24 = vld [vmem:[%s3933_s1 + $0x64] ss:$8 sps:$4 sm:$0xff]   ;;  %v3270_v26 = vld [vmem:[%s3933_s1 + $0x60] ss:$8 sps:$4 sm:$0xff]  }
  0x9c   : > { %v3268_v25 = vld [vmem:[%s3933_s1 + $0x264] ss:$8 sps:$4 sm:$0xff]   ;;  %v3271_v27 = vld [vmem:[%s3933_s1 + $0x260] ss:$8 sps:$4 sm:$0xff]   ;;  %v3272_v28 = vld [vmem:[%s3933_s1 + $0x74] ss:$8 sps:$4 sm:$0xff]  }
  0x9d   : > { %1610 = vmatpush1.bf16.msra.mxu1 %v3246_v10  ;;  %v3274_v29 = vld [vmem:[%s3933_s1 + $0x274] ss:$8 sps:$4 sm:$0xff]   ;;  %v3276_v30 = vld [vmem:[%s3933_s1 + $0x70] ss:$8 sps:$4 sm:$0xff]   ;;  %v3278_v32 = vld [vmem:[%s3933_s1 + $0x84] ss:$8 sps:$4 sm:$0xff]  }
  0x9e   : > { %1812 = vmatpush1.bf16.msra.mxu0 %v3247_v11  ;;  %1611 = vmatprep.subr.bf16.mxu1 %v3248_v12  ;;  %v3277_v31 = vld [vmem:[%s3933_s1 + $0x270] ss:$8 sps:$4 sm:$0xff]   ;;  %v3280_v33 = vld [vmem:[%s3933_s1 + $0x284] ss:$8 sps:$4 sm:$0xff]   ;;  %v3282_v34 = vld [vmem:[%s3933_s1 + $0x80] ss:$8 sps:$4 sm:$0xff]  }
  0x9f   : > { %1813 = vmatprep.subr.bf16.mxu0 %v3250_v13  ;;  %v3283_v35 = vld [vmem:[%s3933_s1 + $0x280] ss:$8 sps:$4 sm:$0xff]   ;;  %v3284_v36 = vld [vmem:[%s3933_s1 + $0x94] ss:$8 sps:$4 sm:$0xff]   ;;  %v3288_v38 = vld [vmem:[%s3933_s1 + $0x90] ss:$8 sps:$4 sm:$0xff]  }
  0xa0   : > { %v3286_v37 = vld [vmem:[%s3933_s1 + $0x294] ss:$8 sps:$4 sm:$0xff]   ;;  %v3289_v39 = vld [vmem:[%s3933_s1 + $0x290] ss:$8 sps:$4 sm:$0xff]   ;;  %v3290_v40 = vld [vmem:[%s3933_s1 + $0xa4] ss:$8 sps:$4 sm:$0xff]  }
  0xa1   : > { %1612 = vmatpush1.bf16.msra.mxu1 %v3252_v14  ;;  %v3292_v41 = vld [vmem:[%s3933_s1 + $0x2a4] ss:$8 sps:$4 sm:$0xff]   ;;  %v3294_v42 = vld [vmem:[%s3933_s1 + $0xa0] ss:$8 sps:$4 sm:$0xff]   ;;  %v3296_v44 = vld [vmem:[%s3933_s1 + $0xb4] ss:$8 sps:$4 sm:$0xff]  }
  0xa2   : > { %1814 = vmatpush1.bf16.msra.mxu0 %v3253_v15  ;;  %1613 = vmatprep.subr.bf16.mxu1 %v3254_v16  ;;  %v3295_v43 = vld [vmem:[%s3933_s1 + $0x2a0] ss:$8 sps:$4 sm:$0xff]   ;;  %v3298_v45 = vld [vmem:[%s3933_s1 + $0x2b4] ss:$8 sps:$4 sm:$0xff]   ;;  %v3300_v46 = vld [vmem:[%s3933_s1 + $0xb0] ss:$8 sps:$4 sm:$0xff]  }
  0xa3   : > { %1815 = vmatprep.subr.bf16.mxu0 %v3256_v17  ;;  %v3301_v47 = vld [vmem:[%s3933_s1 + $0x2b0] ss:$8 sps:$4 sm:$0xff]   ;;  %v3328_v48 = vld [vmem:[%s4961_s0 + $0x4] ss:$36 sps:$4 sm:$0xff]   ;;  %v3308_v54 = vld [vmem:[%s3933_s1 + $0xd4] ss:$8 sps:$4 sm:$0xff]  }
  0xa4   : > { %v3302_v49 = vld [vmem:[%s3933_s1 + $0xc4] ss:$8 sps:$4 sm:$0xff]   ;;  %1637 = vmatprep.mubr.bf16.mxu1 %v3328_v48  ;;  %v3334_v51 = vld [vmem:[%s4961_s0 + $0x14] ss:$36 sps:$4 sm:$0xff]   ;;  %v3306_v52 = vld [vmem:[%s3933_s1 + $0xc0] ss:$8 sps:$4 sm:$0xff]  }
  0xa5   : > { %1614 = vmatpush1.bf16.msra.mxu1 %v3258_v18  ;;  %v3304_v50 = vld [vmem:[%s3933_s1 + $0x2c4] ss:$8 sps:$4 sm:$0xff]   ;;  %v3307_v53 = vld [vmem:[%s3933_s1 + $0x2c0] ss:$8 sps:$4 sm:$0xff]   ;;  %v3310_v55 = vld [vmem:[%s3933_s1 + $0x2d4] ss:$8 sps:$4 sm:$0xff]   ;;  %1839 = vmatprep.mubr.bf16.mxu0 %v3334_v51 }
  0xa6   : > { %1816 = vmatpush1.bf16.msra.mxu0 %v3259_v19  ;;  %1615 = vmatprep.subr.bf16.mxu1 %v3260_v20  ;;  %v3312_v56 = vld [vmem:[%s3933_s1 + $0xd0] ss:$8 sps:$4 sm:$0xff]   ;;  %v3314_v58 = vld [vmem:[%s3933_s1 + $0xe4] ss:$8 sps:$4 sm:$0xff]   ;;  %v3318_v60 = vld [vmem:[%s3933_s1 + $0xe0] ss:$8 sps:$4 sm:$0xff]  }
  0xa7   : > { %1817 = vmatprep.subr.bf16.mxu0 %v3262_v21  ;;  %v3313_v57 = vld [vmem:[%s3933_s1 + $0x2d0] ss:$8 sps:$4 sm:$0xff]   ;;  %v3316_v59 = vld [vmem:[%s3933_s1 + $0x2e4] ss:$8 sps:$4 sm:$0xff]   ;;  %v3319_v61 = vld [vmem:[%s3933_s1 + $0x2e0] ss:$8 sps:$4 sm:$0xff]  }
  0xa8   : > { %v3320_v62 = vld [vmem:[%s3933_s1 + $0xf4] ss:$8 sps:$4 sm:$0xff]   ;;  %v3324_v0 = vld [vmem:[%s3933_s1 + $0xf0] ss:$8 sps:$4 sm:$0xff]   ;;  %v3331_v2 = vld [vmem:[%s3933_s1 + $0x104] ss:$8 sps:$4 sm:$0xff]  }
  0xa9   : > { %1616 = vmatpush1.bf16.msra.mxu1 %v3264_v22  ;;  %v3322_v63 = vld [vmem:[%s3933_s1 + $0x2f4] ss:$8 sps:$4 sm:$0xff]   ;;  %v3325_v1 = vld [vmem:[%s3933_s1 + $0x2f0] ss:$8 sps:$4 sm:$0xff]   ;;  %v4027_v3 = vld [vmem:[%s3933_s1 + $0x304] ss:$8 sps:$4 sm:$0xff]  }
  0xaa   : > { %1818 = vmatpush1.bf16.msra.mxu0 %v3265_v23  ;;  %1617 = vmatprep.subr.bf16.mxu1 %v3266_v24  ;;  %v3326_v4 = vld [vmem:[%s4961_s0] ss:$36 sps:$4 sm:$0xff]   ;;  %v3332_v6 = vld [vmem:[%s4961_s0 + $0x10] ss:$36 sps:$4 sm:$0xff]   ;;  %v3360_v18 = vld [vmem:[%s4961_s0 + $0x58] ss:$36 sps:$4 sm:$0xff]  }
  0xab   : > { %1819 = vmatprep.subr.bf16.mxu0 %v3268_v25  ;;  %v3329_v5 = vld [vmem:[%s3933_s1 + $0x100] ss:$8 sps:$4 sm:$0xff]   ;;  %v3340_v8 = vld [vmem:[%s3933_s1 + $0x114] ss:$8 sps:$4 sm:$0xff]   ;;  %v3358_v11 = vld [vmem:[%s4961_s0 + $0x4c] ss:$36 sps:$4 sm:$0xff]  }
  0xac   : > { %v4037_v7 = vld [vmem:[%s3933_s1 + $0x300] ss:$8 sps:$4 sm:$0xff]   ;;  %v4042_v9 = vld [vmem:[%s3933_s1 + $0x314] ss:$8 sps:$4 sm:$0xff]   ;;  %v3338_v12 = vld [vmem:[%s3933_s1 + $0x110] ss:$8 sps:$4 sm:$0xff]  }
  0xad   : > { %1618 = vmatpush1.bf16.msra.mxu1 %v3270_v26  ;;  %v3356_v10 = vld [vmem:[%s4961_s0 + $0x5c] ss:$36 sps:$4 sm:$0xff]   ;;  %v4052_v13 = vld [vmem:[%s3933_s1 + $0x310] ss:$8 sps:$4 sm:$0xff]   ;;  %v3346_v14 = vld [vmem:[%s3933_s1 + $0x124] ss:$8 sps:$4 sm:$0xff]  }
  0xae   : > { %1820 = vmatpush1.bf16.msra.mxu0 %v3271_v27  ;;  %1619 = vmatprep.subr.bf16.mxu1 %v3272_v28  ;;  %v4058_v15 = vld [vmem:[%s3933_s1 + $0x324] ss:$8 sps:$4 sm:$0xff]   ;;  %v3344_v16 = vld [vmem:[%s3933_s1 + $0x120] ss:$8 sps:$4 sm:$0xff]   ;;  %v3352_v20 = vld [vmem:[%s3933_s1 + $0x134] ss:$8 sps:$4 sm:$0xff]  }
  0xaf   : > { %1821 = vmatprep.subr.bf16.mxu0 %v3274_v29  ;;  %v4062_v17 = vld [vmem:[%s3933_s1 + $0x320] ss:$8 sps:$4 sm:$0xff]   ;;  %v4074_v21 = vld [vmem:[%s3933_s1 + $0x334] ss:$8 sps:$4 sm:$0xff]   ;;  %v3350_v24 = vld [vmem:[%s3933_s1 + $0x130] ss:$8 sps:$4 sm:$0xff]  }
  0xb0   : > { %v3361_v19 = vld [vmem:[%s4961_s0 + $0x48] ss:$36 sps:$4 sm:$0xff]   ;;  %v3376_v23 = vld [vmem:[%s4961_s0 + $0x94] ss:$36 sps:$4 sm:$0xff]   ;;  %s3171_s18 = smul.u32 104, %s3929_s16  ;;  %p4994_p13 = scmp.ne.s32.totalorder %s4974_s28, 0 }
  0xb1   : > { %1620 = vmatpush1.bf16.msra.mxu1 %v3276_v30  ;;  %v3374_v22 = vld [vmem:[%s4961_s0 + $0xa4] ss:$36 sps:$4 sm:$0xff]   ;;  %v4084_v25 = vld [vmem:[%s3933_s1 + $0x330] ss:$8 sps:$4 sm:$0xff]   ;;  %s3004_s16 = sshll.u32 (%p4994_p13), %s3758_s22, 3 }
  0xb2   : > { %1822 = vmatpush1.bf16.msra.mxu0 %v3277_v31  ;;  %1621 = vmatprep.subr.bf16.mxu1 %v3278_v32  ;;  %v3364_v26 = vld [vmem:[%s3933_s1 + $0x144] ss:$8 sps:$4 sm:$0xff]   ;;  %v3362_v28 = vld [vmem:[%s3933_s1 + $0x140] ss:$8 sps:$4 sm:$0xff]   ;;  %v3379_v31 = vld [vmem:[%s4961_s0 + $0x90] ss:$36 sps:$4 sm:$0xff]   ;;  %s2536_s15 = scalar_lea.vmem (%p4994_p13), %s4966_s5, %s3004_s16 }
  0xb3   : > { %1823 = vmatprep.subr.bf16.mxu0 %v3280_v33  ;;  %v4090_v27 = vld [vmem:[%s3933_s1 + $0x344] ss:$8 sps:$4 sm:$0xff]   ;;  %v4094_v29 = vld [vmem:[%s3933_s1 + $0x340] ss:$8 sps:$4 sm:$0xff]   ;;  %v3370_v32 = vld [vmem:[%s3933_s1 + $0x154] ss:$8 sps:$4 sm:$0xff]  }
  0xb4   : > { %v3378_v30 = vld [vmem:[%s4961_s0 + $0xa0] ss:$36 sps:$4 sm:$0xff]   ;;  %v4106_v33 = vld [vmem:[%s3933_s1 + $0x354] ss:$8 sps:$4 sm:$0xff]   ;;  %v3386_v48 = vld [vmem:[%s3933_s1 + $0x170] ss:$8 sps:$4 sm:$0xff]  }
  0xb5   : > { %1622 = vmatpush1.bf16.msra.mxu1 %v3282_v34  ;;  %v3392_v34 = vld [vmem:[%s4961_s0 + $0xec] ss:$36 sps:$4 sm:$0xff]  }
  0xb6   : > { %1824 = vmatpush1.bf16.msra.mxu0 %v3283_v35  ;;  %1623 = vmatprep.subr.bf16.mxu1 %v3284_v36  ;;  %v3394_v35 = vld [vmem:[%s4961_s0 + $0xdc] ss:$36 sps:$4 sm:$0xff]   ;;  %v3368_v36 = vld [vmem:[%s3933_s1 + $0x150] ss:$8 sps:$4 sm:$0xff]   ;;  %v4154_v51 = vld [vmem:[%s3933_s1 + $0x384] ss:$8 sps:$4 sm:$0xff]  }
  0xb7   : > { %1825 = vmatprep.subr.bf16.mxu0 %v3286_v37  ;;  %v4116_v37 = vld [vmem:[%s3933_s1 + $0x350] ss:$8 sps:$4 sm:$0xff]  }
  0xb9   : > { %1624 = vmatpush1.bf16.msra.mxu1 %v3288_v38  ;;  %v3382_v38 = vld [vmem:[%s3933_s1 + $0x164] ss:$8 sps:$4 sm:$0xff]  }
  0xba   : > { %1826 = vmatpush1.bf16.msra.mxu0 %v3289_v39  ;;  %1625 = vmatprep.subr.bf16.mxu1 %v3290_v40  ;;  %v4122_v39 = vld [vmem:[%s3933_s1 + $0x364] ss:$8 sps:$4 sm:$0xff]   ;;  %v3380_v40 = vld [vmem:[%s3933_s1 + $0x160] ss:$8 sps:$4 sm:$0xff]  }
  0xbb   : > { %1827 = vmatprep.subr.bf16.mxu0 %v3292_v41  ;;  %v4126_v41 = vld [vmem:[%s3933_s1 + $0x360] ss:$8 sps:$4 sm:$0xff]  }
  0xbd   : > { %1626 = vmatpush1.bf16.msra.mxu1 %v3294_v42  ;;  %v3396_v42 = vld [vmem:[%s4961_s0 + $0xe8] ss:$36 sps:$4 sm:$0xff]  }
  0xbe   : > { %1828 = vmatpush1.bf16.msra.mxu0 %v3295_v43  ;;  %1627 = vmatprep.subr.bf16.mxu1 %v3296_v44  ;;  %v3397_v43 = vld [vmem:[%s4961_s0 + $0xd8] ss:$36 sps:$4 sm:$0xff]  }
  0xbf   : > { %1829 = vmatprep.subr.bf16.mxu0 %v3298_v45  ;;  %v3388_v44 = vld [vmem:[%s3933_s1 + $0x174] ss:$8 sps:$4 sm:$0xff]  }
  0xc0   : > { %v4138_v45 = vld [vmem:[%s3933_s1 + $0x374] ss:$8 sps:$4 sm:$0xff]  }
  0xc1   : > { %1628 = vmatpush1.bf16.msra.mxu1 %v3300_v46  ;;  %v3410_v46 = vld [vmem:[%s4961_s0 + $0x134] ss:$36 sps:$4 sm:$0xff]  }
  0xc2   : > { %1830 = vmatpush1.bf16.msra.mxu0 %v3301_v47  ;;  %1629 = vmatprep.subr.bf16.mxu1 %v3302_v49  ;;  %v3412_v47 = vld [vmem:[%s4961_s0 + $0x124] ss:$36 sps:$4 sm:$0xff]   ;;  %v4148_v49 = vld [vmem:[%s3933_s1 + $0x370] ss:$8 sps:$4 sm:$0xff]  }
  0xc3   : > { %1831 = vmatprep.subr.bf16.mxu0 %v3304_v50  ;;  %v3400_v50 = vld [vmem:[%s3933_s1 + $0x184] ss:$8 sps:$4 sm:$0xff]  }
  0xc5   : > { %1630 = vmatpush1.bf16.msra.mxu1 %v3306_v52  ;;  %v3398_v52 = vld [vmem:[%s3933_s1 + $0x180] ss:$8 sps:$4 sm:$0xff]  }
  0xc6   : > { %1832 = vmatpush1.bf16.msra.mxu0 %v3307_v53  ;;  %1631 = vmatprep.subr.bf16.mxu1 %v3308_v54  ;;  %v3414_v53 = vld [vmem:[%s4961_s0 + $0x130] ss:$36 sps:$4 sm:$0xff]   ;;  %v3415_v54 = vld [vmem:[%s4961_s0 + $0x120] ss:$36 sps:$4 sm:$0xff]  }
  0xc7   : > { %1833 = vmatprep.subr.bf16.mxu0 %v3310_v55  ;;  %v4165_v55 = vld [vmem:[%s3933_s1 + $0x380] ss:$8 sps:$4 sm:$0xff]  }
  0xc9   : > { %1632 = vmatpush1.bf16.msra.mxu1 %v3312_v56  ;;  %v3406_v56 = vld [vmem:[%s3933_s1 + $0x194] ss:$8 sps:$4 sm:$0xff]  }
  0xca   : > { %1834 = vmatpush1.bf16.msra.mxu0 %v3313_v57  ;;  %1633 = vmatprep.subr.bf16.mxu1 %v3314_v58  ;;  %v4170_v57 = vld [vmem:[%s3933_s1 + $0x394] ss:$8 sps:$4 sm:$0xff]  }
  0xcb   : > { %1835 = vmatprep.subr.bf16.mxu0 %v3316_v59  ;;  %v3428_v58 = vld [vmem:[%s4961_s0 + $0x17c] ss:$36 sps:$4 sm:$0xff]   ;;  %v3404_v59 = vld [vmem:[%s3933_s1 + $0x190] ss:$8 sps:$4 sm:$0xff]  }
  0xcd   : > { %1634 = vmatpush1.bf16.msra.mxu1 %v3318_v60  ;;  %v3430_v60 = vld [vmem:[%s4961_s0 + $0x16c] ss:$36 sps:$4 sm:$0xff]  }
  0xce   : > { %1836 = vmatpush1.bf16.msra.mxu0 %v3319_v61  ;;  %1635 = vmatprep.subr.bf16.mxu1 %v3320_v62  ;;  %v4180_v61 = vld [vmem:[%s3933_s1 + $0x390] ss:$8 sps:$4 sm:$0xff]   ;;  %v3418_v62 = vld [vmem:[%s3933_s1 + $0x1a4] ss:$8 sps:$4 sm:$0xff]  }
  0xcf   : > { %1837 = vmatprep.subr.bf16.mxu0 %v3322_v63  ;;  %v4185_v63 = vld [vmem:[%s3933_s1 + $0x3a4] ss:$8 sps:$4 sm:$0xff]  }
  0xd1   : > { %1636 = vmatpush1.bf16.msra.mxu1 %v3324_v0  ;;  %v3432_v0 = vld [vmem:[%s4961_s0 + $0x178] ss:$36 sps:$4 sm:$0xff]  }
  0xd2   : > { %1838 = vmatpush1.bf16.msra.mxu0 %v3325_v1  ;;  %1706 = vmatprep.subr.bf16.mxu1 %v3331_v2  ;;  %v3433_v1 = vld [vmem:[%s4961_s0 + $0x168] ss:$36 sps:$4 sm:$0xff]   ;;  %v418_v2 = vld [vmem:[%s4961_s0 + $0x1c0] sm:$0x11] }
  0xd3   : > { %1908 = vmatprep.subr.bf16.mxu0 %v4027_v3 }
  0xd4   : > { %1638 = vmatmul.mubr.bf16.vlgmr.msra.gmra.mrb[0].mxu1 %v3326_v4  ;;  %v416_v4 = vld [vmem:[%s4961_s0 + $0x1b0] sm:$0x11] }
  0xd5   : > { %1840 = vmatmul.mubr.bf16.vlgmr.msra.gmra.mrb[0].mxu0 %v3332_v6  ;;  %1707 = vmatpush1.bf16.msra.mxu1 %v3329_v5  ;;  %v3416_v5 = vld [vmem:[%s3933_s1 + $0x1a0] ss:$8 sps:$4 sm:$0xff]  }
  0xd6   : > { %1909 = vmatpush1.bf16.msra.mxu0 %v4037_v7  ;;  %1708 = vmatprep.subr.bf16.mxu1 %v3340_v8  ;;  %v4203_v6 = vld [vmem:[%s3933_s1 + $0x3a0] ss:$8 sps:$4 sm:$0xff]   ;;  %v3424_v8 = vld [vmem:[%s3933_s1 + $0x1b4] ss:$8 sps:$4 sm:$0xff]  }
  0xd7   : > { %1910 = vmatprep.subr.bf16.mxu0 %v4042_v9  ;;  %1849 = vmatprep.mubr.bf16.mxu0 %v3356_v10  ;;  %v4208_v10 = vld [vmem:[%s3933_s1 + $0x3b4] ss:$8 sps:$4 sm:$0xff]  }
  0xd8   : > { %1647 = vmatprep.mubr.bf16.mxu1 %v3358_v11  ;;  %v2822_v11 = vcombine.high %v418_v2, %v418_v2 }
  0xd9   : > { %1709 = vmatpush1.bf16.msra.mxu1 %v3338_v12  ;;  %v2818_v12 = vcombine.high %v416_v4, %v416_v4 }
  0xda   : > { %1911 = vmatpush1.bf16.msra.mxu0 %v4052_v13  ;;  %1710 = vmatprep.subr.bf16.mxu1 %v3346_v14  ;;  %v3422_v14 = vld [vmem:[%s3933_s1 + $0x1b0] ss:$8 sps:$4 sm:$0xff]  }
  0xdb   : > { %1912 = vmatprep.subr.bf16.mxu0 %v4058_v15 }
  0xdc   : > { %1648 = vmatmul.mubr.bf16.gmra.mrb[4].mxu1 %v3361_v19  ;;  %v4218_v19 = vld [vmem:[%s3933_s1 + $0x3c4] ss:$8 sps:$4 sm:$0xff]  }
  0xdd   : > { %1850 = vmatmul.mubr.bf16.gmra.mrb[4].mxu0 %v3360_v18  ;;  %1711 = vmatpush1.bf16.msra.mxu1 %v3344_v16  ;;  %v4213_v16 = vld [vmem:[%s3933_s1 + $0x3b0] ss:$8 sps:$4 sm:$0xff]   ;;  %v3436_v18 = vld [vmem:[%s3933_s1 + $0x1c4] ss:$8 sps:$4 sm:$0xff]  }
  0xde   : > { %1913 = vmatpush1.bf16.msra.mxu0 %v4062_v17  ;;  %1712 = vmatprep.subr.bf16.mxu1 %v3352_v20  ;;  %v3434_v20 = vld [vmem:[%s3933_s1 + $0x1c0] ss:$8 sps:$4 sm:$0xff]  }
  0xdf   : > { %1914 = vmatprep.subr.bf16.mxu0 %v4074_v21  ;;  %1859 = vmatprep.mubr.bf16.mxu0 %v3374_v22  ;;  %v2821_v22 = vcombine.low %v418_v2, %v418_v2  ;;  %v3491_v2 = vld [vmem:[%s4961_s0 + $0xa8] ss:$36 sps:$4 sm:$0xff]  }
  0xe0   : > { %1657 = vmatprep.mubr.bf16.mxu1 %v3376_v23  ;;  %v2817_v23 = vcombine.low %v416_v4, %v416_v4  ;;  %v3498_v4 = vld [vmem:[%s4961_s0 + $0xe4] ss:$36 sps:$4 sm:$0xff]  }
  0xe1   : > { %1713 = vmatpush1.bf16.msra.mxu1 %v3350_v24  ;;  %v4223_v24 = vld [vmem:[%s3933_s1 + $0x3c0] ss:$8 sps:$4 sm:$0xff]  }
  0xe2   : > { %1915 = vmatpush1.bf16.msra.mxu0 %v4084_v25  ;;  %1714 = vmatprep.subr.bf16.mxu1 %v3364_v26  ;;  %v3442_v26 = vld [vmem:[%s3933_s1 + $0x1d4] ss:$8 sps:$4 sm:$0xff]  }
  0xe3   : > { %1916 = vmatprep.subr.bf16.mxu0 %v4090_v27 }
  0xe4   : > { %1658 = vmatmul.mubr.bf16.gmra.mrb[8].mxu1 %v3379_v31  ;;  %v3467_v31 = vld [vmem:[%s4961_s0 + $0x1c] ss:$36 sps:$4 sm:$0xff]  }
  0xe5   : > { %1860 = vmatmul.mubr.bf16.gmra.mrb[8].mxu0 %v3378_v30  ;;  %1715 = vmatpush1.bf16.msra.mxu1 %v3362_v28  ;;  %v4228_v28 = vld [vmem:[%s3933_s1 + $0x3d4] ss:$8 sps:$4 sm:$0xff]   ;;  %v3464_v30 = vld [vmem:[%s4961_s0 + $0xc] ss:$36 sps:$4 sm:$0xff]  }
  0xe6   : > { %1917 = vmatpush1.bf16.msra.mxu0 %v4094_v29  ;;  %1716 = vmatprep.subr.bf16.mxu1 %v3370_v32  ;;  %v3440_v32 = vld [vmem:[%s3933_s1 + $0x1d0] ss:$8 sps:$4 sm:$0xff]  }
  0xe7   : > { %1918 = vmatprep.subr.bf16.mxu0 %v4106_v33  ;;  %1869 = vmatprep.mubr.bf16.mxu0 %v3392_v34  ;;  %v4239_v34 = vld [vmem:[%s3933_s1 + $0x3d0] ss:$8 sps:$4 sm:$0xff]  }
  0xe8   : > { %1667 = vmatprep.mubr.bf16.mxu1 %v3394_v35  ;;  %v3452_v35 = vld [vmem:[%s3933_s1 + $0x1e4] ss:$8 sps:$4 sm:$0xff]  }
  0xe9   : > { %1717 = vmatpush1.bf16.msra.mxu1 %v3368_v36  ;;  %v4244_v36 = vld [vmem:[%s3933_s1 + $0x3e4] ss:$8 sps:$4 sm:$0xff]  }
  0xea   : > { %1919 = vmatpush1.bf16.msra.mxu0 %v4116_v37  ;;  %1718 = vmatprep.subr.bf16.mxu1 %v3382_v38  ;;  %v3450_v38 = vld [vmem:[%s3933_s1 + $0x1e0] ss:$8 sps:$4 sm:$0xff]  }
  0xeb   : > { %1920 = vmatprep.subr.bf16.mxu0 %v4122_v39 }
  0xec   : > { %1668 = vmatmul.mubr.bf16.gmra.mrb[12].mxu1 %v3397_v43  ;;  %v4254_v43 = vld [vmem:[%s3933_s1 + $0x3f4] ss:$8 sps:$4 sm:$0xff]  }
  0xed   : > { %1870 = vmatmul.mubr.bf16.gmra.mrb[12].mxu0 %v3396_v42  ;;  %1719 = vmatpush1.bf16.msra.mxu1 %v3380_v40  ;;  %v4249_v40 = vld [vmem:[%s3933_s1 + $0x3e0] ss:$8 sps:$4 sm:$0xff]   ;;  %v3458_v42 = vld [vmem:[%s3933_s1 + $0x1f4] ss:$8 sps:$4 sm:$0xff]  }
  0xee   : > { %1921 = vmatpush1.bf16.msra.mxu0 %v4126_v41  ;;  %1720 = vmatprep.subr.bf16.mxu1 %v3388_v44  ;;  %v3456_v44 = vld [vmem:[%s3933_s1 + $0x1f0] ss:$8 sps:$4 sm:$0xff]  }
  0xef   : > { %1922 = vmatprep.subr.bf16.mxu0 %v4138_v45  ;;  %1879 = vmatprep.mubr.bf16.mxu0 %v3410_v46  ;;  %v4259_v46 = vld [vmem:[%s3933_s1 + $0x3f0] ss:$8 sps:$4 sm:$0xff]  }
  0xf0   : > { %1677 = vmatprep.mubr.bf16.mxu1 %v3412_v47  ;;  %v3470_v47 = vld [vmem:[%s3933_s1 + $0x404] ss:$8 sps:$4 sm:$0xff]  }
  0xf1   : > { %1721 = vmatpush1.bf16.msra.mxu1 %v3386_v48  ;;  %v3462_v48 = vld [vmem:[%s4961_s0 + $0x8] ss:$36 sps:$4 sm:$0xff]  }
  0xf2   : > { %1923 = vmatpush1.bf16.msra.mxu0 %v4148_v49  ;;  %1722 = vmatprep.subr.bf16.mxu1 %v3400_v50  ;;  %v3465_v50 = vld [vmem:[%s4961_s0 + $0x18] ss:$36 sps:$4 sm:$0xff]  }
  0xf3   : > { %1924 = vmatprep.subr.bf16.mxu0 %v4154_v51 }
  0xf4   : > { %1678 = vmatmul.mubr.bf16.gmra.mrb[16].mxu1 %v3415_v54  ;;  %v3474_v54 = vld [vmem:[%s4961_s0 + $0x54] ss:$36 sps:$4 sm:$0xff]  }
  0xf5   : > { %1880 = vmatmul.mubr.bf16.gmra.mrb[16].mxu0 %v3414_v53  ;;  %1723 = vmatpush1.bf16.msra.mxu1 %v3398_v52  ;;  %v3468_v52 = vld [vmem:[%s3933_s1 + $0x400] ss:$8 sps:$4 sm:$0xff]   ;;  %v3473_v53 = vld [vmem:[%s3933_s1 + $0x414] ss:$8 sps:$4 sm:$0xff]  }
  0xf6   : > { %1925 = vmatpush1.bf16.msra.mxu0 %v4165_v55  ;;  %1724 = vmatprep.subr.bf16.mxu1 %v3406_v56  ;;  %v3476_v56 = vld [vmem:[%s4961_s0 + $0x64] ss:$36 sps:$4 sm:$0xff]  }
  0xf7   : > { %1926 = vmatprep.subr.bf16.mxu0 %v4170_v57  ;;  %1889 = vmatprep.mubr.bf16.mxu0 %v3428_v58  ;;  %v3471_v58 = vld [vmem:[%s3933_s1 + $0x410] ss:$8 sps:$4 sm:$0xff]  }
  0xf8   : > { %1687 = vmatprep.mubr.bf16.mxu1 %v3430_v60  ;;  %v3479_v60 = vld [vmem:[%s4961_s0 + $0x60] ss:$36 sps:$4 sm:$0xff]  }
  0xf9   : > { %1725 = vmatpush1.bf16.msra.mxu1 %v3404_v59  ;;  %v3478_v59 = vld [vmem:[%s4961_s0 + $0x50] ss:$36 sps:$4 sm:$0xff]  }
  0xfa   : > { %1927 = vmatpush1.bf16.msra.mxu0 %v4180_v61  ;;  %1726 = vmatprep.subr.bf16.mxu1 %v3418_v62  ;;  %v3486_v62 = vld [vmem:[%s4961_s0 + $0x9c] ss:$36 sps:$4 sm:$0xff]  }
  0xfb   : > { %1928 = vmatprep.subr.bf16.mxu0 %v4185_v63 }
  0xfc   : > { %1688 = vmatmul.mubr.bf16.gmra.mrb[20].mxu1 %v3433_v1  ;;  %v3490_v1 = vld [vmem:[%s4961_s0 + $0x98] ss:$36 sps:$4 sm:$0xff]  }
  0xfd   : > { %1890 = vmatmul.mubr.bf16.gmra.mrb[20].mxu0 %v3432_v0  ;;  %1727 = vmatpush1.bf16.msra.mxu1 %v3416_v5  ;;  %v3488_v0 = vld [vmem:[%s4961_s0 + $0xac] ss:$36 sps:$4 sm:$0xff]   ;;  %v3500_v5 = vld [vmem:[%s4961_s0 + $0xf4] ss:$36 sps:$4 sm:$0xff]  }
  0xfe   : > { %1929 = vmatpush1.bf16.msra.mxu0 %v4203_v6  ;;  %1728 = vmatprep.subr.bf16.mxu1 %v3424_v8  ;;  %v3502_v8 = vld [vmem:[%s4961_s0 + $0xe0] ss:$36 sps:$4 sm:$0xff]  }
  0xff   : > { %1930 = vmatprep.subr.bf16.mxu0 %v4208_v10  ;;  %1899 = vmatprep.mubr.bf16.mxu0 %v2822_v11  ;;  %v3503_v11 = vld [vmem:[%s4961_s0 + $0xf0] ss:$36 sps:$4 sm:$0xff]  }
 0x100   : > { %1697 = vmatprep.mubr.bf16.mxu1 %v2818_v12  ;;  %v3510_v12 = vld [vmem:[%s4961_s0 + $0x12c] ss:$36 sps:$4 sm:$0xff]  }
 0x101   : > { %1729 = vmatpush1.bf16.msra.mxu1 %v3422_v14  ;;  %v3507_v14 = vld [vmem:[%s3933_s1 + $0x470] ss:$8 sps:$4 sm:$0xff]  }
 0x102   : > { %1931 = vmatpush1.bf16.msra.mxu0 %v4213_v16  ;;  %1730 = vmatprep.subr.bf16.mxu1 %v3436_v18  ;;  %v3513_v18 = vld [vmem:[%s4961_s0 + $0x20] ss:$36 sps:$4 sm:$0xff]  }
 0x103   : > { %1932 = vmatprep.subr.bf16.mxu0 %v4218_v19 }
 0x104   : > { %1698 = vmatmul.mubr.bf16.gmra.mrb[24].mxu1 %v2817_v23  ;;  %v3529_v23 = vld [vmem:[%s4961_s0 + $0x188] ss:$36 sps:$4 sm:$0xff]  }
 0x105   : > { %1900 = vmatmul.mubr.bf16.gmra.mrb[24].mxu0 %v2821_v22  ;;  %1731 = vmatpush1.bf16.msra.mxu1 %v3434_v20  ;;  %v3528_v22 = vld [vmem:[%s4961_s0 + $0x180] ss:$36 sps:$4 sm:$0xff]  }
 0x106   : > { %1933 = vmatpush1.bf16.msra.mxu0 %v4223_v24  ;;  %1732 = vmatprep.subr.bf16.mxu1 %v3442_v26 }
 0x107   : > { %1934 = vmatprep.subr.bf16.mxu0 %v4228_v28  ;;  %1738 = vmatprep.mubr.bf16.mxu1 %v3464_v30 }
 0x108   : > { %1940 = vmatprep.mubr.bf16.mxu0 %v3467_v31 }
 0x109   : > { %1733 = vmatpush1.bf16.msra.mxu1 %v3440_v32 }
 0x10a   : > { %1935 = vmatpush1.bf16.msra.mxu0 %v4239_v34  ;;  %1734 = vmatprep.subr.bf16.mxu1 %v3452_v35 }
 0x10b   : > { %1936 = vmatprep.subr.bf16.mxu0 %v4244_v36 }
 0x10d   : > { %1735 = vmatpush1.bf16.msra.mxu1 %v3450_v38 }
 0x10e   : > { %1937 = vmatpush1.bf16.msra.mxu0 %v4249_v40  ;;  %1736 = vmatprep.subr.bf16.mxu1 %v3458_v42 }
 0x10f   : > { %1938 = vmatprep.subr.bf16.mxu0 %v4254_v43 }
 0x111   : > { %1737 = vmatpush1.bf16.msra.mxu1 %v3456_v44 }
 0x112   : > { %1939 = vmatpush1.bf16.msra.mxu0 %v4259_v46  ;;  %3005 = vmatprep.subr.bf16.mxu1 %v4027_v3  ;;  %v3482_v3 = vld [vmem:[%s3933_s1 + $0x424] ss:$8 sps:$4 sm:$0xff]  }
 0x113   : > { %2009 = vmatprep.subr.bf16.mxu0 %v3470_v47 }
 0x114   : > { %1739 = vmatmul.mubr.bf16.vlgmr.msra.gmra.mrb[0].mxu1 %v3462_v48 }
 0x115   : > { %1941 = vmatmul.mubr.bf16.vlgmr.msra.gmra.mrb[0].mxu0 %v3465_v50  ;;  %3021 = vmatpush1.bf16.msra.mxu1 %v4037_v7  ;;  %v3480_v7 = vld [vmem:[%s3933_s1 + $0x420] ss:$8 sps:$4 sm:$0xff]  }
 0x116   : > { %2010 = vmatpush1.bf16.msra.mxu0 %v3468_v52  ;;  %3006 = vmatprep.subr.bf16.mxu1 %v4042_v9  ;;  %v3485_v9 = vld [vmem:[%s3933_s1 + $0x434] ss:$8 sps:$4 sm:$0xff]  }
 0x117   : > { %2011 = vmatprep.subr.bf16.mxu0 %v3473_v53  ;;  %1748 = vmatprep.mubr.bf16.mxu1 %v3474_v54 }
 0x118   : > { %1950 = vmatprep.mubr.bf16.mxu0 %v3476_v56 }
 0x119   : > { %3022 = vmatpush1.bf16.msra.mxu1 %v4052_v13  ;;  %v3483_v13 = vld [vmem:[%s3933_s1 + $0x430] ss:$8 sps:$4 sm:$0xff]  }
 0x11a   : > { %2012 = vmatpush1.bf16.msra.mxu0 %v3471_v58  ;;  %3007 = vmatprep.subr.bf16.mxu1 %v4058_v15  ;;  %v3494_v15 = vld [vmem:[%s3933_s1 + $0x444] ss:$8 sps:$4 sm:$0xff]  }
 0x11b   : > { %2013 = vmatprep.subr.bf16.mxu0 %v3482_v3  ;;  %v567_v3 = vlaneseq }
 0x11c   : > { %1749 = vmatmul.mubr.bf16.gmra.mrb[4].mxu1 %v3478_v59 }
 0x11d   : > { %1951 = vmatmul.mubr.bf16.gmra.mrb[4].mxu0 %v3479_v60  ;;  %3023 = vmatpush1.bf16.msra.mxu1 %v4062_v17  ;;  %v3492_v17 = vld [vmem:[%s3933_s1 + $0x440] ss:$8 sps:$4 sm:$0xff]  }
 0x11e   : > { %2014 = vmatpush1.bf16.msra.mxu0 %v3480_v7  ;;  %3008 = vmatprep.subr.bf16.mxu1 %v4074_v21  ;;  %v3497_v21 = vld [vmem:[%s3933_s1 + $0x454] ss:$8 sps:$4 sm:$0xff]  }
 0x11f   : > { %2015 = vmatprep.subr.bf16.mxu0 %v3485_v9  ;;  %1758 = vmatprep.mubr.bf16.mxu1 %v3486_v62  ;;  %v568_v9 = vshrl.u32 %v567_v3, 7 }
 0x120   : > { %1960 = vmatprep.mubr.bf16.mxu0 %v3488_v0 }
 0x121   : > { %3024 = vmatpush1.bf16.msra.mxu1 %v4084_v25  ;;  %v3495_v25 = vld [vmem:[%s3933_s1 + $0x450] ss:$8 sps:$4 sm:$0xff]   ;;  %v4424_v0 = vsub.s32 0, %v568_v9 }
 0x122   : > { %2016 = vmatpush1.bf16.msra.mxu0 %v3483_v13  ;;  %3009 = vmatprep.subr.bf16.mxu1 %v4090_v27  ;;  %v3506_v27 = vld [vmem:[%s3933_s1 + $0x464] ss:$8 sps:$4 sm:$0xff]   ;;  %v565_v13 = vld [vmem:[%s291_s9] sm:$0x3]  ;;  %s4913_s9 = scalar_lea.vmem [#allocation9], %s3171_s18 }
 0x123   : > { %2017 = vmatprep.subr.bf16.mxu0 %v3494_v15  ;;  %v4428_v15 = vsub.s32 1, %v568_v9 }
 0x124   : > { %1759 = vmatmul.mubr.bf16.gmra.mrb[8].mxu1 %v3490_v1 }
 0x125   : > { %1961 = vmatmul.mubr.bf16.gmra.mrb[8].mxu0 %v3491_v2  ;;  %3025 = vmatpush1.bf16.msra.mxu1 %v4094_v29  ;;  %v3504_v29 = vld [vmem:[%s3933_s1 + $0x460] ss:$8 sps:$4 sm:$0xff]  }
 0x126   : > { %2018 = vmatpush1.bf16.msra.mxu0 %v3492_v17  ;;  %3010 = vmatprep.subr.bf16.mxu1 %v4106_v33  ;;  %v3509_v33 = vld [vmem:[%s3933_s1 + $0x474] ss:$8 sps:$4 sm:$0xff]  }
 0x127   : > { %2019 = vmatprep.subr.bf16.mxu0 %v3497_v21  ;;  %1768 = vmatprep.mubr.bf16.mxu1 %v3498_v4  ;;  %v4437_v21 = vrot.slane %v565_v13, %v4424_v0 }
 0x128   : > { %1970 = vmatprep.mubr.bf16.mxu0 %v3500_v5  ;;  %v4442_v5 = vrot.slane %v565_v13, %v4428_v15 }
 0x129   : > { %3026 = vmatpush1.bf16.msra.mxu1 %v4116_v37  ;;  %v3708_v37 = vmov 0  }
 0x12a   : > { %2020 = vmatpush1.bf16.msra.mxu0 %v3495_v25  ;;  %3011 = vmatprep.subr.bf16.mxu1 %v4122_v39  ;;  %v3512_v39 = vld [vmem:[%s4961_s0 + $0x128] ss:$36 sps:$4 sm:$0xff]  }
 0x12b   : > { %2021 = vmatprep.subr.bf16.mxu0 %v3506_v27 }
 0x12c   : > { %1769 = vmatmul.mubr.bf16.gmra.mrb[12].mxu1 %v3502_v8 }
 0x12d   : > { %1971 = vmatmul.mubr.bf16.gmra.mrb[12].mxu0 %v3503_v11  ;;  %3027 = vmatpush1.bf16.msra.mxu1 %v4126_v41  ;;  %v3514_v41 = vld [vmem:[%s4961_s0 + $0x174] ss:$36 sps:$4 sm:$0xff]  }
 0x12e   : > { %2022 = vmatpush1.bf16.msra.mxu0 %v3504_v29  ;;  %3012 = vmatprep.subr.bf16.mxu1 %v4138_v45  ;;  %v417_v45 = vld [vmem:[%s4961_s0 + $0x1b8] sm:$0x11] }
 0x12f   : > { %2023 = vmatprep.subr.bf16.mxu0 %v3509_v33  ;;  %1778 = vmatprep.mubr.bf16.mxu1 %v3510_v12  ;;  %v2820_v20 = vcombine.high %v417_v45, %v417_v45 }
 0x130   : > { %2041 = vmatprep.mubr.bf16.mxu0 %v3708_v37 }
 0x131   : > { %3028 = vmatpush1.bf16.msra.mxu1 %v4148_v49  ;;  %v3516_v49 = vld [vmem:[%s4961_s0 + $0x170] ss:$36 sps:$4 sm:$0xff]  }
 0x132   : > { %2024 = vmatpush1.bf16.msra.mxu0 %v3507_v14  ;;  %3013 = vmatprep.subr.bf16.mxu1 %v4154_v51  ;;  %v3517_v51 = vld [vmem:[%s4961_s0 + $0x68] ss:$36 sps:$4 sm:$0xff]  }
 0x134   : > { %1779 = vmatmul.mubr.bf16.gmra.mrb[16].mxu1 %v3512_v39 }
 0x135   : > { %2042 = vmatmul.mubr.bf16.vlgmr.msra.gmra.mrb[0].mxu0 %v3513_v18  ;;  %3029 = vmatpush1.bf16.msra.mxu1 %v4165_v55  ;;  %v2819_v55 = vcombine.low %v417_v45, %v417_v45 }
 0x136   : > { %1788 = vmatprep.mubr.bf16.mxu1 %v3514_v41  ;;  %3014 = vmatprep.subr.bf16.mxu1 %v4170_v57  ;;  %v3520_v57 = vld [vmem:[%s4961_s0 + $0xb0] ss:$36 sps:$4 sm:$0xff]  }
 0x137   : > { %2051 = vmatprep.mubr.bf16.mxu0 %v3708_v37 }
 0x139   : > { %3030 = vmatpush1.bf16.msra.mxu1 %v4180_v61  ;;  %v3524_v61 = vld [vmem:[%s4961_s0 + $0x13c] ss:$36 sps:$4 sm:$0xff]  }
 0x13a   : > { %3015 = vmatprep.subr.bf16.mxu1 %v4185_v63  ;;  %v3521_v63 = vld [vmem:[%s4961_s0 + $0xf8] ss:$36 sps:$4 sm:$0xff]  }
 0x13c   : > { %1789 = vmatmul.mubr.bf16.gmra.mrb[20].mxu1 %v3516_v49 }
 0x13d   : > { %2052 = vmatmul.mubr.bf16.gmra.mrb[4].mxu0 %v3517_v51  ;;  %3031 = vmatpush1.bf16.msra.mxu1 %v4203_v6  ;;  %v3522_v6 = vld [vmem:[%s4961_s0 + $0x138] ss:$36 sps:$4 sm:$0xff]  }
 0x13e   : > { %1798 = vmatprep.mubr.bf16.mxu1 %v2820_v20  ;;  %3016 = vmatprep.subr.bf16.mxu1 %v4208_v10  ;;  %v3525_v10 = vld [vmem:[%s4961_s0 + $0x140] ss:$36 sps:$4 sm:$0xff]  }
 0x13f   : > { %2061 = vmatprep.mubr.bf16.mxu0 %v3708_v37 }
 0x141   : > { %3032 = vmatpush1.bf16.msra.mxu1 %v4213_v16  ;;  %v3526_v16 = vld [vmem:[%s4961_s0 + $0x184] ss:$36 sps:$4 sm:$0xff]  }
 0x142   : > { %3017 = vmatprep.subr.bf16.mxu1 %v4218_v19  ;;  %v419_v19 = vld [vmem:[%s4961_s0 + $0x1c8] sm:$0x11] }
 0x143   : > { %v2823_v26 = vcombine.low %v419_v19, %v419_v19 }
 0x144   : > { %1799 = vmatmul.mubr.bf16.gmra.mrb[24].mxu1 %v2819_v55 }
 0x145   : > { %2062 = vmatmul.mubr.bf16.gmra.mrb[8].mxu0 %v3520_v57  ;;  %3033 = vmatpush1.bf16.msra.mxu1 %v4223_v24  ;;  %v2824_v24 = vcombine.high %v419_v19, %v419_v19 }
 0x146   : > { %2071 = vmatprep.mubr.bf16.mxu0 %v3708_v37  ;;  %3018 = vmatprep.subr.bf16.mxu1 %v4228_v28  ;;  %v3532_v28 = vld [vmem:[%s4961_s0 + $0x1d0] ss:$0 sps:$4 sm:$0x11]  }
 0x147   : > { %1980 = vmatprep.mubr.bf16.mxu1 %v3524_v61 }
 0x149   : > { %3034 = vmatpush1.bf16.msra.mxu1 %v4239_v34 }
 0x14a   : > { %3019 = vmatprep.subr.bf16.mxu1 %v4244_v36 }
 0x14d   : > { %2072 = vmatmul.mubr.bf16.gmra.mrb[12].mxu0 %v3521_v63  ;;  %3035 = vmatpush1.bf16.msra.mxu1 %v4249_v40 }
 0x14e   : > { %2081 = vmatprep.mubr.bf16.mxu0 %v3708_v37  ;;  %3020 = vmatprep.subr.bf16.mxu1 %v4254_v43 }
 0x151   : > { %3036 = vmatpush1.bf16.msra.mxu1 %v4259_v46 }
 0x154   : > { %1981 = vmatmul.mubr.bf16.vlgmr.msra.gmra.mrb[28].mxu1 %v3522_v6 }
 0x155   : > { %2082 = vmatmul.mubr.bf16.gmra.mrb[28].mxu0 %v3525_v10  ;;  %1990 = vmatprep.mubr.bf16.mxu1 %v3526_v16 }
 0x156   : > { %2091 = vmatprep.mubr.bf16.mxu0 %v3708_v37 }
 0x15c   : > { %1991 = vmatmul.mubr.bf16.gmra.mrb[32].mxu1 %v3528_v22 }
 0x15d   : > { %2092 = vmatmul.mubr.bf16.gmra.mrb[32].mxu0 %v3529_v23  ;;  %2000 = vmatprep.mubr.bf16.mxu1 %v2824_v24 }
 0x15e   : > { %2101 = vmatprep.mubr.bf16.mxu0 %v3708_v37 }
 0x164   : > { %2001 = vmatmul.mubr.bf16.gmra.mrb[36].mxu1 %v2823_v26 }
 0x165   : > { %2102 = vmatmul.mubr.bf16.gmra.mrb[36].mxu0 %v3532_v28 }
 0x1c8   : > { %v1881_v30 = vpop.f32.mrb[16].mxu0 }
 0x1c9   : > { %v1883_v31 = vpop.f32.mrb[17].mxu0 }
 0x1ca   : > { %v1885_v32 = vpop.f32.mrb[18].mxu0 }
 0x1cb   : > { %v1887_v34 = vpop.f32.mrb[19].mxu0 }
 0x1d0   : > { %v4404_v35 = vpop.f32.mrb[20].mxu0 }
 0x1d1   : > { %v4406_v36 = vpop.f32.mrb[21].mxu0 }
 0x1d2   : > { %v4408_v38 = vpop.f32.mrb[22].mxu0 }
 0x1d3   : > { %v4410_v40 = vpop.f32.mrb[23].mxu0 }
 0x1d8   : > { %v4412_v42 = vpop.f32.mrb[24].mxu0 }
 0x1d9   : > { %v4414_v43 = vpop.f32.mrb[25].mxu0 }
 0x1da   : > { %v1905_v44 = vpop.f32.mrb[26].mxu0 }
 0x1db   : > { %v1906_v46 = vpop.f32.mrb[27].mxu0 }
 0x1e7   : > { %v1740_v47 = vpop.f32.mrb[0].mxu1 }
 0x1e8   : > { %v1742_v48 = vpop.f32.mrb[1].mxu1  ;;  %v3037_v25 = vadd.f32 %v1740_v47, %v4437_v21 }
 0x1e9   : > { %v1744_v50 = vpop.f32.mrb[2].mxu1  ;;  %v3039_v27 = vadd.f32 %v1742_v48, %v4442_v5 }
 0x1ea   : > { %v1746_v52 = vpop.f32.mrb[3].mxu1  ;;  %v3041_v29 = vadd.f32 %v1744_v50, %v4437_v21 }
 0x1eb   : > { %v3043_v39 = vadd.f32 %v1746_v52, %v4442_v5 }
 0x1ef   : > { %v1750_v53 = vpop.f32.mrb[4].mxu1 }
 0x1f0   : > { %v1752_v54 = vpop.f32.mrb[5].mxu1 }
 0x1f1   : > { %v1754_v56 = vpop.f32.mrb[6].mxu1  ;;  %v3047_v46 = vadd.f32 %v1752_v54, %v4442_v5 }
 0x1f2   : > { %v1756_v58 = vpop.f32.mrb[7].mxu1  ;;  %v3049_v50 = vadd.f32 %v1754_v56, %v4437_v21 }
 0x1f7   : > { %v4416_v59 = vpop.f32.mrb[8].mxu1 }
 0x1f8   : > { %v4418_v60 = vpop.f32.mrb[9].mxu1 }
 0x1f9   : > { %v4420_v7 = vpop.f32.mrb[10].mxu1 }
 0x1fa   : > { %v4422_v62 = vpop.f32.mrb[11].mxu1 }
 0x1ff   : > { %v4430_v1 = vpop.f32.mrb[12].mxu1 }
 0x200   : > { %v4432_v2 = vpop.f32.mrb[13].mxu1 }
 0x201   : > { %v4434_v17 = vpop.f32.mrb[14].mxu1 }
 0x202   : > { %v4439_v4 = vpop.f32.mrb[15].mxu1 }
 0x207   : > { %v1780_v8 = vpop.f32.mrb[16].mxu1 }
 0x208   : > { %v2043_v11 = vpop.f32.mrb[0].mxu0  ;;  %v3069_v33 = vadd.f32 %v1780_v8, %v4437_v21  ;;  %v1782_v14 = vpop.f32.mrb[17].mxu1 }
 0x209   : > { %v4448_v12 = vadd.f32 %v3037_v25, %v2043_v11  ;;  %v2045_v37 = vpop.f32.mrb[1].mxu0  ;;  %v3073_v18 = vadd.f32 %v1782_v14, %v4442_v5  ;;  %v1784_v45 = vpop.f32.mrb[18].mxu1  ;;  %v3051_v25 = vadd.f32 %v1756_v58, %v4442_v5 }
 0x20a   : > { %v4452_v41 = vadd.f32 %v3039_v27, %v2045_v37  ;;  %v2047_v49 = vpop.f32.mrb[2].mxu0  ;;  %v3077_v51 = vadd.f32 %v1784_v45, %v4437_v21  ;;  %v1786_v55 = vpop.f32.mrb[19].mxu1  ;;  %v4457_v61 = vadd.f32 %v3069_v33, %v1881_v30 }
 0x20b   : > { %v4455_v20 = vadd.f32 %v3041_v29, %v2047_v49  ;;  %v2049_v57 = vpop.f32.mrb[3].mxu0  ;;  %v3081_v63 = vadd.f32 %v1786_v55, %v4442_v5  ;;  %v4462_v10 = vadd.f32 %v3073_v18, %v1883_v31  ;;  %v2152_v16 = vmul.f32 %v4448_v12, %v4448_v12 }
 0x20c   : > { %v4460_v6 = vadd.f32 %v3043_v39, %v2049_v57  ;;  %v4470_v23 = vadd.f32 %v3077_v51, %v1885_v32  ;;  %v2153_v24 = vmul.f32 %v4452_v41, %v4452_v41  ;;  %v3045_v31 = vadd.f32 %v1750_v53, %v4437_v21 }
 0x20d   : > { %v2110_v19 = vadd.f32 %v4455_v20, %v4448_v12  ;;  %v2154_v22 = vmul.f32 %v4455_v20, %v4455_v20  ;;  %v4478_v30 = vadd.f32 %v3081_v63, %v1887_v34 }
 0x20e   : > { %v2130_v26 = vadd.f32 %v4460_v6, %v4452_v41  ;;  %v2155_v28 = vmul.f32 %v4460_v6, %v4460_v6 }
 0x20f   : > { %v2178_v44 = vadd.f32 %v2154_v22, %v2152_v16  ;;  %v1790_v48 = vpop.f32.mrb[20].mxu1  ;;  %v3053_v22 = vadd.f32 %v4416_v59, %v4437_v21 }
 0x210   : > { %v2197_v47 = vadd.f32 %v2155_v28, %v2153_v24  ;;  %v2053_v32 = vpop.f32.mrb[4].mxu0  ;;  %v3085_v52 = vadd.f32 %v1790_v48, %v4437_v21  ;;  %v1792_v9 = vpop.f32.mrb[21].mxu1 }
 0x211   : > { %v4484_v3 = vadd.f32 %v3045_v31, %v2053_v32  ;;  %v2055_v13 = vpop.f32.mrb[5].mxu0  ;;  %v3089_v34 = vadd.f32 %v1792_v9, %v4442_v5  ;;  %v1794_v53 = vpop.f32.mrb[22].mxu1 }
 0x212   : > { %v4488_v27 = vadd.f32 %v3047_v46, %v2055_v13  ;;  %v2057_v8 = vpop.f32.mrb[6].mxu0  ;;  %v3093_v56 = vadd.f32 %v1794_v53, %v4437_v21  ;;  %v1796_v33 = vpop.f32.mrb[23].mxu1  ;;  %v4506_v55 = vadd.f32 %v3085_v52, %v4404_v35  ;;  %v3055_v35 = vadd.f32 %v4418_v60, %v4442_v5 }
 0x213   : > { %v2111_v54 = vadd.f32 %v4484_v3, %v2110_v19  ;;  %v2156_v11 = vmul.f32 %v4484_v3, %v4484_v3  ;;  %v4494_v29 = vadd.f32 %v3049_v50, %v2057_v8  ;;  %v2059_v14 = vpop.f32.mrb[7].mxu0  ;;  %v3097_v39 = vadd.f32 %v1796_v33, %v4442_v5 }
 0x214   : > { %v2131_v37 = vadd.f32 %v4488_v27, %v2130_v26  ;;  %v2157_v58 = vmul.f32 %v4488_v27, %v4488_v27  ;;  %v4500_v18 = vadd.f32 %v3051_v25, %v2059_v14  ;;  %v4512_v19 = vadd.f32 %v3089_v34, %v4406_v36 }
 0x215   : > { %v2179_v45 = vadd.f32 %v2178_v44, %v2156_v11  ;;  %v2112_v49 = vadd.f32 %v4494_v29, %v2111_v54  ;;  %v2158_v51 = vmul.f32 %v4494_v29, %v4494_v29  ;;  %v4517_v26 = vadd.f32 %v3093_v56, %v4408_v38 }
 0x216   : > { %v2198_v57 = vadd.f32 %v2197_v47, %v2157_v58  ;;  %v2132_v63 = vadd.f32 %v4500_v18, %v2131_v37  ;;  %v2159_v16 = vmul.f32 %v4500_v18, %v4500_v18  ;;  %v4520_v28 = vadd.f32 %v3097_v39, %v4410_v40 }
 0x217   : > { %v2180_v24 = vadd.f32 %v2179_v45, %v2158_v51  ;;  %v1800_v44 = vpop.f32.mrb[24].mxu1  ;;  %v3057_v36 = vadd.f32 %v4420_v7, %v4437_v21  ;;  %v3059_v38 = vadd.f32 %v4422_v62, %v4442_v5  ;;  %v3061_v39 = vadd.f32 %v4430_v1, %v4437_v21 }
 0x218   : > { %v2199_v31 = vadd.f32 %v2198_v57, %v2159_v16  ;;  %v2063_v46 = vpop.f32.mrb[8].mxu0  ;;  %v3101_v47 = vadd.f32 %v1800_v44, %v4437_v21  ;;  %v1802_v59 = vpop.f32.mrb[25].mxu1  ;;  %v3065_v57 = vadd.f32 %v4434_v17, %v4437_v21 }
 0x219   : > { %v4527_v48 = vadd.f32 %v3053_v22, %v2063_v46  ;;  %v2065_v32 = vpop.f32.mrb[9].mxu0  ;;  %v3105_v40 = vadd.f32 %v1802_v59, %v4442_v5  ;;  %v1804_v60 = vpop.f32.mrb[26].mxu1  ;;  %v3067_v22 = vadd.f32 %v4439_v4, %v4442_v5 }
 0x21a   : > { %v4532_v50 = vadd.f32 %v3055_v35, %v2065_v32  ;;  %v2067_v52 = vpop.f32.mrb[10].mxu0  ;;  %v1805_v25 = vpop.f32.mrb[27].mxu1  ;;  %v4540_v53 = vadd.f32 %v3101_v47, %v4412_v42 }
 0x21b   : > { %v2113_v9 = vadd.f32 %v4527_v48, %v2112_v49  ;;  %v2160_v7 = vmul.f32 %v4527_v48, %v4527_v48  ;;  %v4537_v13 = vadd.f32 %v3057_v36, %v2067_v52  ;;  %v2069_v34 = vpop.f32.mrb[11].mxu0  ;;  %v4548_v11 = vadd.f32 %v3105_v40, %v4414_v43 }
 0x21c   : > { %v2133_v62 = vadd.f32 %v4532_v50, %v2132_v63  ;;  %v2161_v8 = vmul.f32 %v4532_v50, %v4532_v50  ;;  %v4545_v54 = vadd.f32 %v3059_v38, %v2069_v34  ;;  %v3063_v43 = vadd.f32 %v4432_v2, %v4442_v5 }
 0x21d   : > { %v2181_v56 = vadd.f32 %v2180_v24, %v2160_v7  ;;  %v2114_v33 = vadd.f32 %v4537_v13, %v2113_v9  ;;  %v2162_v14 = vmul.f32 %v4537_v13, %v4537_v13 }
 0x21e   : > { %v2200_v37 = vadd.f32 %v2199_v31, %v2161_v8  ;;  %v2134_v42 = vadd.f32 %v4545_v54, %v2133_v62  ;;  %v2163_v58 = vmul.f32 %v4545_v54, %v4545_v54 }
 0x21f   : > { %v2182_v45 = vadd.f32 %v2181_v56, %v2162_v14 }
 0x220   : > { %v2201_v49 = vadd.f32 %v2200_v37, %v2163_v58  ;;  %v2073_v51 = vpop.f32.mrb[12].mxu0 }
 0x221   : > { %v4562_v63 = vadd.f32 %v3061_v39, %v2073_v51  ;;  %v2075_v16 = vpop.f32.mrb[13].mxu0 }
 0x222   : > { %v4566_v24 = vadd.f32 %v3063_v43, %v2075_v16  ;;  %v2077_v35 = vpop.f32.mrb[14].mxu0 }
 0x223   : > { %v2115_v1 = vadd.f32 %v4562_v63, %v2114_v33  ;;  %v2164_v31 = vmul.f32 %v4562_v63, %v4562_v63  ;;  %v4571_v2 = vadd.f32 %v3065_v57, %v2077_v35  ;;  %v2079_v44 = vpop.f32.mrb[15].mxu0 }
 0x224   : > { %v2135_v46 = vadd.f32 %v4566_v24, %v2134_v42  ;;  %v2165_v17 = vmul.f32 %v4566_v24, %v4566_v24  ;;  %v4576_v21 = vadd.f32 %v3067_v22, %v2079_v44 }
 0x225   : > { %v2183_v36 = vadd.f32 %v2182_v45, %v2164_v31  ;;  %v2116_v4 = vadd.f32 %v4571_v2, %v2115_v1  ;;  %v2166_v5 = vmul.f32 %v4571_v2, %v4571_v2 }
 0x226   : > { %v2202_v47 = vadd.f32 %v2201_v49, %v2165_v17  ;;  %v2136_v59 = vadd.f32 %v4576_v21, %v2135_v46  ;;  %v2167_v32 = vmul.f32 %v4576_v21, %v4576_v21 }
 0x227   : > { %v2184_v38 = vadd.f32 %v2183_v36, %v2166_v5  ;;  %v1982_v60 = vpop.f32.mrb[28].mxu1 }
 0x228   : > { %v2203_v40 = vadd.f32 %v2202_v47, %v2167_v32  ;;  %v2083_v52 = vpop.f32.mrb[28].mxu0  ;;  %v3071_v9 = vadd.f32 %v4457_v61, %v1982_v60  ;;  %v1984_v7 = vpop.f32.mrb[29].mxu1 }
 0x229   : > { %v2085_v25 = vpop.f32.mrb[29].mxu0  ;;  %v3075_v34 = vadd.f32 %v4462_v10, %v1984_v7  ;;  %v1986_v62 = vpop.f32.mrb[30].mxu1 }
 0x22a   : > { %v2087_v8 = vpop.f32.mrb[30].mxu0  ;;  %v4586_v56 = vadd.f32 %v3071_v9, %v2083_v52  ;;  %v3079_v33 = vadd.f32 %v4470_v23, %v1986_v62  ;;  %v1988_v14 = vpop.f32.mrb[31].mxu1 }
 0x22b   : > { %v2089_v37 = vpop.f32.mrb[31].mxu0  ;;  %v4589_v42 = vadd.f32 %v3075_v34, %v2085_v25  ;;  %v3083_v58 = vadd.f32 %v4478_v30, %v1988_v14 }
 0x22c   : > { %v2117_v39 = vadd.f32 %v4586_v56, %v2116_v4  ;;  %v2168_v61 = vmul.f32 %v4586_v56, %v4586_v56  ;;  %v4595_v45 = vadd.f32 %v3079_v33, %v2087_v8 }
 0x22d   : > { %v2137_v10 = vadd.f32 %v4589_v42, %v2136_v59  ;;  %v2169_v43 = vmul.f32 %v4589_v42, %v4589_v42  ;;  %v4600_v49 = vadd.f32 %v3083_v58, %v2089_v37 }
 0x22e   : > { %v2185_v23 = vadd.f32 %v2184_v38, %v2168_v61  ;;  %v2118_v51 = vadd.f32 %v4595_v45, %v2117_v39  ;;  %v2170_v30 = vmul.f32 %v4595_v45, %v4595_v45 }
 0x22f   : > { %v2204_v57 = vadd.f32 %v2203_v40, %v2169_v43  ;;  %v2138_v16 = vadd.f32 %v4600_v49, %v2137_v10  ;;  %v2171_v22 = vmul.f32 %v4600_v49, %v4600_v49  ;;  %v1992_v35 = vpop.f32.mrb[32].mxu1 }
 0x230   : > { %v2093_v1 = vpop.f32.mrb[32].mxu0  ;;  %v2186_v31 = vadd.f32 %v2185_v23, %v2170_v30  ;;  %v3087_v44 = vadd.f32 %v4506_v55, %v1992_v35  ;;  %v1994_v46 = vpop.f32.mrb[33].mxu1 }
 0x231   : > { %v2095_v17 = vpop.f32.mrb[33].mxu0  ;;  %v2205_v36 = vadd.f32 %v2204_v57, %v2171_v22  ;;  %v3091_v4 = vadd.f32 %v4512_v19, %v1994_v46  ;;  %v1996_v5 = vpop.f32.mrb[34].mxu1 }
 0x232   : > { %v2097_v47 = vpop.f32.mrb[34].mxu0  ;;  %v4610_v59 = vadd.f32 %v3087_v44, %v2093_v1  ;;  %v3095_v32 = vadd.f32 %v4517_v26, %v1996_v5  ;;  %v1998_v38 = vpop.f32.mrb[35].mxu1 }
 0x233   : > { %v2099_v40 = vpop.f32.mrb[35].mxu0  ;;  %v4613_v60 = vadd.f32 %v3091_v4, %v2095_v17  ;;  %v3099_v52 = vadd.f32 %v4520_v28, %v1998_v38 }
 0x234   : > { %v2119_v9 = vadd.f32 %v4610_v59, %v2118_v51  ;;  %v2172_v55 = vmul.f32 %v4610_v59, %v4610_v59  ;;  %v4619_v7 = vadd.f32 %v3095_v32, %v2097_v47 }
 0x235   : > { %v2139_v19 = vadd.f32 %v4613_v60, %v2138_v16  ;;  %v2173_v25 = vmul.f32 %v4613_v60, %v4613_v60  ;;  %v4624_v34 = vadd.f32 %v3099_v52, %v2099_v40 }
 0x236   : > { %v2187_v26 = vadd.f32 %v2186_v31, %v2172_v55  ;;  %v2120_v62 = vadd.f32 %v4619_v7, %v2119_v9  ;;  %v2174_v28 = vmul.f32 %v4619_v7, %v4619_v7 }
 0x237   : > { %v2206_v8 = vadd.f32 %v2205_v36, %v2173_v25  ;;  %v2140_v33 = vadd.f32 %v4624_v34, %v2139_v19  ;;  %v2175_v14 = vmul.f32 %v4624_v34, %v4624_v34  ;;  %v2002_v37 = vpop.f32.mrb[36].mxu1 }
 0x238   : > { %v2103_v58 = vpop.f32.mrb[36].mxu0  ;;  %v2188_v39 = vadd.f32 %v2187_v26, %v2174_v28  ;;  %v3103_v61 = vadd.f32 %v4540_v53, %v2002_v37  ;;  %v2004_v10 = vpop.f32.mrb[37].mxu1 }
 0x239   : > { %v2105_v43 = vpop.f32.mrb[37].mxu0  ;;  %v2207_v23 = vadd.f32 %v2206_v8, %v2175_v14  ;;  %v3107_v51 = vadd.f32 %v4548_v11, %v2004_v10  ;;  %v2006_v30 = vpop.f32.mrb[38].mxu1 }
 0x23a   : > { %v2107_v57 = vpop.f32.mrb[38].mxu0  ;;  %v4634_v16 = vadd.f32 %v3103_v61, %v2103_v58  ;;  %v2007_v22 = vpop.f32.mrb[39].mxu1 }
 0x23b   : > { %v2108_v35 = vpop.f32.mrb[39].mxu0  ;;  %v4636_v1 = vadd.f32 %v3107_v51, %v2105_v43 }
 0x23c   : > { %v2122_v31 = vsel %vm2121_vm0, %v4634_v16, 0.0  ;;  %v2176_v53 = vmul.f32 %v4634_v16, %v4634_v16 }
 0x23d   : > { %v2123_v44 = vadd.f32 %v2122_v31, %v2120_v62  ;;  %v2141_v46 = vsel %vm2121_vm0, %v4636_v1, 0.0  ;;  %v2177_v11 = vmul.f32 %v4636_v1, %v4636_v1 }
 0x23e   : > { %v2189_v17 = vsel %vm2121_vm0, %v2176_v53, 0.0  ;;  %v2142_v36 = vadd.f32 %v2141_v46, %v2140_v33 }
 0x23f   : > { %v2124_v4 = vrot.slane %v2123_v44, 4  ;;  %v2190_v5 = vadd.f32 %v2189_v17, %v2188_v39  ;;  %v2208_v47 = vsel %vm2121_vm0, %v2177_v11, 0.0 }
 0x240   : > { %v2143_v32 = vrot.slane %v2142_v36, 4  ;;  %v2209_v38 = vadd.f32 %v2208_v47, %v2207_v23 }
 0x241   : > { %v2125_v40 = vadd.f32 %v2124_v4, %v2123_v44  ;;  %v2191_v52 = vrot.slane %v2190_v5, 4 }
 0x242   : > { %v2144_v9 = vadd.f32 %v2143_v32, %v2142_v36  ;;  %v2210_v55 = vrot.slane %v2209_v38, 4 }
 0x243   : > { %v2126_v19 = vrot.slane %v2125_v40, 2  ;;  %v2192_v25 = vadd.f32 %v2191_v52, %v2190_v5 }
 0x244   : > { %v2145_v26 = vrot.slane %v2144_v9, 2  ;;  %v2211_v62 = vadd.f32 %v2210_v55, %v2209_v38 }
 0x245   : > { %v2127_v28 = vadd.f32 %v2126_v19, %v2125_v40  ;;  %v2193_v8 = vrot.slane %v2192_v25, 2 }
 0x246   : > { %v2146_v14 = vadd.f32 %v2145_v26, %v2144_v9  ;;  %v2212_v37 = vrot.slane %v2211_v62, 2 }
 0x247   : > { %v2128_v58 = vrot.slane %v2127_v28, 1  ;;  %v2194_v33 = vadd.f32 %v2193_v8, %v2192_v25 }
 0x248   : > { %v2147_v61 = vrot.slane %v2146_v14, 1  ;;  %v2213_v39 = vadd.f32 %v2212_v37, %v2211_v62 }
 0x249   : > { %v2129_v10 = vadd.f32 %v2128_v58, %v2127_v28  ;;  %v2195_v43 = vrot.slane %v2194_v33, 1 }
 0x24a   : > { %v2148_v51 = vadd.f32 %v2147_v61, %v2146_v14  ;;  %v2214_v23 = vrot.slane %v2213_v39, 1 }
 0x24b   : > { %v2150_v30 = vmul.f32 0.010204081, %v2129_v10  ;;  %v2196_v57 = vadd.f32 %v2195_v43, %v2194_v33 }
 0x24c   : > { %v4648_v22 = vmul.f32 0.010204081, %v2148_v51  ;;  %v2215_v35 = vadd.f32 %v2214_v23, %v2213_v39 }
 0x24d   : > { %v2216_v31 = vmul.f32 0.010204081, %v2196_v57  ;;  %v2218_v53 = vmul.f32 %v2150_v30, %v2150_v30  ;;  %v2224_v44 = vsub.f32 %v4448_v12, %v2150_v30  ;;  %v2226_v46 = vsub.f32 %v4455_v20, %v2150_v30 }
 0x24e   : > { %v2228_v11 = vsub.f32 %v4484_v3, %v2150_v30  ;;  %v2230_v17 = vsub.f32 %v4494_v29, %v2150_v30  ;;  %v2232_v36 = vsub.f32 %v4527_v48, %v2150_v30  ;;  %v2234_v4 = vsub.f32 %v4537_v13, %v2150_v30 }
 0x24f   : > { %v2220_v5 = vsub.f32 %v2216_v31, %v2218_v53  ;;  %v2236_v47 = vsub.f32 %v4562_v63, %v2150_v30  ;;  %v2238_v32 = vsub.f32 %v4571_v2, %v2150_v30  ;;  %v2240_v38 = vsub.f32 %v4586_v56, %v2150_v30 }
 0x250   : > { %v2242_v40 = vsub.f32 %v4595_v45, %v2150_v30  ;;  %v2244_v12 = vsub.f32 %v4610_v59, %v2150_v30  ;;  %v2246_v20 = vsub.f32 %v4619_v7, %v2150_v30  ;;  %v2248_v3 = vsub.f32 %v4634_v16, %v2150_v30 }
 0x251   : > { %v2222_v29 = vmax.f32 %v2220_v5, 0.0  ;;  %v2217_v52 = vmul.f32 0.010204081, %v2215_v35  ;;  %v2219_v48 = vmul.f32 %v4648_v22, %v4648_v22  ;;  %v2225_v13 = vsub.f32 %v4452_v41, %v4648_v22 }
 0x252   : > { %v2227_v63 = vsub.f32 %v4460_v6, %v4648_v22  ;;  %v2229_v2 = vsub.f32 %v4488_v27, %v4648_v22  ;;  %v2231_v56 = vsub.f32 %v4500_v18, %v4648_v22  ;;  %v2233_v45 = vsub.f32 %v4532_v50, %v4648_v22 }
 0x253   : > { %v2250_v59 = vadd.f32 1e-05, %v2222_v29  ;;  %v2221_v7 = vsub.f32 %v2217_v52, %v2219_v48  ;;  %v2235_v16 = vsub.f32 %v4545_v54, %v4648_v22  ;;  %v2237_v41 = vsub.f32 %v4566_v24, %v4648_v22 }
 0x254   : > { %v2239_v6 = vsub.f32 %v4576_v21, %v4648_v22  ;;  %v2241_v27 = vsub.f32 %v4589_v42, %v4648_v22  ;;  %v2243_v18 = vsub.f32 %v4600_v49, %v4648_v22  ;;  %v2245_v50 = vsub.f32 %v4613_v60, %v4648_v22  ;;  %v2280_v21 = vld [vmem:[%s300_s11] sm:$0x3]  ;;  %v2318_v60 = vld [vmem:[%s309_s6] sm:$0x3] }
 0x255   : > { %3533 = vrsqrt.f32 %v2250_v59  ;;  %v2223_v9 = vmax.f32 %v2221_v7, 0.0  ;;  %v2247_v54 = vsub.f32 %v4624_v34, %v4648_v22  ;;  %v2249_v24 = vsub.f32 %v4636_v1, %v4648_v22 }
 0x256   : > { %v2285_v19 = vrot.slane %v2280_v21, %v4424_v0  ;;  %v4697_v10 = vrot.slane %v2318_v60, %v4424_v0  ;;  %v4700_v43 = vrot.slane %v2318_v60, %v4428_v15  ;;  %v2289_v30 = vrot.slane %v2280_v21, %v4428_v15 }
 0x257   : > { %v2251_v55 = vadd.f32 1e-05, %v2223_v9 }
 0x259   : > { %3535 = vrsqrt.f32 %v2251_v55 }
 0x25f   : > { %v3534_v42 = vpop.eup %3533 }
 0x260   : > { %v2254_v25 = vmul.f32 %v3534_v42, %v2224_v44  ;;  %v2256_v49 = vmul.f32 %v3534_v42, %v2226_v46  ;;  %v2258_v26 = vmul.f32 %v3534_v42, %v2228_v11  ;;  %v2260_v62 = vmul.f32 %v3534_v42, %v2230_v17 }
 0x261   : > { %v2262_v28 = vmul.f32 %v3534_v42, %v2232_v36  ;;  %v2264_v8 = vmul.f32 %v3534_v42, %v2234_v4  ;;  %v2266_v14 = vmul.f32 %v3534_v42, %v2236_v47  ;;  %v2268_v34 = vmul.f32 %v3534_v42, %v2238_v32 }
 0x262   : > { %v2270_v37 = vmul.f32 %v3534_v42, %v2240_v38  ;;  %v2272_v58 = vmul.f32 %v3534_v42, %v2242_v40  ;;  %v2274_v1 = vmul.f32 %v3534_v42, %v2244_v12  ;;  %v2276_v33 = vmul.f32 %v3534_v42, %v2246_v20 }
 0x263   : > { %v3536_v61 = vpop.eup %3535  ;;  %v2278_v39 = vmul.f32 %v3534_v42, %v2248_v3  ;;  %v2292_v51 = vmul.f32 %v2285_v19, %v2254_v25  ;;  %v2294_v23 = vmul.f32 %v2285_v19, %v2256_v49  ;;  %v2296_v57 = vmul.f32 %v2285_v19, %v2258_v26 }
 0x264   : > { %v2255_v35 = vmul.f32 %v3536_v61, %v2225_v13  ;;  %v2257_v31 = vmul.f32 %v3536_v61, %v2227_v63  ;;  %v2259_v53 = vmul.f32 %v3536_v61, %v2229_v2  ;;  %v2261_v44 = vmul.f32 %v3536_v61, %v2231_v56 }
 0x265   : > { %v2316_v22 = vmul.f32 %v2285_v19, %v2278_v39  ;;  %v2263_v46 = vmul.f32 %v3536_v61, %v2233_v45  ;;  %v2265_v11 = vmul.f32 %v3536_v61, %v2235_v16  ;;  %v2267_v0 = vmul.f32 %v3536_v61, %v2237_v41 }
 0x266   : > { %v2269_v36 = vmul.f32 %v3536_v61, %v2239_v6  ;;  %v2271_v4 = vmul.f32 %v3536_v61, %v2241_v27  ;;  %v2273_v5 = vmul.f32 %v3536_v61, %v2243_v18  ;;  %v2275_v47 = vmul.f32 %v3536_v61, %v2245_v50 }
 0x267   : > { %v4704_v17 = vadd.f32 %v4697_v10, %v2316_v22  ;;  %v2277_v32 = vmul.f32 %v3536_v61, %v2247_v54  ;;  %v2279_v38 = vmul.f32 %v3536_v61, %v2249_v24  ;;  %v2298_v40 = vmul.f32 %v2285_v19, %v2260_v62 }
 0x268   : > { %v2300_v15 = vmul.f32 %v2285_v19, %v2262_v28  ;;  %v2302_v12 = vmul.f32 %v2285_v19, %v2264_v8  ;;  %v2304_v20 = vmul.f32 %v2285_v19, %v2266_v14  ;;  %v2306_v3 = vmul.f32 %v2285_v19, %v2268_v34 }
 0x269   : > { %v2308_v29 = vmul.f32 %v2285_v19, %v2270_v37  ;;  %v2310_v52 = vmul.f32 %v2285_v19, %v2272_v58  ;;  %v2312_v48 = vmul.f32 %v2285_v19, %v2274_v1  ;;  %v2314_v13 = vmul.f32 %v2285_v19, %v2276_v33 }
 0x26a   : > { %v4707_v63 = vmul.f32 0.01, %v4704_v17  ;;  %v2293_v2 = vmul.f32 %v2289_v30, %v2255_v35  ;;  %v2295_v56 = vmul.f32 %v2289_v30, %v2257_v31  ;;  %v2297_v45 = vmul.f32 %v2289_v30, %v2259_v53 }
 0x26b   : > { %v2299_v59 = vmul.f32 %v2289_v30, %v2261_v44  ;;  %v2301_v7 = vmul.f32 %v2289_v30, %v2263_v46  ;;  %v2303_v16 = vmul.f32 %v2289_v30, %v2265_v11  ;;  %v2305_v41 = vmul.f32 %v2289_v30, %v2267_v0 }
 0x26c   : > { %v2307_v6 = vmul.f32 %v2289_v30, %v2269_v36  ;;  %v2309_v27 = vmul.f32 %v2289_v30, %v2271_v4  ;;  %v2311_v18 = vmul.f32 %v2289_v30, %v2273_v5  ;;  %v2313_v50 = vmul.f32 %v2289_v30, %v2275_v47 }
 0x26d   : > { %v2315_v9 = vmul.f32 %v2289_v30, %v2277_v32  ;;  %v2317_v54 = vmul.f32 %v2289_v30, %v2279_v38  ;;  %v2330_v24 = vadd.f32 %v4697_v10, %v2292_v51  ;;  %vm2380_vm1 = vcmp.ge.f32.partialorder %v4704_v17, 0.0 }
 0x26e   : > { %v4712_v55 = vadd.f32 %v4700_v43, %v2293_v2  ;;  %v4715_v21 = vadd.f32 %v4697_v10, %v2294_v23  ;;  %v4718_v42 = vadd.f32 %v4700_v43, %v2295_v56  ;;  %v4721_v19 = vadd.f32 %v4697_v10, %v2296_v57 }
 0x26f   : > { %v4724_v25 = vadd.f32 %v4700_v43, %v2297_v45  ;;  %v4727_v49 = vadd.f32 %v4697_v10, %v2298_v40  ;;  %v4730_v26 = vadd.f32 %v4700_v43, %v2299_v59  ;;  %v4733_v62 = vadd.f32 %v4697_v10, %v2300_v15 }
 0x270   : > { %v4736_v60 = vadd.f32 %v4700_v43, %v2301_v7  ;;  %v4739_v28 = vadd.f32 %v4697_v10, %v2302_v12  ;;  %v4742_v8 = vadd.f32 %v4700_v43, %v2303_v16  ;;  %v4745_v14 = vadd.f32 %v4697_v10, %v2304_v20 }
 0x271   : > { %v4748_v34 = vadd.f32 %v4700_v43, %v2305_v41  ;;  %v4751_v37 = vadd.f32 %v4697_v10, %v2306_v3  ;;  %v4754_v58 = vadd.f32 %v4700_v43, %v2307_v6  ;;  %v4757_v1 = vadd.f32 %v4697_v10, %v2308_v29 }
 0x272   : > { %v4760_v33 = vadd.f32 %v4700_v43, %v2309_v27  ;;  %v4763_v61 = vadd.f32 %v4697_v10, %v2310_v52  ;;  %v4766_v39 = vadd.f32 %v4700_v43, %v2311_v18  ;;  %v4769_v51 = vadd.f32 %v4697_v10, %v2312_v48 }
 0x273   : > { %v4772_v23 = vadd.f32 %v4700_v43, %v2313_v50  ;;  %v4775_v30 = vadd.f32 %v4697_v10, %v2314_v13  ;;  %v4778_v57 = vadd.f32 %v4700_v43, %v2315_v9  ;;  %v4781_v22 = vadd.f32 %v4700_v43, %v2317_v54 }
 0x274   : > { %vm2356_vm2 = vcmp.ge.f32.partialorder %v2330_v24, 0.0  ;;  %vm2357_vm3 = vcmp.ge.f32.partialorder %v4712_v55, 0.0  ;;  %vm2358_vm4 = vcmp.ge.f32.partialorder %v4715_v21, 0.0  ;;  %vm2359_vm5 = vcmp.ge.f32.partialorder %v4718_v42, 0.0 }
 0x275   : > { %vm2360_vm6 = vcmp.ge.f32.partialorder %v4721_v19, 0.0  ;;  %vm2366_vm12 = vcmp.ge.f32.partialorder %v4739_v28, 0.0  ;;  %vm2367_vm13 = vcmp.ge.f32.partialorder %v4742_v8, 0.0  ;;  %vm2368_vm14 = vcmp.ge.f32.partialorder %v4745_v14, 0.0 }
 0x276   : > { %vm2369_vm15 = vcmp.ge.f32.partialorder %v4748_v34, 0.0  ;;  %vm2374_vm10 = vcmp.ge.f32.partialorder %v4763_v61, 0.0  ;;  %v2382_v10 = vmul.f32 0.01, %v2330_v24  ;;  %v2383_v43 = vmul.f32 0.01, %v4712_v55 }
 0x277   : > { %v4807_v35 = vsel %vm2380_vm1, %v4704_v17, %v4707_v63  ;;  %vm2376_vm0 = vcmp.ge.f32.partialorder %v4769_v51, 0.0  ;;  %vm2377_vm7 = vcmp.ge.f32.partialorder %v4772_v23, 0.0  ;;  %vm2378_vm8 = vcmp.ge.f32.partialorder %v4775_v30, 0.0 }
 0x278   : > { %vm2379_vm9 = vcmp.ge.f32.partialorder %v4778_v57, 0.0  ;;  %v2384_v31 = vmul.f32 0.01, %v4715_v21  ;;  %v2385_v53 = vmul.f32 0.01, %v4718_v42  ;;  %vm2381_vm11 = vcmp.ge.f32.partialorder %v4781_v22, 0.0 }
 0x279   : > { %v2386_v44 = vmul.f32 0.01, %v4721_v19  ;;  %v2387_v46 = vmul.f32 0.01, %v4724_v25  ;;  %v2388_v11 = vmul.f32 0.01, %v4727_v49  ;;  %v2408_v0 = vsel %vm2356_vm2, %v2330_v24, %v2382_v10 }
 0x27a   : > { %v2389_v17 = vmul.f32 0.01, %v4730_v26  ;;  %v2390_v36 = vmul.f32 0.01, %v4733_v62  ;;  %v2391_v4 = vmul.f32 0.01, %v4736_v60  ;;  %v2409_v47 = vsel %vm2357_vm3, %v4712_v55, %v2383_v43 }
 0x27b   : > { %v2392_v5 = vmul.f32 0.01, %v4739_v28  ;;  %v2393_v32 = vmul.f32 0.01, %v4742_v8  ;;  %v2394_v38 = vmul.f32 0.01, %v4745_v14  ;;  %v2410_v15 = vsel %vm2358_vm4, %v4715_v21, %v2384_v31 }
 0x27c   : > { %v2395_v40 = vmul.f32 0.01, %v4748_v34  ;;  %v2396_v12 = vmul.f32 0.01, %v4751_v37  ;;  %v2397_v20 = vmul.f32 0.01, %v4754_v58  ;;  %v2411_v29 = vsel %vm2359_vm5, %v4718_v42, %v2385_v53 }
 0x27d   : > { %v2398_v3 = vmul.f32 0.01, %v4757_v1  ;;  %v2399_v52 = vmul.f32 0.01, %v4760_v33  ;;  %v2400_v48 = vmul.f32 0.01, %v4763_v61  ;;  %v2412_v63 = vsel %vm2360_vm6, %v4721_v19, %v2386_v44 }
 0x27e   : > { %v2401_v13 = vmul.f32 0.01, %v4766_v39  ;;  %v2402_v2 = vmul.f32 0.01, %v4769_v51  ;;  %v2403_v56 = vmul.f32 0.01, %v4772_v23  ;;  %v2418_v50 = vsel %vm2366_vm12, %v4739_v28, %v2392_v5 }
 0x27f   : > { %v2404_v45 = vmul.f32 0.01, %v4775_v30  ;;  %vm4984_vm1 = vcmp.ge.f32.partialorder %v4724_v25, 0.0  ;;  %v2405_v7 = vmul.f32 0.01, %v4778_v57  ;;  %vm4985_vm2 = vcmp.ge.f32.partialorder %v4727_v49, 0.0 }
 0x280   : > { %v2413_v59 = vsel %vm4984_vm1, %v4724_v25, %v2387_v46  ;;  %v2407_v16 = vmul.f32 0.01, %v4781_v22  ;;  %v2414_v41 = vsel %vm4985_vm2, %v4727_v49, %v2388_v11  ;;  %vm4986_vm3 = vcmp.ge.f32.partialorder %v4730_v26, 0.0 }
 0x281   : > { %v2415_v6 = vsel %vm4986_vm3, %v4730_v26, %v2389_v17  ;;  %vm4987_vm4 = vcmp.ge.f32.partialorder %v4733_v62, 0.0  ;;  %vm4988_vm5 = vcmp.ge.f32.partialorder %v4736_v60, 0.0  ;;  %v2419_v9 = vsel %vm2367_vm13, %v4742_v8, %v2393_v32 }
 0x282   : > { %v2416_v27 = vsel %vm4987_vm4, %v4733_v62, %v2390_v36  ;;  %v2417_v18 = vsel %vm4988_vm5, %v4736_v60, %v2391_v4  ;;  %v2420_v54 = vsel %vm2368_vm14, %v4745_v14, %v2394_v38  ;;  %v2421_v24 = vsel %vm2369_vm15, %v4748_v34, %v2395_v40 }
 0x283   : > { %vm4989_vm6 = vcmp.ge.f32.partialorder %v4751_v37, 0.0  ;;  %vm4990_vm1 = vcmp.ge.f32.partialorder %v4754_v58, 0.0  ;;  %vm4991_vm12 = vcmp.ge.f32.partialorder %v4757_v1, 0.0  ;;  %vm4992_vm13 = vcmp.ge.f32.partialorder %v4760_v33, 0.0 }
 0x284   : > { %v2422_v55 = vsel %vm4989_vm6, %v4751_v37, %v2396_v12  ;;  %v2423_v21 = vsel %vm4990_vm1, %v4754_v58, %v2397_v20  ;;  %v2424_v42 = vsel %vm4991_vm12, %v4757_v1, %v2398_v3  ;;  %v2425_v19 = vsel %vm4992_vm13, %v4760_v33, %v2399_v52 }
 0x285   : > { %v2426_v25 = vsel %vm2374_vm10, %v4763_v61, %v2400_v48  ;;  %vm4993_vm14 = vcmp.ge.f32.partialorder %v4766_v39, 0.0  ;;  %v2428_v26 = vsel %vm2376_vm0, %v4769_v51, %v2402_v2  ;;  %v2429_v62 = vsel %vm2377_vm7, %v4772_v23, %v2403_v56 }
 0x286   : > { %v2427_v49 = vsel %vm4993_vm14, %v4766_v39, %v2401_v13  ;;  %v2430_v60 = vsel %vm2378_vm8, %v4775_v30, %v2404_v45  ;;  %v2431_v28 = vsel %vm2379_vm9, %v4778_v57, %v2405_v7  ;;  %v2433_v8 = vsel %vm2381_vm11, %v4781_v22, %v2407_v16 }
 0x287   : > { %v2991_v14 = vpack.c.bf16 %v2409_v47, %v2408_v0  ;;  %v2992_v34 = vpack.c.bf16 %v2411_v29, %v2410_v15  ;;  %v2993_v37 = vpack.c.bf16 %v2413_v59, %v2412_v63  ;;  %v2994_v58 = vpack.c.bf16 %v2415_v6, %v2414_v41 }
 0x288   : > { %v2995_v1 = vpack.c.bf16 %v2417_v18, %v2416_v27  ;;  %v2996_v33 = vpack.c.bf16 %v2419_v9, %v2418_v50  ;;  %v2997_v61 = vpack.c.bf16 %v2421_v24, %v2420_v54  ;;  %v2998_v39 = vpack.c.bf16 %v2423_v21, %v2422_v55 }
 0x289   : > { %v2999_v51 = vpack.c.bf16 %v2425_v19, %v2424_v42  ;;  %v3000_v23 = vpack.c.bf16 %v2427_v49, %v2426_v25  ;;  %v3001_v10 = vpack.c.bf16 %v2429_v62, %v2428_v26  ;;  %2514 = vst [vmem:[%s4913_s9] sm:$0xff] %v2991_v14  ;;  %2515 = vst [vmem:[%s4913_s9 + $0x8] sm:$0xff] %v2992_v34  ;;  %2533 = sbr.rel (!%p4994_p13) target bundleno = 664 (0x298), region = 60 }
 0x28a   : > { %2516 = vst [vmem:[%s4913_s9 + $0x10] sm:$0xff] %v2993_v37  ;;  %v3002_v30 = vpack.c.bf16 %v2431_v28, %v2430_v60  ;;  %v3003_v57 = vpack.c.bf16 %v2433_v8, %v4807_v35  ;;  %2517 = vst [vmem:[%s4913_s9 + $0x18] sm:$0xff] %v2994_v58 }
 0x28b   : > { %2518 = vst [vmem:[%s4913_s9 + $0x20] sm:$0xff] %v2995_v1  ;;  %2519 = vst [vmem:[%s4913_s9 + $0x28] sm:$0xff] %v2996_v33 }
 0x28c   : > { %2520 = vst [vmem:[%s4913_s9 + $0x30] sm:$0xff] %v2997_v61  ;;  %2521 = vst [vmem:[%s4913_s9 + $0x38] sm:$0xff] %v2998_v39 }
 0x28d   : > { %2522 = vst [vmem:[%s4913_s9 + $0x40] sm:$0xff] %v2999_v51  ;;  %2523 = vst [vmem:[%s4913_s9 + $0x48] sm:$0xff] %v3000_v23 }
 0x28e   : > { %2524 = vst [vmem:[%s4913_s9 + $0x50] sm:$0xff] %v3001_v10  ;;  %2525 = vst [vmem:[%s4913_s9 + $0x58] sm:$0xff] %v3002_v30 }
 0x28f   : > { %2526 = vst [vmem:[%s4913_s9 + $0x60] sm:$0x11] %v3003_v57 }
 0x290   : > { %v2588_v22 = vld [vmem:[%s4913_s9] sm:$0xff]  ;;  %v2590_v43 = vld [vmem:[%s4913_s9 + $0x8] sm:$0xff] }
 0x291   : > { %v2592_v35 = vld [vmem:[%s4913_s9 + $0x10] sm:$0xff]  ;;  %v2594_v31 = vld [vmem:[%s4913_s9 + $0x18] sm:$0xff]  ;;  %2589 = vst [vmem:[%s2536_s15] sm:$0xff] %v2588_v22  ;;  %2591 = vst [vmem:[%s2536_s15 + $0x10] sm:$0xff] %v2590_v43 }
 0x292   : > { %v2596_v53 = vld [vmem:[%s4913_s9 + $0x20] sm:$0xff]  ;;  %v2598_v44 = vld [vmem:[%s4913_s9 + $0x28] sm:$0xff]  ;;  %2593 = vst [vmem:[%s2536_s15 + $0x20] sm:$0xff] %v2592_v35  ;;  %2595 = vst [vmem:[%s2536_s15 + $0x30] sm:$0xff] %v2594_v31 }
 0x293   : > { %2597 = vst [vmem:[%s2536_s15 + $0x40] sm:$0xff] %v2596_v53  ;;  %2599 = vst [vmem:[%s2536_s15 + $0x50] sm:$0xff] %v2598_v44  ;;  %v2600_v46 = vld [vmem:[%s4913_s9 + $0x30] sm:$0xff]  ;;  %v2602_v11 = vld [vmem:[%s4913_s9 + $0x38] sm:$0xff] }
 0x294   : > { %v2604_v17 = vld [vmem:[%s4913_s9 + $0x40] sm:$0xff]  ;;  %2601 = vst [vmem:[%s2536_s15 + $0x60] sm:$0xff] %v2600_v46  ;;  %2603 = vst [vmem:[%s2536_s15 + $0x70] sm:$0xff] %v2602_v11  ;;  %v2606_v0 = vld [vmem:[%s4913_s9 + $0x48] sm:$0xff] }
 0x295   : > { %2605 = vst [vmem:[%s2536_s15 + $0x80] sm:$0xff] %v2604_v17  ;;  %v2608_v36 = vld [vmem:[%s4913_s9 + $0x50] sm:$0xff]  ;;  %v2610_v4 = vld [vmem:[%s4913_s9 + $0x58] sm:$0xff]  ;;  %2607 = vst [vmem:[%s2536_s15 + $0x90] sm:$0xff] %v2606_v0 }
 0x296   : > { %2609 = vst [vmem:[%s2536_s15 + $0xa0] sm:$0xff] %v2608_v36  ;;  %2611 = vst [vmem:[%s2536_s15 + $0xb0] sm:$0xff] %v2610_v4  ;;  %v2612_v5 = vld [vmem:[%s4913_s9 + $0x60] sm:$0xff] }
 0x297   : > { %2613 = vst [vmem:[%s2536_s15 + $0xc0] sm:$0xff] %v2612_v5 }
 0x298 PF: > { %s4995_s22 = sld [smem:[#allocation13_spill]]  ;;  %p21_p7 = scmp.ge.s32.totalorder %s3761_s23, 4  }
 0x299   : > { %s4996_s18 = smov %s3691_s19  ;;  %s4997_s19 = smov %s3695_s20 }
 0x29a   : > { %s4999_s21 = smov %s3761_s23  ;;  %23 = sbr.rel (!%p21_p7) target bundleno = 10 (0xa), region = 155 }
 0x29e   : > { %s4998_s20 = smov %s4995_s22 }
 0x2a1   :  { %2629 = vsyncpa [#allocation3], 1 }
 0x2a2   :  { %2631 = vsyncpa [#allocation3 + $0x1], 1 }
 0x2a3   :  { %2632 = vsyncpa [#allocation5], 1 }
 0x2a4   :  { %2634 = vsyncpa [#allocation5 + $0x1], 1 }
 0x2a5   :  { %2635 = vsyncpa [#allocation8], 1 }
 0x2a6   :  { %2637 = vsyncpa [#allocation8 + $0x1], 1 }

// kernel: encoder_forward.5
= control target key start
LH: loop header
LB: loop body
LE: loop exit
PB: predicated region body
PF: predicated region fallthrough
CT: control target
= control target key end

     0   :  { %8 = vsyncpa [#allocation4], 0  ;;  %s7069_s0 = inlined_call_operand.vmem [shape: bf16[2,25088], index: 0, kind: input, shape index: {}]   ;;  %s7070_s1 = inlined_call_operand.hbm [shape: bf16[25088,128], index: 1, kind: input, shape index: {}]   ;;  %s7071_s2 = inlined_call_operand.hbm [shape: f32[1,128], index: 2, kind: input, shape index: {}]   ;;  %s7072_s3 = inlined_call_operand.hbm [shape: f32[2,128], index: 3, kind: output, shape index: {}]  }
   0x1   :  { %10 = vsyncpa [#allocation4 + $0x1], 0 }
   0x2   :  { %11 = vsyncpa [#allocation7], 0 }
   0x3   :  { %12 = vsyncpa [#allocation5], 0  ;;  %s6411_s12 = smov 0   ;;  %s6413_s13 = smov 0  }
   0x4   :  { %s6415_s14 = smov 0   ;;  %s6417_s15 = smov 0  }
   0x5 LB: > { %s6430_s16 = sadd.s32 4294967295, %s6380_s15   ;;  %s6433_s17 = sadd.s32 1, %s6380_s15   ;;  %s6380_s15 = sphi %s6417_s15, %s7091_s15   ;;  %s6376_s14 = sphi %s6415_s14, %s7090_s14   ;;  %s6372_s13 = sphi %s6413_s13, %s7089_s13   ;;  %s6368_s12 = sphi %s6411_s12, %s7088_s12  }
   0x6   : > { %s48_s18 = ssub.s32 %s6380_s15, %s6433_s17  ;;  %s51_s19 = sadd.s32 1, %s6376_s14 }
   0x7   : > { %p49_p0 = scmp.eq.s32.totalorder %s48_s18, 0  ;;  %p58_p1 = scmp.ne.s32.totalorder %s6376_s14, %s6372_s13 }
   0x8   : > { %p59_p2 = scmp.eq.s32.totalorder %s6380_s15, 0  ;;  %p64_p3 = scmp.ne.s32.totalorder %s6372_s13, %s6368_s12 }
   0x9   : > { %s6443_s20 = scalar_select %p49_p0, %s6376_s14, %s51_s19  }
   0xa   : > { %p6445_p4 = por %p59_p2, %p58_p1  ;;  %p7073_p5 = scmp.eq.s32.totalorder %s6430_s16, 0 }
   0xb   : > { %p4823_p6 = scmp.ge.s32.totalorder %s6380_s15, 1  ;;  %p117_p7 = scmp.lt.s32.totalorder %s6380_s15, 5 }
   0xc   : > { %p6454_p8 = por %p7073_p5, %p64_p3  ;;  %s6382_s24 = smov [#allocation6]  }
   0xd   : > { %p6459_p10 = pnand %p4823_p6, %p117_p7  ;;  %s130_s25 = sshll.u32 %s6382_s24, 4  ;;  %s131_s25 = int_to_ptr.vmem [resolvable:$true] %s130_s25 }
   0xe   : > { %s7078_s22 = scalar_select %p6454_p8, 1, 0 }
   0xf   : > { %s7079_s23 = scalar_select %p6459_p10, 1, 0 }
  0x10   : > { %p5799_p11 = pneg %p6459_p10  ;;  %p5808_p12 = scmp.lt.s32.totalorder %s6380_s15, 4 }
  0x11   : > { %s149_s26 = sand.u32 1, %s6376_s14   ;;  %s5229_s30 = smul.u32 50176, %s6380_s15 }
  0x12   : > { %p6469_p13 = pnand %p5799_p11, %p7073_p5  ;;  %p6475_p0 = pnand %p5808_p12, %p6445_p4 }
  0x13   : > { %s5787_s29 = smul.u32 3136, %s149_s26  ;;  %s6254_s6 = scalar_lea.hbm %s7071_s2, 16 }
  0x14   : > { %s7081_s28 = scalar_select %p6475_p0, 1, 0 }
  0x15   : > { %p6255_p1 = scmp.ne.s32.totalorder %s7071_s2, %s6254_s6  ;;  %p6256_p2 = pneg %p6469_p13 }
  0x16   : > { %p6261_p4 = scmp.lt.u32.totalorder %s6254_s6, %s7071_s2 }
  0x17   : > { %p6257_p3 = pnand %p6256_p2, %p6255_p1 }
  0x19   : > { %p6258_p6 = pneg %p6257_p3 }
  0x1b   : > { %p6263_p7 = pnand %p6261_p4, %p6258_p6 }
  0x1d   : > { %6266 = shalt.err (!%p6263_p7)
}
  0x1e   : > { %s6267_s11 = scalar_lea.vmem %s131_s25, 16  ;;  %s6274_s12 = scalar_lea.vmem %s131_s25, 32 }
  0x1f   : > { %p6268_p11 = scmp.ne.s32.totalorder %s131_s25, %s6267_s11  ;;  %p6275_p5 = scmp.lt.s32.totalorder %s131_s25, %s131_s25 }
  0x20   : > { %p6276_p8 = scmp.lt.s32.totalorder %s6274_s12, %s6267_s11 }
  0x21   : > { %p6270_p12 = pnand %p6268_p11, %p6256_p2 }
  0x22   : > { %p6277_p10 = por %p6276_p8, %p6275_p5 }
  0x23   : > { %p6271_p9 = pneg %p6270_p12 }
  0x25   : > { %p6278_p0 = pnand %p6277_p10, %p6271_p9 }
  0x27   : > { %6281 = shalt.err (!%p6278_p0)
}
  0x28   : > { %5802 = dma.hbm_to_vmem [thread:$0]  (!%p6469_p13), %s7071_s2, 16, %s131_s25, [#allocation7]  }
  0x29   : > { %s6499_s24 = scalar_lea.hbm %s7070_s1, %s5229_s30  ;;  %s153_s4 = scalar_lea.vmem [#allocation3], %s5787_s29 }
  0x2a   : > { %s160_s5 = sshll.u32 %s153_s4, 4  ;;  %s6503_s27 = scalar_lea.sflag [#allocation4], %s149_s26  ;;  %s6501_s5 = int_to_ptr.vmem [resolvable:$true] %s160_s5 }
  0x2b   : > { %s6282_s6 = scalar_lea.hbm %s6499_s24, 50176  ;;  %p7082_p8 = scmp.ne.s32.totalorder %s7081_s28, 0 }
  0x2c   : > { %p6283_p5 = scmp.ne.s32.totalorder %s6499_s24, %s6282_s6  ;;  %s6287_s7 = scalar_lea.hbm %s7070_s1, 200704 }
  0x2d   : > { %p6284_p9 = pneg %p7082_p8  ;;  %p6288_p0 = scmp.lt.u32.totalorder %s6499_s24, %s7070_s1 }
  0x2e   : > { %p6289_p1 = scmp.lt.u32.totalorder %s6287_s7, %s6282_s6  ;;  %p6291_p3 = scmp.lt.u32.totalorder %s6282_s6, %s6499_s24 }
  0x2f   : > { %p6285_p10 = pnand %p6284_p9, %p6283_p5 }
  0x30   : > { %p6290_p2 = por %p6289_p1, %p6288_p0 }
  0x31   : > { %p6286_p13 = pneg %p6285_p10 }
  0x32   : > { %p6292_p6 = por %p6291_p3, %p6290_p2 }
  0x34   : > { %p6293_p4 = pnand %p6292_p6, %p6286_p13 }
  0x36   : > { %6296 = shalt.err (!%p6293_p4)
}
  0x37   : > { %s6297_s26 = scalar_lea.vmem %s6501_s5, 50176  ;;  %s6383_s29 = smov [#allocation3]  }
  0x38   : > { %p6298_p7 = scmp.ne.s32.totalorder %s6501_s5, %s6297_s26  ;;  %s6302_s10 = sshll.u32 %s6383_s29, 4  ;;  %s6303_s10 = int_to_ptr.vmem [resolvable:$false] %s6302_s10 }
  0x39   : > { %s6304_s11 = scalar_lea.vmem %s6303_s10, 100352  ;;  %p6305_p5 = scmp.lt.s32.totalorder %s6501_s5, %s6303_s10 }
  0x3a   : > { %p6300_p11 = pnand %p6298_p7, %p6284_p9  ;;  %p6306_p10 = scmp.lt.s32.totalorder %s6304_s11, %s6297_s26 }
  0x3c   : > { %p6301_p12 = pneg %p6300_p11  ;;  %p6307_p0 = por %p6306_p10, %p6305_p5 }
  0x3e   : > { %p6308_p1 = pnand %p6307_p0, %p6301_p12 }
  0x40   : > { %6311 = shalt.err (!%p6308_p1)
}
  0x41   : > { %s6384_s12 = smov 64   ;;  %s6385_s15 = smov 4  }
  0x42   : > { %5806 = dma.hbm_to_vmem [thread:$0]  (!%p7082_p8), %s6499_s24, 50176, %s6501_s5, %s6503_s27, %s6384_s12, %s6384_s12, %s6385_s15  }
  0x43   : > { %p7083_p9 = scmp.ne.s32.totalorder %s7079_s23, 0 }
  0x44   : > { %s174_s18 = sand.u32 (!%p7083_p9), 1, %s6372_s13   ;;  %p7084_p13 = scmp.ne.s32.totalorder (!%p7083_p9), %s7078_s22, 0 }
  0x45   : > { %172 = sbr.rel (%p7083_p9) target bundleno = 789 (0x315), region = 32  ;;  %s175_s21 = scalar_lea.sflag (!%p7083_p9), [#allocation4], %s174_s18 }
  0x46   : > { %s5788_s19 = smul.u32 (!%p7083_p9), 3136, %s174_s18 }
  0x48   : > { %s6534_s4 = scalar_lea.vmem (!%p7083_p9), [#allocation3], %s5788_s19 }
  0x4c   : > { %6355 = dma.done.wait (%p7084_p13), %s175_s21, 50176  }
  0x4d   : > { %6357 = vsyncadd (%p7084_p13), %s175_s21, 4294917120  ;;  %p7085_p2 = scmp.eq.s32.totalorder %s6430_s16, 0 }
  0x4f   : > { %6359 = dma.done.wait (%p7085_p2), [#allocation7], 16   ;;  %p7086_p8 = pmov %p7085_p2 }
  0x50   : > { %s204_s23 = smul.u32 49, %s6430_s16  ;;  %p7087_p6 = scmp.ne.s32.totalorder %s6430_s16, 0 }
  0x51   : > { %6361 = vsyncadd (%p7086_p8), [#allocation7], 4294967280  ;;  %v6386_v0 = vmov (!%p7087_p6), 0.0  }
  0x52   : > { %p205_p3 = scmp.lt.s32.totalorder %s204_s23, 195  ;;  %214 = sbr.rel (%p7087_p6) target bundleno = 89 (0x59), region = 44  ;;  %215 = vst [vmem:[#allocation2] sm:$0x3] (!%p7087_p6), %v6386_v0 }
  0x54   : > { %s7093_s23 = smov (!%p205_p3, %s204_s23), 195 }
  0x55   : > { %s6548_s5 = scalar_lea.vmem %s7069_s0, %s7093_s23 }
  0x59 PF: > { %v5852_v1 = vld [vmem:[%s6534_s4 + $0x40] sm:$0xff]   ;;  %v5856_v5 = vld [vmem:[%s6534_s4 + $0x48] sm:$0xff]   ;;  %v5860_v9 = vld [vmem:[%s6534_s4 + $0x50] sm:$0xff]   ;;  %v1019_v30 = vlaneseq  ;;  %v6387_v36 = vmov 1966171168   ;;  %vm6389_vm0 = vmmov 0  }
  0x5a   : > { %v5853_v2 = vld [vmem:[%s6534_s4 + $0xc0] sm:$0xff]   ;;  %5230 = vmatprep.subr.bf16.mxu0 %v5852_v1  ;;  %v5857_v6 = vld [vmem:[%s6534_s4 + $0xc8] sm:$0xff]   ;;  %v5861_v10 = vld [vmem:[%s6534_s4 + $0xd0] sm:$0xff]   ;;  %v1017_v37 = vunpack.c.l.s4 %v6387_v36  ;;  %p5223_p4 = scmp.ne.s32.totalorder %s6430_s16, 3 }
  0x5b   : > { %v5854_v3 = vld [vmem:[%s6534_s4] sm:$0xff]   ;;  %5252 = vmatprep.subr.bf16.mxu1 %v5853_v2  ;;  %v5858_v7 = vld [vmem:[%s6534_s4 + $0x8] sm:$0xff]   ;;  %v5862_v11 = vld [vmem:[%s6534_s4 + $0x10] sm:$0xff]   ;;  %v1020_v34 = vshrl.u32 %v1019_v30, 7 }
  0x5c   : > { %v5855_v4 = vld [vmem:[%s6534_s4 + $0x80] sm:$0xff]   ;;  %5231 = vmatpush3.bf16.msra.mxu0 %v5854_v3  ;;  %v5859_v8 = vld [vmem:[%s6534_s4 + $0x88] sm:$0xff]   ;;  %v5863_v12 = vld [vmem:[%s6534_s4 + $0x90] sm:$0xff]   ;;  %v1018_v40 = vunpack.c.0.s8 %v1017_v37 }
  0x5d   : > { %5253 = vmatpush3.bf16.msra.mxu1 %v5855_v4  ;;  %5232 = vmatprep.subr.bf16.mxu0 %v5856_v5  ;;  %v5864_v13 = vld [vmem:[%s6534_s4 + $0x58] sm:$0xff]   ;;  %v5868_v17 = vld [vmem:[%s6534_s4 + $0x60] sm:$0xff]   ;;  %v5872_v21 = vld [vmem:[%s6534_s4 + $0x68] sm:$0xff]  }
  0x5e   : > { %5254 = vmatprep.subr.bf16.mxu1 %v5857_v6  ;;  %v5865_v14 = vld [vmem:[%s6534_s4 + $0xd8] sm:$0xff]   ;;  %v5869_v18 = vld [vmem:[%s6534_s4 + $0xe0] sm:$0xff]   ;;  %v5873_v22 = vld [vmem:[%s6534_s4 + $0xe8] sm:$0xff]   ;;  %v6587_v42 = vsub.s32 %v1018_v40, %v1020_v34 }
  0x5f   : > { %v5866_v15 = vld [vmem:[%s6534_s4 + $0x18] sm:$0xff]   ;;  %v5870_v19 = vld [vmem:[%s6534_s4 + $0x20] sm:$0xff]   ;;  %v5874_v23 = vld [vmem:[%s6534_s4 + $0x28] sm:$0xff]  }
  0x60   : > { %5233 = vmatpush3.bf16.msra.mxu0 %v5858_v7  ;;  %v5867_v16 = vld [vmem:[%s6534_s4 + $0x98] sm:$0xff]   ;;  %v5871_v20 = vld [vmem:[%s6534_s4 + $0xa0] sm:$0xff]   ;;  %v5875_v24 = vld [vmem:[%s6534_s4 + $0xa8] sm:$0xff]  }
  0x61   : > { %5255 = vmatpush3.bf16.msra.mxu1 %v5859_v8  ;;  %5234 = vmatprep.subr.bf16.mxu0 %v5860_v9  ;;  %v5876_v25 = vld [vmem:[%s6534_s4 + $0x70] sm:$0xff]   ;;  %v5880_v29 = vld [vmem:[%s6534_s4 + $0x78] sm:$0xff]   ;;  %v5885_v35 = vld [vmem:[%s6534_s4 + $0x140] sm:$0xff]  }
  0x62   : > { %5256 = vmatprep.subr.bf16.mxu1 %v5861_v10  ;;  %v5877_v26 = vld [vmem:[%s6534_s4 + $0xf0] sm:$0xff]   ;;  %v5881_v31 = vld [vmem:[%s6534_s4 + $0xf8] sm:$0xff]   ;;  %v5887_v41 = vld [vmem:[%s6534_s4 + $0x1c0] sm:$0xff]  }
  0x63   : > { %v5878_v27 = vld [vmem:[%s6534_s4 + $0x30] sm:$0xff]   ;;  %v5882_v32 = vld [vmem:[%s6534_s4 + $0x38] sm:$0xff]   ;;  %v5886_v48 = vld [vmem:[%s6534_s4 + $0x100] sm:$0xff]  }
  0x64   : > { %5235 = vmatpush3.bf16.msra.mxu0 %v5862_v11  ;;  %v5879_v28 = vld [vmem:[%s6534_s4 + $0xb0] sm:$0xff]   ;;  %v5883_v33 = vld [vmem:[%s6534_s4 + $0xb8] sm:$0xff]   ;;  %v5888_v50 = vld [vmem:[%s6534_s4 + $0x180] sm:$0xff]  }
  0x65   : > { %5257 = vmatpush3.bf16.msra.mxu1 %v5863_v12  ;;  %5236 = vmatprep.subr.bf16.mxu0 %v5864_v13  ;;  %v217_v38 = vld [vmem:[%s6548_s5] sm:$0xff]  ;;  %v5889_v53 = vld [vmem:[%s6534_s4 + $0x148] sm:$0xff]   ;;  %v5893_v59 = vld [vmem:[%s6534_s4 + $0x150] sm:$0xff]  }
  0x66   : > { %5258 = vmatprep.subr.bf16.mxu1 %v5865_v14  ;;  %v1015_v39 = vcombine.high %v217_v38, %v217_v38  ;;  %v1022_v43 = vrot.slane %v217_v38, %v6587_v42  ;;  %v5890_v55 = vld [vmem:[%s6534_s4 + $0x108] sm:$0xff]   ;;  %v5894_v60 = vld [vmem:[%s6534_s4 + $0x110] sm:$0xff]   ;;  %v5897_v63 = vld [vmem:[%s6534_s4 + $0x158] sm:$0xff]  }
  0x67   : > { %v5891_v56 = vld [vmem:[%s6534_s4 + $0x1c8] sm:$0xff]   ;;  %v5895_v61 = vld [vmem:[%s6534_s4 + $0x1d0] sm:$0xff]   ;;  %v5898_v0 = vld [vmem:[%s6534_s4 + $0x118] sm:$0xff]  }
  0x68   : > { %5237 = vmatpush3.bf16.msra.mxu0 %v5866_v15  ;;  %v6591_v44 = vrot.slane %v1015_v39, %v6587_v42  ;;  %v1030_v45 = vcombine.high %v1022_v43, %v1022_v43  ;;  %v1038_v46 = vrot.slane %v1022_v43, %v6587_v42  ;;  %v5892_v58 = vld [vmem:[%s6534_s4 + $0x188] sm:$0xff]   ;;  %v5896_v62 = vld [vmem:[%s6534_s4 + $0x190] sm:$0xff]   ;;  %v5899_v1 = vld [vmem:[%s6534_s4 + $0x1d8] sm:$0xff]  }
  0x69   : > { %5259 = vmatpush3.bf16.msra.mxu1 %v5867_v16  ;;  %5238 = vmatprep.subr.bf16.mxu0 %v5868_v17  ;;  %v5900_v2 = vld [vmem:[%s6534_s4 + $0x198] sm:$0xff]   ;;  %v5901_v3 = vld [vmem:[%s6534_s4 + $0x160] sm:$0xff]   ;;  %v5905_v7 = vld [vmem:[%s6534_s4 + $0x168] sm:$0xff]  }
  0x6a   : > { %5260 = vmatprep.subr.bf16.mxu1 %v5869_v18  ;;  %v1031_v47 = vcombine.high %v6591_v44, %v6591_v44  ;;  %v1052_v49 = vrot.slane %v1030_v45, %v6587_v42  ;;  %v1060_v52 = vcombine.high %v1038_v46, %v1038_v46  ;;  %v5902_v4 = vld [vmem:[%s6534_s4 + $0x120] sm:$0xff]   ;;  %v5906_v8 = vld [vmem:[%s6534_s4 + $0x128] sm:$0xff]   ;;  %v5909_v11 = vld [vmem:[%s6534_s4 + $0x170] sm:$0xff]  }
  0x6b   : > { %v5903_v5 = vld [vmem:[%s6534_s4 + $0x1e0] sm:$0xff]   ;;  %v5907_v9 = vld [vmem:[%s6534_s4 + $0x1e8] sm:$0xff]   ;;  %v5910_v12 = vld [vmem:[%s6534_s4 + $0x130] sm:$0xff]  }
  0x6c   : > { %5239 = vmatpush3.bf16.msra.mxu0 %v5870_v19  ;;  %v1059_v51 = vrot.slane %v1031_v47, %v6587_v42  ;;  %3756 = vmatprep.mubr.bf16.mxu0 %v1052_v49  ;;  %v1062_v54 = vcombine.high %v1052_v49, %v1052_v49  ;;  %v5904_v6 = vld [vmem:[%s6534_s4 + $0x1a0] sm:$0xff]   ;;  %v5908_v10 = vld [vmem:[%s6534_s4 + $0x1a8] sm:$0xff]   ;;  %v5911_v13 = vld [vmem:[%s6534_s4 + $0x1f0] sm:$0xff]   ;;  %v1045_v19 = vrot.slane %v6591_v44, %v6587_v42 }
  0x6d   : > { %5261 = vmatpush3.bf16.msra.mxu1 %v5871_v20  ;;  %5240 = vmatprep.subr.bf16.mxu0 %v5872_v21  ;;  %v5912_v14 = vld [vmem:[%s6534_s4 + $0x1b0] sm:$0xff]   ;;  %v5913_v15 = vld [vmem:[%s6534_s4 + $0x178] sm:$0xff]   ;;  %v5917_v20 = vld [vmem:[%s6534_s4 + $0x240] sm:$0xff]  }
  0x6e   : > { %5262 = vmatprep.subr.bf16.mxu1 %v5873_v22  ;;  %v1063_v57 = vcombine.high %v1059_v51, %v1059_v51  ;;  %3796 = vmatprep.mubr.bf16.mxu1 %v1062_v54  ;;  %v5914_v16 = vld [vmem:[%s6534_s4 + $0x138] sm:$0xff]   ;;  %v5918_v21 = vld [vmem:[%s6534_s4 + $0x200] sm:$0xff]   ;;  %v5926_v30 = vld [vmem:[%s6534_s4 + $0x210] sm:$0xff]  }
  0x6f   : > { %v5915_v17 = vld [vmem:[%s6534_s4 + $0x1f8] sm:$0xff]   ;;  %v5919_v22 = vld [vmem:[%s6534_s4 + $0x2c0] sm:$0xff]   ;;  %v5938_v43 = vld [vmem:[%s6534_s4 + $0x228] sm:$0xff]  }
  0x70   : > { %5241 = vmatpush3.bf16.msra.mxu0 %v5874_v23  ;;  %v5916_v18 = vld [vmem:[%s6534_s4 + $0x1b8] sm:$0xff]   ;;  %v5920_v23 = vld [vmem:[%s6534_s4 + $0x280] sm:$0xff]   ;;  %v5939_v44 = vld [vmem:[%s6534_s4 + $0x2e8] sm:$0xff]  }
  0x71   : > { %5263 = vmatpush3.bf16.msra.mxu1 %v5875_v24  ;;  %5242 = vmatprep.subr.bf16.mxu0 %v5876_v25  ;;  %v1061_v24 = vcombine.high %v1045_v19, %v1045_v19  ;;  %v5921_v25 = vld [vmem:[%s6534_s4 + $0x248] sm:$0xff]   ;;  %v5930_v34 = vld [vmem:[%s6534_s4 + $0x218] sm:$0xff]   ;;  %v5933_v37 = vld [vmem:[%s6534_s4 + $0x260] sm:$0xff]  }
  0x72   : > { %5264 = vmatprep.subr.bf16.mxu1 %v5877_v26  ;;  %v5922_v26 = vld [vmem:[%s6534_s4 + $0x208] sm:$0xff]   ;;  %v5932_v36 = vld [vmem:[%s6534_s4 + $0x298] sm:$0xff]   ;;  %v5934_v38 = vld [vmem:[%s6534_s4 + $0x220] sm:$0xff]  }
  0x73   : > { %v5935_v39 = vld [vmem:[%s6534_s4 + $0x2e0] sm:$0xff]   ;;  %v5940_v45 = vld [vmem:[%s6534_s4 + $0x2a8] sm:$0xff]   ;;  %v5941_v47 = vld [vmem:[%s6534_s4 + $0x270] sm:$0xff]  }
  0x74   : > { %5243 = vmatpush3.bf16.msra.mxu0 %v5878_v27  ;;  %v5923_v27 = vld [vmem:[%s6534_s4 + $0x2c8] sm:$0xff]   ;;  %v5936_v40 = vld [vmem:[%s6534_s4 + $0x2a0] sm:$0xff]   ;;  %v5944_v54 = vld [vmem:[%s6534_s4 + $0x2b0] sm:$0xff]  }
  0x75   : > { %5265 = vmatpush3.bf16.msra.mxu1 %v5879_v28  ;;  %5244 = vmatprep.subr.bf16.mxu0 %v5880_v29  ;;  %v5924_v28 = vld [vmem:[%s6534_s4 + $0x288] sm:$0xff]   ;;  %v5925_v29 = vld [vmem:[%s6534_s4 + $0x250] sm:$0xff]  }
  0x76   : > { %5266 = vmatprep.subr.bf16.mxu1 %v5881_v31  ;;  %v5927_v31 = vld [vmem:[%s6534_s4 + $0x2d0] sm:$0xff]  }
  0x78   : > { %5245 = vmatpush3.bf16.msra.mxu0 %v5882_v32  ;;  %v5928_v32 = vld [vmem:[%s6534_s4 + $0x290] sm:$0xff]  }
  0x79   : > { %5267 = vmatpush3.bf16.msra.mxu1 %v5883_v33  ;;  %5274 = vmatprep.subr.bf16.mxu0 %v5885_v35  ;;  %v5929_v33 = vld [vmem:[%s6534_s4 + $0x258] sm:$0xff]  }
  0x7a   : > { %5296 = vmatprep.subr.bf16.mxu1 %v5887_v41  ;;  %v5931_v35 = vld [vmem:[%s6534_s4 + $0x2d8] sm:$0xff]   ;;  %v5937_v41 = vld [vmem:[%s6534_s4 + $0x268] sm:$0xff]  }
  0x7b   : > { %3757 = vmatmul.mubr.bf16.vlgmr.msra.gmra.mrb[0].mxu0 %v1038_v46  ;;  %v218_v46 = vld [vmem:[%s6548_s5 + $0x8] sm:$0xff] }
  0x7c   : > { %5275 = vmatpush3.bf16.msra.mxu0 %v5886_v48  ;;  %3797 = vmatmul.mubr.bf16.vlgmr.msra.gmra.mrb[0].mxu1 %v1060_v52  ;;  %v1071_v48 = vrot.slane %v218_v46, %v6587_v42  ;;  %v1064_v49 = vcombine.high %v218_v46, %v218_v46  ;;  %v5991_v46 = vld [vmem:[%s6534_s4 + $0x410] sm:$0xff]  }
  0x7d   : > { %5276 = vmatprep.subr.bf16.mxu0 %v5889_v53  ;;  %5297 = vmatpush3.bf16.msra.mxu1 %v5888_v50  ;;  %v5942_v50 = vld [vmem:[%s6534_s4 + $0x230] sm:$0xff]  }
  0x7e   : > { %3836 = vmatprep.mubr.bf16.mxu0 %v1059_v51  ;;  %5298 = vmatprep.subr.bf16.mxu1 %v5891_v56  ;;  %v5943_v51 = vld [vmem:[%s6534_s4 + $0x2f0] sm:$0xff]   ;;  %v1079_v52 = vcombine.high %v1071_v48, %v1071_v48  ;;  %v6660_v53 = vrot.slane %v1064_v49, %v6587_v42  ;;  %v5994_v49 = vld [vmem:[%s6534_s4 + $0x458] sm:$0xff]  }
  0x7f   : > { %3876 = vmatprep.mubr.bf16.mxu1 %v1063_v57  ;;  %v5946_v57 = vld [vmem:[%s6534_s4 + $0x238] sm:$0xff]  }
  0x80   : > { %5277 = vmatpush3.bf16.msra.mxu0 %v5890_v55  ;;  %v5945_v55 = vld [vmem:[%s6534_s4 + $0x278] sm:$0xff]   ;;  %v1101_v56 = vrot.slane %v1079_v52, %v6587_v42 }
  0x81   : > { %5278 = vmatprep.subr.bf16.mxu0 %v5893_v59  ;;  %5299 = vmatpush3.bf16.msra.mxu1 %v5892_v58  ;;  %v1080_v58 = vcombine.high %v6660_v53, %v6660_v53  ;;  %v5947_v59 = vld [vmem:[%s6534_s4 + $0x2f8] sm:$0xff]  }
  0x82   : > { %5300 = vmatprep.subr.bf16.mxu1 %v5895_v61  ;;  %v5948_v61 = vld [vmem:[%s6534_s4 + $0x2b8] sm:$0xff]  }
  0x83   : > { %v5997_v52 = vld [vmem:[%s6534_s4 + $0x498] sm:$0xff]  }
  0x84   : > { %5279 = vmatpush3.bf16.msra.mxu0 %v5894_v60  ;;  %v1111_v60 = vcombine.high %v1101_v56, %v1101_v56 }
  0x85   : > { %5280 = vmatprep.subr.bf16.mxu0 %v5897_v63  ;;  %5301 = vmatpush3.bf16.msra.mxu1 %v5896_v62  ;;  %v1087_v62 = vrot.slane %v1071_v48, %v6587_v42  ;;  %v5949_v63 = vld [vmem:[%s6534_s4 + $0x340] sm:$0xff]   ;;  %v5993_v48 = vld [vmem:[%s6534_s4 + $0x490] sm:$0xff]  }
  0x86   : > { %5302 = vmatprep.subr.bf16.mxu1 %v5899_v1  ;;  %v1108_v1 = vrot.slane %v1080_v58, %v6587_v42  ;;  %v6003_v58 = vld [vmem:[%s6534_s4 + $0x428] sm:$0xff]  }
  0x88   : > { %5281 = vmatpush3.bf16.msra.mxu0 %v5898_v0  ;;  %v5950_v0 = vld [vmem:[%s6534_s4 + $0x300] sm:$0xff]  }
  0x89   : > { %5282 = vmatprep.subr.bf16.mxu0 %v5901_v3  ;;  %5303 = vmatpush3.bf16.msra.mxu1 %v5900_v2  ;;  %v5951_v2 = vld [vmem:[%s6534_s4 + $0x3c0] sm:$0xff]  }
  0x8a   : > { %5304 = vmatprep.subr.bf16.mxu1 %v5903_v5  ;;  %v5952_v3 = vld [vmem:[%s6534_s4 + $0x380] sm:$0xff]   ;;  %v5953_v5 = vld [vmem:[%s6534_s4 + $0x348] sm:$0xff]  }
  0x8c   : > { %5283 = vmatpush3.bf16.msra.mxu0 %v5902_v4  ;;  %v1109_v4 = vcombine.high %v1087_v62, %v1087_v62 }
  0x8d   : > { %5284 = vmatprep.subr.bf16.mxu0 %v5905_v7  ;;  %5305 = vmatpush3.bf16.msra.mxu1 %v5904_v6  ;;  %v5954_v6 = vld [vmem:[%s6534_s4 + $0x308] sm:$0xff]   ;;  %v1112_v7 = vcombine.high %v1108_v1, %v1108_v1 }
  0x8e   : > { %5306 = vmatprep.subr.bf16.mxu1 %v5907_v9  ;;  %v5956_v9 = vld [vmem:[%s6534_s4 + $0x388] sm:$0xff]  }
  0x90   : > { %5285 = vmatpush3.bf16.msra.mxu0 %v5906_v8  ;;  %v5955_v8 = vld [vmem:[%s6534_s4 + $0x3c8] sm:$0xff]  }
  0x91   : > { %5286 = vmatprep.subr.bf16.mxu0 %v5909_v11  ;;  %5307 = vmatpush3.bf16.msra.mxu1 %v5908_v10  ;;  %v5957_v10 = vld [vmem:[%s6534_s4 + $0x350] sm:$0xff]  }
  0x92   : > { %5308 = vmatprep.subr.bf16.mxu1 %v5911_v13  ;;  %v5958_v11 = vld [vmem:[%s6534_s4 + $0x310] sm:$0xff]  }
  0x93   : > { %v5960_v13 = vld [vmem:[%s6534_s4 + $0x390] sm:$0xff]  }
  0x94   : > { %5287 = vmatpush3.bf16.msra.mxu0 %v5910_v12  ;;  %v5959_v12 = vld [vmem:[%s6534_s4 + $0x3d0] sm:$0xff]  }
  0x95   : > { %5288 = vmatprep.subr.bf16.mxu0 %v5913_v15  ;;  %5309 = vmatpush3.bf16.msra.mxu1 %v5912_v14  ;;  %v5961_v14 = vld [vmem:[%s6534_s4 + $0x358] sm:$0xff]  }
  0x96   : > { %5310 = vmatprep.subr.bf16.mxu1 %v5915_v17  ;;  %v5962_v15 = vld [vmem:[%s6534_s4 + $0x318] sm:$0xff]  }
  0x97   : > { %v5964_v17 = vld [vmem:[%s6534_s4 + $0x398] sm:$0xff]  }
  0x98   : > { %5289 = vmatpush3.bf16.msra.mxu0 %v5914_v16  ;;  %v5963_v16 = vld [vmem:[%s6534_s4 + $0x3d8] sm:$0xff]  }
  0x99   : > { %5318 = vmatprep.subr.bf16.mxu0 %v5917_v20  ;;  %5311 = vmatpush3.bf16.msra.mxu1 %v5916_v18  ;;  %v5965_v18 = vld [vmem:[%s6534_s4 + $0x360] sm:$0xff]  }
  0x9a   : > { %5340 = vmatprep.subr.bf16.mxu1 %v5919_v22  ;;  %v5967_v20 = vld [vmem:[%s6534_s4 + $0x3e0] sm:$0xff]   ;;  %v5969_v22 = vld [vmem:[%s6534_s4 + $0x368] sm:$0xff]  }
  0x9b   : > { %3837 = vmatmul.mubr.bf16.vlgmr.msra.gmra.mrb[4].mxu0 %v1045_v19  ;;  %v5966_v19 = vld [vmem:[%s6534_s4 + $0x320] sm:$0xff]  }
  0x9c   : > { %5319 = vmatpush3.bf16.msra.mxu0 %v5918_v21  ;;  %3877 = vmatmul.mubr.bf16.vlgmr.msra.gmra.mrb[4].mxu1 %v1061_v24  ;;  %v5968_v21 = vld [vmem:[%s6534_s4 + $0x3a0] sm:$0xff]   ;;  %v5971_v24 = vld [vmem:[%s6534_s4 + $0x3e8] sm:$0xff]  }
  0x9d   : > { %5320 = vmatprep.subr.bf16.mxu0 %v5921_v25  ;;  %5341 = vmatpush3.bf16.msra.mxu1 %v5920_v23  ;;  %v5970_v23 = vld [vmem:[%s6534_s4 + $0x328] sm:$0xff]  }
  0x9e   : > { %5342 = vmatprep.subr.bf16.mxu1 %v5923_v27  ;;  %3916 = vmatprep.mubr.bf16.mxu0 %v1101_v56  ;;  %v5972_v25 = vld [vmem:[%s6534_s4 + $0x3a8] sm:$0xff]   ;;  %v5974_v27 = vld [vmem:[%s6534_s4 + $0x330] sm:$0xff]   ;;  %v6001_v56 = vld [vmem:[%s6534_s4 + $0x4a0] sm:$0xff]  }
  0x9f   : > { %3956 = vmatprep.mubr.bf16.mxu1 %v1111_v60  ;;  %v6005_v60 = vld [vmem:[%s6534_s4 + $0x4a8] sm:$0xff]  }
  0xa0   : > { %5321 = vmatpush3.bf16.msra.mxu0 %v5922_v26  ;;  %v5973_v26 = vld [vmem:[%s6534_s4 + $0x370] sm:$0xff]  }
  0xa1   : > { %5322 = vmatprep.subr.bf16.mxu0 %v5925_v29  ;;  %5343 = vmatpush3.bf16.msra.mxu1 %v5924_v28  ;;  %v5975_v28 = vld [vmem:[%s6534_s4 + $0x3f0] sm:$0xff]  }
  0xa2   : > { %5344 = vmatprep.subr.bf16.mxu1 %v5927_v31  ;;  %v5976_v29 = vld [vmem:[%s6534_s4 + $0x3b0] sm:$0xff]   ;;  %v5978_v31 = vld [vmem:[%s6534_s4 + $0x338] sm:$0xff]  }
  0xa4   : > { %5323 = vmatpush3.bf16.msra.mxu0 %v5926_v30  ;;  %v5977_v30 = vld [vmem:[%s6534_s4 + $0x378] sm:$0xff]  }
  0xa5   : > { %5324 = vmatprep.subr.bf16.mxu0 %v5929_v33  ;;  %5345 = vmatpush3.bf16.msra.mxu1 %v5928_v32  ;;  %v5979_v32 = vld [vmem:[%s6534_s4 + $0x3f8] sm:$0xff]  }
  0xa6   : > { %5346 = vmatprep.subr.bf16.mxu1 %v5931_v35  ;;  %v5981_v33 = vld [vmem:[%s6534_s4 + $0x3b8] sm:$0xff]   ;;  %v5982_v35 = vld [vmem:[%s6534_s4 + $0x440] sm:$0xff]  }
  0xa8   : > { %5325 = vmatpush3.bf16.msra.mxu0 %v5930_v34  ;;  %v1094_v34 = vrot.slane %v6660_v53, %v6587_v42  ;;  %v5998_v53 = vld [vmem:[%s6534_s4 + $0x460] sm:$0xff]  }
  0xa9   : > { %5326 = vmatprep.subr.bf16.mxu0 %v5933_v37  ;;  %5347 = vmatpush3.bf16.msra.mxu1 %v5932_v36  ;;  %v5983_v36 = vld [vmem:[%s6534_s4 + $0x400] sm:$0xff]  }
  0xaa   : > { %5348 = vmatprep.subr.bf16.mxu1 %v5935_v39  ;;  %v5984_v37 = vld [vmem:[%s6534_s4 + $0x4c0] sm:$0xff]   ;;  %v1110_v39 = vcombine.high %v1094_v34, %v1094_v34 }
  0xac   : > { %5327 = vmatpush3.bf16.msra.mxu0 %v5934_v38  ;;  %v5985_v38 = vld [vmem:[%s6534_s4 + $0x480] sm:$0xff]  }
  0xad   : > { %5328 = vmatprep.subr.bf16.mxu0 %v5937_v41  ;;  %5349 = vmatpush3.bf16.msra.mxu1 %v5936_v40  ;;  %v5986_v40 = vld [vmem:[%s6534_s4 + $0x448] sm:$0xff]  }
  0xae   : > { %5350 = vmatprep.subr.bf16.mxu1 %v5939_v44  ;;  %v5987_v41 = vld [vmem:[%s6534_s4 + $0x408] sm:$0xff]  }
  0xaf   : > { %v5989_v44 = vld [vmem:[%s6534_s4 + $0x488] sm:$0xff]  }
  0xb0   : > { %5329 = vmatpush3.bf16.msra.mxu0 %v5938_v43  ;;  %v5988_v43 = vld [vmem:[%s6534_s4 + $0x4c8] sm:$0xff]  }
  0xb1   : > { %5330 = vmatprep.subr.bf16.mxu0 %v5941_v47  ;;  %5351 = vmatpush3.bf16.msra.mxu1 %v5940_v45  ;;  %v5990_v45 = vld [vmem:[%s6534_s4 + $0x450] sm:$0xff]  }
  0xb2   : > { %5352 = vmatprep.subr.bf16.mxu1 %v5943_v51  ;;  %v5992_v47 = vld [vmem:[%s6534_s4 + $0x4d0] sm:$0xff]   ;;  %v5996_v51 = vld [vmem:[%s6534_s4 + $0x4d8] sm:$0xff]  }
  0xb4   : > { %5331 = vmatpush3.bf16.msra.mxu0 %v5942_v50  ;;  %v5995_v50 = vld [vmem:[%s6534_s4 + $0x418] sm:$0xff]  }
  0xb5   : > { %5332 = vmatprep.subr.bf16.mxu0 %v5945_v55  ;;  %5353 = vmatpush3.bf16.msra.mxu1 %v5944_v54  ;;  %v5999_v54 = vld [vmem:[%s6534_s4 + $0x420] sm:$0xff]  }
  0xb6   : > { %5354 = vmatprep.subr.bf16.mxu1 %v5947_v59  ;;  %v6000_v55 = vld [vmem:[%s6534_s4 + $0x4e0] sm:$0xff]   ;;  %v6004_v59 = vld [vmem:[%s6534_s4 + $0x4e8] sm:$0xff]  }
  0xb8   : > { %5333 = vmatpush3.bf16.msra.mxu0 %v5946_v57  ;;  %v6002_v57 = vld [vmem:[%s6534_s4 + $0x468] sm:$0xff]  }
  0xb9   : > { %5362 = vmatprep.subr.bf16.mxu0 %v5949_v63  ;;  %5355 = vmatpush3.bf16.msra.mxu1 %v5948_v61  ;;  %v219_v61 = vld [vmem:[%s6548_s5 + $0x10] sm:$0xff] }
  0xba   : > { %5384 = vmatprep.subr.bf16.mxu1 %v5951_v2  ;;  %v1120_v63 = vrot.slane %v219_v61, %v6587_v42  ;;  %v6008_v2 = vld [vmem:[%s6534_s4 + $0x4f0] sm:$0xff]  }
  0xbb   : > { %3917 = vmatmul.mubr.bf16.vlgmr.msra.gmra.mrb[8].mxu0 %v1087_v62  ;;  %v6006_v62 = vld [vmem:[%s6534_s4 + $0x470] sm:$0xff]  }
  0xbc   : > { %5363 = vmatpush3.bf16.msra.mxu0 %v5950_v0  ;;  %3996 = vmatprep.mubr.bf16.mxu0 %v1108_v1  ;;  %v1113_v0 = vcombine.high %v219_v61, %v219_v61  ;;  %v6007_v1 = vld [vmem:[%s6534_s4 + $0x430] sm:$0xff]  }
  0xbd   : > { %3957 = vmatmul.mubr.bf16.vlgmr.msra.gmra.mrb[8].mxu1 %v1109_v4  ;;  %5364 = vmatprep.subr.bf16.mxu0 %v5953_v5  ;;  %v6009_v5 = vld [vmem:[%s6534_s4 + $0x4b0] sm:$0xff]  }
  0xbe   : > { %5385 = vmatpush3.bf16.msra.mxu1 %v5952_v3  ;;  %4036 = vmatprep.mubr.bf16.mxu1 %v1112_v7  ;;  %v1128_v3 = vcombine.high %v1120_v63, %v1120_v63  ;;  %v6736_v4 = vrot.slane %v1113_v0, %v6587_v42  ;;  %v6056_v61 = vld [vmem:[%s6534_s4 + $0x610] sm:$0xff]   ;;  %v6059_v0 = vld [vmem:[%s6534_s4 + $0x658] sm:$0xff]  }
  0xbf   : > { %5386 = vmatprep.subr.bf16.mxu1 %v5955_v8  ;;  %v6011_v8 = vld [vmem:[%s6534_s4 + $0x438] sm:$0xff]  }
  0xc0   : > { %5365 = vmatpush3.bf16.msra.mxu0 %v5954_v6  ;;  %v6010_v6 = vld [vmem:[%s6534_s4 + $0x478] sm:$0xff]   ;;  %v1150_v7 = vrot.slane %v1128_v3, %v6587_v42 }
  0xc1   : > { %5366 = vmatprep.subr.bf16.mxu0 %v5957_v10  ;;  %v6012_v10 = vld [vmem:[%s6534_s4 + $0x4f8] sm:$0xff]  }
  0xc2   : > { %5387 = vmatpush3.bf16.msra.mxu1 %v5956_v9  ;;  %v1129_v9 = vcombine.high %v6736_v4, %v6736_v4  ;;  %v6062_v3 = vld [vmem:[%s6534_s4 + $0x698] sm:$0xff]  }
  0xc3   : > { %5388 = vmatprep.subr.bf16.mxu1 %v5959_v12  ;;  %v6013_v12 = vld [vmem:[%s6534_s4 + $0x4b8] sm:$0xff]  }
  0xc4   : > { %5367 = vmatpush3.bf16.msra.mxu0 %v5958_v11  ;;  %v1160_v11 = vcombine.high %v1150_v7, %v1150_v7 }
  0xc5   : > { %5368 = vmatprep.subr.bf16.mxu0 %v5961_v14  ;;  %v6014_v14 = vld [vmem:[%s6534_s4 + $0x540] sm:$0xff]  }
  0xc6   : > { %5389 = vmatpush3.bf16.msra.mxu1 %v5960_v13  ;;  %v1136_v13 = vrot.slane %v1120_v63, %v6587_v42  ;;  %v6058_v63 = vld [vmem:[%s6534_s4 + $0x690] sm:$0xff]  }
  0xc7   : > { %5390 = vmatprep.subr.bf16.mxu1 %v5963_v16  ;;  %v1157_v16 = vrot.slane %v1129_v9, %v6587_v42  ;;  %v6068_v9 = vld [vmem:[%s6534_s4 + $0x628] sm:$0xff]  }
  0xc8   : > { %5369 = vmatpush3.bf16.msra.mxu0 %v5962_v15  ;;  %v6015_v15 = vld [vmem:[%s6534_s4 + $0x500] sm:$0xff]  }
  0xc9   : > { %5370 = vmatprep.subr.bf16.mxu0 %v5965_v18  ;;  %v6017_v18 = vld [vmem:[%s6534_s4 + $0x580] sm:$0xff]  }
  0xca   : > { %5391 = vmatpush3.bf16.msra.mxu1 %v5964_v17  ;;  %v6016_v17 = vld [vmem:[%s6534_s4 + $0x5c0] sm:$0xff]  }
  0xcb   : > { %5392 = vmatprep.subr.bf16.mxu1 %v5967_v20  ;;  %v6018_v20 = vld [vmem:[%s6534_s4 + $0x548] sm:$0xff]  }
  0xcc   : > { %5371 = vmatpush3.bf16.msra.mxu0 %v5966_v19  ;;  %v1158_v19 = vcombine.high %v1136_v13, %v1136_v13 }
  0xcd   : > { %5372 = vmatprep.subr.bf16.mxu0 %v5969_v22  ;;  %v1161_v22 = vcombine.high %v1157_v16, %v1157_v16 }
  0xce   : > { %5393 = vmatpush3.bf16.msra.mxu1 %v5968_v21  ;;  %v6019_v21 = vld [vmem:[%s6534_s4 + $0x508] sm:$0xff]  }
  0xcf   : > { %5394 = vmatprep.subr.bf16.mxu1 %v5971_v24  ;;  %v6021_v24 = vld [vmem:[%s6534_s4 + $0x588] sm:$0xff]  }
  0xd0   : > { %5373 = vmatpush3.bf16.msra.mxu0 %v5970_v23  ;;  %v6020_v23 = vld [vmem:[%s6534_s4 + $0x5c8] sm:$0xff]  }
  0xd1   : > { %5374 = vmatprep.subr.bf16.mxu0 %v5973_v26  ;;  %v6023_v26 = vld [vmem:[%s6534_s4 + $0x510] sm:$0xff]  }
  0xd2   : > { %5395 = vmatpush3.bf16.msra.mxu1 %v5972_v25  ;;  %v6022_v25 = vld [vmem:[%s6534_s4 + $0x550] sm:$0xff]  }
  0xd3   : > { %5396 = vmatprep.subr.bf16.mxu1 %v5975_v28  ;;  %v6025_v28 = vld [vmem:[%s6534_s4 + $0x590] sm:$0xff]  }
  0xd4   : > { %5375 = vmatpush3.bf16.msra.mxu0 %v5974_v27  ;;  %v6024_v27 = vld [vmem:[%s6534_s4 + $0x5d0] sm:$0xff]  }
  0xd5   : > { %5376 = vmatprep.subr.bf16.mxu0 %v5977_v30  ;;  %v6027_v30 = vld [vmem:[%s6534_s4 + $0x518] sm:$0xff]  }
  0xd6   : > { %5397 = vmatpush3.bf16.msra.mxu1 %v5976_v29  ;;  %v6026_v29 = vld [vmem:[%s6534_s4 + $0x558] sm:$0xff]  }
  0xd7   : > { %5398 = vmatprep.subr.bf16.mxu1 %v5979_v32  ;;  %v6029_v32 = vld [vmem:[%s6534_s4 + $0x598] sm:$0xff]  }
  0xd8   : > { %5377 = vmatpush3.bf16.msra.mxu0 %v5978_v31  ;;  %v6028_v31 = vld [vmem:[%s6534_s4 + $0x5d8] sm:$0xff]  }
  0xd9   : > { %5406 = vmatprep.subr.bf16.mxu0 %v5982_v35  ;;  %v6032_v35 = vld [vmem:[%s6534_s4 + $0x5e0] sm:$0xff]  }
  0xda   : > { %5399 = vmatpush3.bf16.msra.mxu1 %v5981_v33  ;;  %v6030_v33 = vld [vmem:[%s6534_s4 + $0x560] sm:$0xff]  }
  0xdb   : > { %3997 = vmatmul.mubr.bf16.vlgmr.msra.gmra.mrb[12].mxu0 %v1094_v34  ;;  %5428 = vmatprep.subr.bf16.mxu1 %v5984_v37  ;;  %v6031_v34 = vld [vmem:[%s6534_s4 + $0x520] sm:$0xff]   ;;  %v6034_v37 = vld [vmem:[%s6534_s4 + $0x568] sm:$0xff]  }
  0xdc   : > { %5407 = vmatpush3.bf16.msra.mxu0 %v5983_v36  ;;  %4076 = vmatprep.mubr.bf16.mxu0 %v1150_v7  ;;  %v6033_v36 = vld [vmem:[%s6534_s4 + $0x5a0] sm:$0xff]  }
  0xdd   : > { %4037 = vmatmul.mubr.bf16.vlgmr.msra.gmra.mrb[12].mxu1 %v1110_v39  ;;  %5408 = vmatprep.subr.bf16.mxu0 %v5986_v40  ;;  %v6036_v39 = vld [vmem:[%s6534_s4 + $0x5e8] sm:$0xff]   ;;  %v6066_v7 = vld [vmem:[%s6534_s4 + $0x6a0] sm:$0xff]  }
  0xde   : > { %5429 = vmatpush3.bf16.msra.mxu1 %v5985_v38  ;;  %4116 = vmatprep.mubr.bf16.mxu1 %v1160_v11  ;;  %v6035_v38 = vld [vmem:[%s6534_s4 + $0x528] sm:$0xff]  }
  0xdf   : > { %5430 = vmatprep.subr.bf16.mxu1 %v5988_v43  ;;  %v6037_v40 = vld [vmem:[%s6534_s4 + $0x5a8] sm:$0xff]   ;;  %v6039_v43 = vld [vmem:[%s6534_s4 + $0x530] sm:$0xff]  }
  0xe0   : > { %5409 = vmatpush3.bf16.msra.mxu0 %v5987_v41  ;;  %v6038_v41 = vld [vmem:[%s6534_s4 + $0x570] sm:$0xff]   ;;  %v6070_v11 = vld [vmem:[%s6534_s4 + $0x6a8] sm:$0xff]  }
  0xe1   : > { %5410 = vmatprep.subr.bf16.mxu0 %v5990_v45  ;;  %v6041_v45 = vld [vmem:[%s6534_s4 + $0x5b0] sm:$0xff]  }
  0xe2   : > { %5431 = vmatpush3.bf16.msra.mxu1 %v5989_v44  ;;  %v6040_v44 = vld [vmem:[%s6534_s4 + $0x5f0] sm:$0xff]  }
  0xe3   : > { %5432 = vmatprep.subr.bf16.mxu1 %v5992_v47  ;;  %v6043_v47 = vld [vmem:[%s6534_s4 + $0x538] sm:$0xff]  }
  0xe4   : > { %5411 = vmatpush3.bf16.msra.mxu0 %v5991_v46  ;;  %v6042_v46 = vld [vmem:[%s6534_s4 + $0x578] sm:$0xff]  }
  0xe5   : > { %5412 = vmatprep.subr.bf16.mxu0 %v5994_v49  ;;  %v6046_v49 = vld [vmem:[%s6534_s4 + $0x5b8] sm:$0xff]  }
  0xe6   : > { %5433 = vmatpush3.bf16.msra.mxu1 %v5993_v48  ;;  %v6044_v48 = vld [vmem:[%s6534_s4 + $0x5f8] sm:$0xff]  }
  0xe7   : > { %5434 = vmatprep.subr.bf16.mxu1 %v5996_v51  ;;  %v6047_v51 = vld [vmem:[%s6534_s4 + $0x640] sm:$0xff]  }
  0xe8   : > { %5413 = vmatpush3.bf16.msra.mxu0 %v5995_v50  ;;  %v1143_v50 = vrot.slane %v6736_v4, %v6587_v42  ;;  %v6063_v4 = vld [vmem:[%s6534_s4 + $0x660] sm:$0xff]  }
  0xe9   : > { %5414 = vmatprep.subr.bf16.mxu0 %v5998_v53  ;;  %v6049_v53 = vld [vmem:[%s6534_s4 + $0x6c0] sm:$0xff]  }
  0xea   : > { %5435 = vmatpush3.bf16.msra.mxu1 %v5997_v52  ;;  %v6048_v52 = vld [vmem:[%s6534_s4 + $0x600] sm:$0xff]  }
  0xeb   : > { %5436 = vmatprep.subr.bf16.mxu1 %v6000_v55  ;;  %v1159_v55 = vcombine.high %v1143_v50, %v1143_v50 }
  0xec   : > { %5415 = vmatpush3.bf16.msra.mxu0 %v5999_v54  ;;  %v6050_v54 = vld [vmem:[%s6534_s4 + $0x680] sm:$0xff]  }
  0xed   : > { %5416 = vmatprep.subr.bf16.mxu0 %v6002_v57  ;;  %v6052_v57 = vld [vmem:[%s6534_s4 + $0x608] sm:$0xff]  }
  0xee   : > { %5437 = vmatpush3.bf16.msra.mxu1 %v6001_v56  ;;  %v6051_v56 = vld [vmem:[%s6534_s4 + $0x648] sm:$0xff]  }
  0xef   : > { %5438 = vmatprep.subr.bf16.mxu1 %v6004_v59  ;;  %v6054_v59 = vld [vmem:[%s6534_s4 + $0x688] sm:$0xff]  }
  0xf0   : > { %5417 = vmatpush3.bf16.msra.mxu0 %v6003_v58  ;;  %v6053_v58 = vld [vmem:[%s6534_s4 + $0x6c8] sm:$0xff]  }
  0xf1   : > { %5418 = vmatprep.subr.bf16.mxu0 %v6006_v62  ;;  %v6057_v62 = vld [vmem:[%s6534_s4 + $0x6d0] sm:$0xff]  }
  0xf2   : > { %5439 = vmatpush3.bf16.msra.mxu1 %v6005_v60  ;;  %v6055_v60 = vld [vmem:[%s6534_s4 + $0x650] sm:$0xff]  }
  0xf3   : > { %5440 = vmatprep.subr.bf16.mxu1 %v6008_v2  ;;  %v6061_v2 = vld [vmem:[%s6534_s4 + $0x6d8] sm:$0xff]  }
  0xf4   : > { %5419 = vmatpush3.bf16.msra.mxu0 %v6007_v1  ;;  %v6060_v1 = vld [vmem:[%s6534_s4 + $0x618] sm:$0xff]  }
  0xf5   : > { %5420 = vmatprep.subr.bf16.mxu0 %v6010_v6  ;;  %v6065_v6 = vld [vmem:[%s6534_s4 + $0x6e0] sm:$0xff]  }
  0xf6   : > { %5441 = vmatpush3.bf16.msra.mxu1 %v6009_v5  ;;  %v6064_v5 = vld [vmem:[%s6534_s4 + $0x620] sm:$0xff]  }
  0xf7   : > { %5442 = vmatprep.subr.bf16.mxu1 %v6012_v10  ;;  %v6069_v10 = vld [vmem:[%s6534_s4 + $0x6e8] sm:$0xff]  }
  0xf8   : > { %5421 = vmatpush3.bf16.msra.mxu0 %v6011_v8  ;;  %v6067_v8 = vld [vmem:[%s6534_s4 + $0x668] sm:$0xff]  }
  0xf9   : > { %5450 = vmatprep.subr.bf16.mxu0 %v6014_v14  ;;  %v6072_v14 = vld [vmem:[%s6534_s4 + $0x630] sm:$0xff]  }
  0xfa   : > { %5443 = vmatpush3.bf16.msra.mxu1 %v6013_v12  ;;  %v6071_v12 = vld [vmem:[%s6534_s4 + $0x670] sm:$0xff]  }
  0xfb   : > { %4077 = vmatmul.mubr.bf16.vlgmr.msra.gmra.mrb[16].mxu0 %v1136_v13  ;;  %5472 = vmatprep.subr.bf16.mxu1 %v6016_v17  ;;  %v220_v13 = vld [vmem:[%s6548_s5 + $0x18] sm:$0xff] }
  0xfc   : > { %5451 = vmatpush3.bf16.msra.mxu0 %v6015_v15  ;;  %4156 = vmatprep.mubr.bf16.mxu0 %v1157_v16  ;;  %v1169_v15 = vrot.slane %v220_v13, %v6587_v42  ;;  %v1162_v16 = vcombine.high %v220_v13, %v220_v13  ;;  %v6073_v17 = vld [vmem:[%s6534_s4 + $0x6f0] sm:$0xff]   ;;  %v6112_v13 = vld [vmem:[%s6534_s4 + $0x840] sm:$0xff]  }
  0xfd   : > { %4117 = vmatmul.mubr.bf16.vlgmr.msra.gmra.mrb[16].mxu1 %v1158_v19  ;;  %5452 = vmatprep.subr.bf16.mxu0 %v6018_v20 }
  0xfe   : > { %5473 = vmatpush3.bf16.msra.mxu1 %v6017_v18  ;;  %4196 = vmatprep.mubr.bf16.mxu1 %v1161_v22  ;;  %v6074_v18 = vld [vmem:[%s6534_s4 + $0x6b0] sm:$0xff]   ;;  %v1177_v19 = vcombine.high %v1169_v15, %v1169_v15  ;;  %v6813_v20 = vrot.slane %v1162_v16, %v6587_v42  ;;  %v6076_v22 = vld [vmem:[%s6534_s4 + $0x638] sm:$0xff]   ;;  %v6115_v16 = vld [vmem:[%s6534_s4 + $0x880] sm:$0xff]  }
  0xff   : > { %5474 = vmatprep.subr.bf16.mxu1 %v6020_v23 }
 0x100   : > { %5453 = vmatpush3.bf16.msra.mxu0 %v6019_v21  ;;  %v6075_v21 = vld [vmem:[%s6534_s4 + $0x678] sm:$0xff]   ;;  %v1199_v23 = vrot.slane %v1177_v19, %v6587_v42  ;;  %v6117_v19 = vld [vmem:[%s6534_s4 + $0x808] sm:$0xff]  }
 0x101   : > { %5454 = vmatprep.subr.bf16.mxu0 %v6022_v25  ;;  %v6077_v25 = vld [vmem:[%s6534_s4 + $0x6f8] sm:$0xff]  }
 0x102   : > { %5475 = vmatpush3.bf16.msra.mxu1 %v6021_v24  ;;  %v1178_v24 = vcombine.high %v6813_v20, %v6813_v20 }
 0x103   : > { %5476 = vmatprep.subr.bf16.mxu1 %v6024_v27  ;;  %v1209_v27 = vcombine.high %v1199_v23, %v1199_v23 }
 0x104   : > { %5455 = vmatpush3.bf16.msra.mxu0 %v6023_v26  ;;  %v6078_v26 = vld [vmem:[%s6534_s4 + $0x6b8] sm:$0xff]  }
 0x105   : > { %5456 = vmatprep.subr.bf16.mxu0 %v6026_v29  ;;  %v6079_v29 = vld [vmem:[%s6534_s4 + $0x740] sm:$0xff]  }
 0x106   : > { %5477 = vmatpush3.bf16.msra.mxu1 %v6025_v28  ;;  %v1185_v28 = vrot.slane %v1169_v15, %v6587_v42  ;;  %v6114_v15 = vld [vmem:[%s6534_s4 + $0x8c0] sm:$0xff]  }
 0x107   : > { %5478 = vmatprep.subr.bf16.mxu1 %v6028_v31  ;;  %v1206_v31 = vrot.slane %v1178_v24, %v6587_v42  ;;  %v6122_v24 = vld [vmem:[%s6534_s4 + $0x8d0] sm:$0xff]  }
 0x108   : > { %5457 = vmatpush3.bf16.msra.mxu0 %v6027_v30  ;;  %v6080_v30 = vld [vmem:[%s6534_s4 + $0x700] sm:$0xff]  }
 0x109   : > { %5458 = vmatprep.subr.bf16.mxu0 %v6030_v33  ;;  %v6082_v33 = vld [vmem:[%s6534_s4 + $0x780] sm:$0xff]  }
 0x10a   : > { %5479 = vmatpush3.bf16.msra.mxu1 %v6029_v32  ;;  %v6081_v32 = vld [vmem:[%s6534_s4 + $0x7c0] sm:$0xff]  }
 0x10b   : > { %5480 = vmatprep.subr.bf16.mxu1 %v6032_v35  ;;  %v6083_v35 = vld [vmem:[%s6534_s4 + $0x748] sm:$0xff]  }
 0x10c   : > { %5459 = vmatpush3.bf16.msra.mxu0 %v6031_v34  ;;  %v1207_v34 = vcombine.high %v1185_v28, %v1185_v28 }
 0x10d   : > { %5460 = vmatprep.subr.bf16.mxu0 %v6034_v37  ;;  %v1210_v37 = vcombine.high %v1206_v31, %v1206_v31 }
 0x10e   : > { %5481 = vmatpush3.bf16.msra.mxu1 %v6033_v36  ;;  %v6084_v36 = vld [vmem:[%s6534_s4 + $0x708] sm:$0xff]  }
 0x10f   : > { %5482 = vmatprep.subr.bf16.mxu1 %v6036_v39  ;;  %v6086_v39 = vld [vmem:[%s6534_s4 + $0x788] sm:$0xff]  }
 0x110   : > { %5461 = vmatpush3.bf16.msra.mxu0 %v6035_v38  ;;  %v6085_v38 = vld [vmem:[%s6534_s4 + $0x7c8] sm:$0xff]  }
 0x111   : > { %5462 = vmatprep.subr.bf16.mxu0 %v6038_v41  ;;  %v6088_v41 = vld [vmem:[%s6534_s4 + $0x710] sm:$0xff]  }
 0x112   : > { %5483 = vmatpush3.bf16.msra.mxu1 %v6037_v40  ;;  %v6087_v40 = vld [vmem:[%s6534_s4 + $0x750] sm:$0xff]  }
 0x113   : > { %5484 = vmatprep.subr.bf16.mxu1 %v6040_v44  ;;  %v6090_v44 = vld [vmem:[%s6534_s4 + $0x790] sm:$0xff]  }
 0x114   : > { %5463 = vmatpush3.bf16.msra.mxu0 %v6039_v43  ;;  %v6089_v43 = vld [vmem:[%s6534_s4 + $0x7d0] sm:$0xff]  }
 0x115   : > { %5464 = vmatprep.subr.bf16.mxu0 %v6042_v46  ;;  %v6092_v46 = vld [vmem:[%s6534_s4 + $0x718] sm:$0xff]  }
 0x116   : > { %5485 = vmatpush3.bf16.msra.mxu1 %v6041_v45  ;;  %v6091_v45 = vld [vmem:[%s6534_s4 + $0x758] sm:$0xff]  }
 0x117   : > { %5486 = vmatprep.subr.bf16.mxu1 %v6044_v48  ;;  %v6094_v48 = vld [vmem:[%s6534_s4 + $0x798] sm:$0xff]  }
 0x118   : > { %5465 = vmatpush3.bf16.msra.mxu0 %v6043_v47  ;;  %v6093_v47 = vld [vmem:[%s6534_s4 + $0x7d8] sm:$0xff]  }
 0x119   : > { %5494 = vmatprep.subr.bf16.mxu0 %v6047_v51  ;;  %v6097_v51 = vld [vmem:[%s6534_s4 + $0x7e0] sm:$0xff]  }
 0x11a   : > { %5487 = vmatpush3.bf16.msra.mxu1 %v6046_v49  ;;  %v6095_v49 = vld [vmem:[%s6534_s4 + $0x760] sm:$0xff]  }
 0x11b   : > { %4157 = vmatmul.mubr.bf16.vlgmr.msra.gmra.mrb[20].mxu0 %v1143_v50  ;;  %5516 = vmatprep.subr.bf16.mxu1 %v6049_v53  ;;  %v6096_v50 = vld [vmem:[%s6534_s4 + $0x720] sm:$0xff]   ;;  %v6099_v53 = vld [vmem:[%s6534_s4 + $0x768] sm:$0xff]  }
 0x11c   : > { %5495 = vmatpush3.bf16.msra.mxu0 %v6048_v52  ;;  %4236 = vmatprep.mubr.bf16.mxu0 %v1199_v23  ;;  %v6098_v52 = vld [vmem:[%s6534_s4 + $0x7a0] sm:$0xff]   ;;  %v6121_v23 = vld [vmem:[%s6534_s4 + $0x810] sm:$0xff]  }
 0x11d   : > { %4197 = vmatmul.mubr.bf16.vlgmr.msra.gmra.mrb[20].mxu1 %v1159_v55  ;;  %5496 = vmatprep.subr.bf16.mxu0 %v6051_v56  ;;  %v6101_v55 = vld [vmem:[%s6534_s4 + $0x7e8] sm:$0xff]  }
 0x11e   : > { %5517 = vmatpush3.bf16.msra.mxu1 %v6050_v54  ;;  %4276 = vmatprep.mubr.bf16.mxu1 %v1209_v27  ;;  %v6100_v54 = vld [vmem:[%s6534_s4 + $0x728] sm:$0xff]   ;;  %v6125_v27 = vld [vmem:[%s6534_s4 + $0x818] sm:$0xff]  }
 0x11f   : > { %5518 = vmatprep.subr.bf16.mxu1 %v6053_v58  ;;  %v6102_v56 = vld [vmem:[%s6534_s4 + $0x7a8] sm:$0xff]  }
 0x120   : > { %5497 = vmatpush3.bf16.msra.mxu0 %v6052_v57  ;;  %v6103_v57 = vld [vmem:[%s6534_s4 + $0x770] sm:$0xff]  }
 0x121   : > { %5498 = vmatprep.subr.bf16.mxu0 %v6055_v60 }
 0x122   : > { %5519 = vmatpush3.bf16.msra.mxu1 %v6054_v59  ;;  %v6104_v59 = vld [vmem:[%s6534_s4 + $0x730] sm:$0xff]  }
 0x123   : > { %5520 = vmatprep.subr.bf16.mxu1 %v6057_v62 }
 0x124   : > { %5499 = vmatpush3.bf16.msra.mxu0 %v6056_v61  ;;  %v6105_v61 = vld [vmem:[%s6534_s4 + $0x7f0] sm:$0xff]  }
 0x125   : > { %5500 = vmatprep.subr.bf16.mxu0 %v6059_v0 }
 0x126   : > { %5521 = vmatpush3.bf16.msra.mxu1 %v6058_v63 }
 0x127   : > { %5522 = vmatprep.subr.bf16.mxu1 %v6061_v2  ;;  %v6107_v2 = vld [vmem:[%s6534_s4 + $0x778] sm:$0xff]  }
 0x128   : > { %5501 = vmatpush3.bf16.msra.mxu0 %v6060_v1  ;;  %v6106_v1 = vld [vmem:[%s6534_s4 + $0x7b0] sm:$0xff]  }
 0x129   : > { %5502 = vmatprep.subr.bf16.mxu0 %v6063_v4 }
 0x12a   : > { %5523 = vmatpush3.bf16.msra.mxu1 %v6062_v3 }
 0x12b   : > { %5524 = vmatprep.subr.bf16.mxu1 %v6065_v6  ;;  %v6108_v6 = vld [vmem:[%s6534_s4 + $0x738] sm:$0xff]  }
 0x12c   : > { %5503 = vmatpush3.bf16.msra.mxu0 %v6064_v5 }
 0x12d   : > { %5504 = vmatprep.subr.bf16.mxu0 %v6067_v8  ;;  %v6109_v8 = vld [vmem:[%s6534_s4 + $0x7f8] sm:$0xff]  }
 0x12e   : > { %5525 = vmatpush3.bf16.msra.mxu1 %v6066_v7 }
 0x12f   : > { %5526 = vmatprep.subr.bf16.mxu1 %v6069_v10 }
 0x130   : > { %5505 = vmatpush3.bf16.msra.mxu0 %v6068_v9 }
 0x131   : > { %5506 = vmatprep.subr.bf16.mxu0 %v6071_v12  ;;  %v1192_v12 = vrot.slane %v6813_v20, %v6587_v42  ;;  %v6118_v20 = vld [vmem:[%s6534_s4 + $0x8c8] sm:$0xff]  }
 0x132   : > { %5527 = vmatpush3.bf16.msra.mxu1 %v6070_v11  ;;  %v6111_v11 = vld [vmem:[%s6534_s4 + $0x7b8] sm:$0xff]  }
 0x133   : > { %5528 = vmatprep.subr.bf16.mxu1 %v6073_v17  ;;  %v1208_v17 = vcombine.high %v1192_v12, %v1192_v12 }
 0x134   : > { %5507 = vmatpush3.bf16.msra.mxu0 %v6072_v14  ;;  %v6113_v14 = vld [vmem:[%s6534_s4 + $0x800] sm:$0xff]  }
 0x135   : > { %5508 = vmatprep.subr.bf16.mxu0 %v6075_v21  ;;  %v6119_v21 = vld [vmem:[%s6534_s4 + $0x888] sm:$0xff]  }
 0x136   : > { %5529 = vmatpush3.bf16.msra.mxu1 %v6074_v18  ;;  %v6116_v18 = vld [vmem:[%s6534_s4 + $0x848] sm:$0xff]  }
 0x137   : > { %5530 = vmatprep.subr.bf16.mxu1 %v6077_v25  ;;  %v6123_v25 = vld [vmem:[%s6534_s4 + $0x890] sm:$0xff]  }
 0x138   : > { %5509 = vmatpush3.bf16.msra.mxu0 %v6076_v22  ;;  %v6120_v22 = vld [vmem:[%s6534_s4 + $0x850] sm:$0xff]  }
 0x139   : > { %5538 = vmatprep.subr.bf16.mxu0 %v6079_v29  ;;  %v6127_v29 = vld [vmem:[%s6534_s4 + $0x898] sm:$0xff]  }
 0x13a   : > { %5531 = vmatpush3.bf16.msra.mxu1 %v6078_v26  ;;  %v6124_v26 = vld [vmem:[%s6534_s4 + $0x858] sm:$0xff]  }
 0x13b   : > { %4237 = vmatmul.mubr.bf16.vlgmr.msra.gmra.mrb[24].mxu0 %v1185_v28  ;;  %5560 = vmatprep.subr.bf16.mxu1 %v6081_v32  ;;  %v6126_v28 = vld [vmem:[%s6534_s4 + $0x8d8] sm:$0xff]   ;;  %v6130_v32 = vld [vmem:[%s6534_s4 + $0x8e0] sm:$0xff]  }
 0x13c   : > { %5539 = vmatpush3.bf16.msra.mxu0 %v6080_v30  ;;  %4316 = vmatprep.mubr.bf16.mxu0 %v1206_v31  ;;  %v6128_v30 = vld [vmem:[%s6534_s4 + $0x860] sm:$0xff]  }
 0x13d   : > { %4277 = vmatmul.mubr.bf16.vlgmr.msra.gmra.mrb[24].mxu1 %v1207_v34  ;;  %5540 = vmatprep.subr.bf16.mxu0 %v6083_v35  ;;  %v6129_v31 = vld [vmem:[%s6534_s4 + $0x820] sm:$0xff]   ;;  %v6132_v34 = vld [vmem:[%s6534_s4 + $0x868] sm:$0xff]  }
 0x13e   : > { %5561 = vmatpush3.bf16.msra.mxu1 %v6082_v33  ;;  %4356 = vmatprep.mubr.bf16.mxu1 %v1210_v37  ;;  %v6131_v33 = vld [vmem:[%s6534_s4 + $0x8a0] sm:$0xff]   ;;  %v6133_v35 = vld [vmem:[%s6534_s4 + $0x828] sm:$0xff]  }
 0x13f   : > { %5562 = vmatprep.subr.bf16.mxu1 %v6085_v38  ;;  %v6135_v37 = vld [vmem:[%s6534_s4 + $0x8a8] sm:$0xff]   ;;  %v6136_v38 = vld [vmem:[%s6534_s4 + $0x870] sm:$0xff]  }
 0x140   : > { %5541 = vmatpush3.bf16.msra.mxu0 %v6084_v36  ;;  %v6134_v36 = vld [vmem:[%s6534_s4 + $0x8e8] sm:$0xff]  }
 0x141   : > { %5542 = vmatprep.subr.bf16.mxu0 %v6087_v40 }
 0x142   : > { %5563 = vmatpush3.bf16.msra.mxu1 %v6086_v39  ;;  %v221_v39 = vld [vmem:[%s6548_s5 + $0x20] sm:$0xff] }
 0x143   : > { %5564 = vmatprep.subr.bf16.mxu1 %v6089_v43  ;;  %v1218_v43 = vrot.slane %v221_v39, %v6587_v42 }
 0x144   : > { %5543 = vmatpush3.bf16.msra.mxu0 %v6088_v41  ;;  %v6137_v41 = vld [vmem:[%s6534_s4 + $0x830] sm:$0xff]  }
 0x145   : > { %5544 = vmatprep.subr.bf16.mxu0 %v6091_v45 }
 0x146   : > { %5565 = vmatpush3.bf16.msra.mxu1 %v6090_v44  ;;  %v1211_v44 = vcombine.high %v221_v39, %v221_v39  ;;  %v6171_v39 = vld [vmem:[%s6534_s4 + $0x9b0] sm:$0xff]  }
 0x147   : > { %5566 = vmatprep.subr.bf16.mxu1 %v6093_v47 }
 0x148   : > { %5545 = vmatpush3.bf16.msra.mxu0 %v6092_v46  ;;  %v6138_v46 = vld [vmem:[%s6534_s4 + $0x8f0] sm:$0xff]  }
 0x149   : > { %5546 = vmatprep.subr.bf16.mxu0 %v6095_v49 }
 0x14a   : > { %5567 = vmatpush3.bf16.msra.mxu1 %v6094_v48 }
 0x14b   : > { %5568 = vmatprep.subr.bf16.mxu1 %v6097_v51  ;;  %v6890_v51 = vrot.slane %v1211_v44, %v6587_v42 }
 0x14c   : > { %5547 = vmatpush3.bf16.msra.mxu0 %v6096_v50  ;;  %v1226_v50 = vcombine.high %v1218_v43, %v1218_v43 }
 0x14d   : > { %5548 = vmatprep.subr.bf16.mxu0 %v6099_v53 }
 0x14e   : > { %v5246_v58 = vpop.f32.mrb[0].mxu0  ;;  %5569 = vmatpush3.bf16.msra.mxu1 %v6098_v52 }
 0x14f   : > { %v5247_v60 = vpop.f32.mrb[1].mxu0  ;;  %5570 = vmatprep.subr.bf16.mxu1 %v6101_v55  ;;  %v5268_v62 = vpop.f32.mrb[0].mxu1  ;;  %v6140_v55 = vld [vmem:[%s6534_s4 + $0x878] sm:$0xff]  }
 0x150   : > { %v5248_v63 = vadd.f32 %v5247_v60, %v5246_v58  ;;  %v5249_v0 = vpop.f32.mrb[2].mxu0  ;;  %5549 = vmatpush3.bf16.msra.mxu0 %v6100_v54  ;;  %v5269_v3 = vpop.f32.mrb[1].mxu1  ;;  %v6139_v54 = vld [vmem:[%s6534_s4 + $0x8b0] sm:$0xff]   ;;  %v6141_v58 = vld [vmem:[%s6534_s4 + $0x838] sm:$0xff]  }
 0x151   : > { %v5250_v4 = vpop.f32.mrb[3].mxu0  ;;  %5550 = vmatprep.subr.bf16.mxu0 %v6103_v57  ;;  %v5270_v5 = vadd.f32 %v5269_v3, %v5268_v62  ;;  %v5271_v7 = vpop.f32.mrb[2].mxu1  ;;  %v6142_v60 = vld [vmem:[%s6534_s4 + $0x8f8] sm:$0xff]   ;;  %v1227_v62 = vcombine.high %v6890_v51, %v6890_v51  ;;  %v1234_v3 = vrot.slane %v1218_v43, %v6587_v42 }
 0x152   : > { %5571 = vmatpush3.bf16.msra.mxu1 %v6102_v56  ;;  %v5272_v9 = vpop.f32.mrb[3].mxu1  ;;  %v6143_v0 = vld [vmem:[%s6534_s4 + $0x8b8] sm:$0xff]   ;;  %v6144_v4 = vld [vmem:[%s6534_s4 + $0x940] sm:$0xff]  }
 0x153   : > { %5572 = vmatprep.subr.bf16.mxu1 %v6105_v61  ;;  %v6855_v10 = vadd.f32 %v5270_v5, %v5248_v63  ;;  %v6145_v5 = vld [vmem:[%s6534_s4 + $0x900] sm:$0xff]   ;;  %v1256_v9 = vcombine.high %v1234_v3, %v1234_v3 }
 0x154   : > { %5551 = vmatpush3.bf16.msra.mxu0 %v6104_v59  ;;  %v1248_v59 = vrot.slane %v1226_v50, %v6587_v42  ;;  %v6146_v7 = vld [vmem:[%s6534_s4 + $0x9c0] sm:$0xff]  }
 0x155   : > { %5552 = vmatprep.subr.bf16.mxu0 %v6107_v2 }
 0x156   : > { %5573 = vmatpush3.bf16.msra.mxu1 %v6106_v1  ;;  %v1258_v1 = vcombine.high %v1248_v59, %v1248_v59 }
 0x157   : > { %5574 = vmatprep.subr.bf16.mxu1 %v6109_v8  ;;  %v6147_v8 = vld [vmem:[%s6534_s4 + $0x980] sm:$0xff]  }
 0x158   : > { %5553 = vmatpush3.bf16.msra.mxu0 %v6108_v6  ;;  %v1255_v6 = vrot.slane %v1227_v62, %v6587_v42  ;;  %v6185_v62 = vld [vmem:[%s6534_s4 + $0xa50] sm:$0xff]  }
 0x159   : > { %5582 = vmatprep.subr.bf16.mxu0 %v6112_v13  ;;  %v6150_v13 = vld [vmem:[%s6534_s4 + $0x9c8] sm:$0xff]  }
 0x15a   : > { %5575 = vmatpush3.bf16.msra.mxu1 %v6111_v11  ;;  %v6149_v11 = vld [vmem:[%s6534_s4 + $0x908] sm:$0xff]  }
 0x15b   : > { %4317 = vmatmul.mubr.bf16.vlgmr.msra.gmra.mrb[28].mxu0 %v1192_v12  ;;  %5604 = vmatprep.subr.bf16.mxu1 %v6114_v15  ;;  %v1259_v12 = vcombine.high %v1255_v6, %v1255_v6  ;;  %v6152_v15 = vld [vmem:[%s6534_s4 + $0x950] sm:$0xff]  }
 0x15c   : > { %5583 = vmatpush3.bf16.msra.mxu0 %v6113_v14  ;;  %4396 = vmatprep.mubr.bf16.mxu0 %v1248_v59  ;;  %v6151_v14 = vld [vmem:[%s6534_s4 + $0x988] sm:$0xff]  }
 0x15d   : > { %4357 = vmatmul.mubr.bf16.vlgmr.msra.gmra.mrb[28].mxu1 %v1208_v17  ;;  %5584 = vmatprep.subr.bf16.mxu0 %v6116_v18  ;;  %v6154_v17 = vld [vmem:[%s6534_s4 + $0x9d0] sm:$0xff]   ;;  %v6181_v59 = vld [vmem:[%s6534_s4 + $0xa48] sm:$0xff]  }
 0x15e   : > { %5605 = vmatpush3.bf16.msra.mxu1 %v6115_v16  ;;  %4436 = vmatprep.mubr.bf16.mxu1 %v1258_v1  ;;  %v6153_v16 = vld [vmem:[%s6534_s4 + $0x910] sm:$0xff]  }
 0x15f   : > { %5606 = vmatprep.subr.bf16.mxu1 %v6118_v20  ;;  %v6155_v18 = vld [vmem:[%s6534_s4 + $0x990] sm:$0xff]   ;;  %v6157_v20 = vld [vmem:[%s6534_s4 + $0x918] sm:$0xff]  }
 0x160   : > { %5585 = vmatpush3.bf16.msra.mxu0 %v6117_v19  ;;  %v6156_v19 = vld [vmem:[%s6534_s4 + $0x958] sm:$0xff]   ;;  %v6188_v1 = vld [vmem:[%s6534_s4 + $0xa90] sm:$0xff]  }
 0x161   : > { %5586 = vmatprep.subr.bf16.mxu0 %v6120_v22  ;;  %v6159_v22 = vld [vmem:[%s6534_s4 + $0x998] sm:$0xff]  }
 0x162   : > { %5607 = vmatpush3.bf16.msra.mxu1 %v6119_v21  ;;  %v6158_v21 = vld [vmem:[%s6534_s4 + $0x9d8] sm:$0xff]  }
 0x163   : > { %5608 = vmatprep.subr.bf16.mxu1 %v6122_v24  ;;  %v6161_v24 = vld [vmem:[%s6534_s4 + $0x920] sm:$0xff]  }
 0x164   : > { %5587 = vmatpush3.bf16.msra.mxu0 %v6121_v23  ;;  %v6160_v23 = vld [vmem:[%s6534_s4 + $0x960] sm:$0xff]  }
 0x165   : > { %5588 = vmatprep.subr.bf16.mxu0 %v6124_v26  ;;  %v6163_v26 = vld [vmem:[%s6534_s4 + $0x9a0] sm:$0xff]  }
 0x166   : > { %5609 = vmatpush3.bf16.msra.mxu1 %v6123_v25  ;;  %v6162_v25 = vld [vmem:[%s6534_s4 + $0x9e0] sm:$0xff]  }
 0x167   : > { %5610 = vmatprep.subr.bf16.mxu1 %v6126_v28  ;;  %v6165_v28 = vld [vmem:[%s6534_s4 + $0x928] sm:$0xff]  }
 0x168   : > { %5589 = vmatpush3.bf16.msra.mxu0 %v6125_v27  ;;  %v6164_v27 = vld [vmem:[%s6534_s4 + $0x968] sm:$0xff]  }
 0x169   : > { %5590 = vmatprep.subr.bf16.mxu0 %v6128_v30  ;;  %v6167_v30 = vld [vmem:[%s6534_s4 + $0x9a8] sm:$0xff]  }
 0x16a   : > { %5611 = vmatpush3.bf16.msra.mxu1 %v6127_v29  ;;  %v6166_v29 = vld [vmem:[%s6534_s4 + $0x9e8] sm:$0xff]  }
 0x16b   : > { %5612 = vmatprep.subr.bf16.mxu1 %v6130_v32 }
 0x16c   : > { %5591 = vmatpush3.bf16.msra.mxu0 %v6129_v31  ;;  %v6168_v31 = vld [vmem:[%s6534_s4 + $0x970] sm:$0xff]  }
 0x16d   : > { %5592 = vmatprep.subr.bf16.mxu0 %v6132_v34 }
 0x16e   : > { %v5290_v40 = vpop.f32.mrb[4].mxu0  ;;  %5613 = vmatpush3.bf16.msra.mxu1 %v6131_v33  ;;  %v6169_v33 = vld [vmem:[%s6534_s4 + $0x930] sm:$0xff]  }
 0x16f   : > { %v5291_v45 = vpop.f32.mrb[5].mxu0  ;;  %5614 = vmatprep.subr.bf16.mxu1 %v6134_v36  ;;  %v5312_v49 = vpop.f32.mrb[4].mxu1 }
 0x170   : > { %v5292_v47 = vadd.f32 %v5291_v45, %v5290_v40  ;;  %v5293_v48 = vpop.f32.mrb[6].mxu0  ;;  %5593 = vmatpush3.bf16.msra.mxu0 %v6133_v35  ;;  %v5313_v53 = vpop.f32.mrb[5].mxu1  ;;  %v6170_v35 = vld [vmem:[%s6534_s4 + $0x9f0] sm:$0xff]   ;;  %v6172_v40 = vld [vmem:[%s6534_s4 + $0x978] sm:$0xff]  }
 0x171   : > { %v5294_v52 = vpop.f32.mrb[7].mxu0  ;;  %5594 = vmatprep.subr.bf16.mxu0 %v6136_v38  ;;  %v5314_v57 = vadd.f32 %v5313_v53, %v5312_v49  ;;  %v5315_v61 = vpop.f32.mrb[6].mxu1  ;;  %v6174_v48 = vld [vmem:[%s6534_s4 + $0x9f8] sm:$0xff]   ;;  %v1241_v53 = vrot.slane %v6890_v51, %v6587_v42  ;;  %v6183_v51 = vld [vmem:[%s6534_s4 + $0xac8] sm:$0xff]  }
 0x172   : > { %v3839_v56 = vadd.f32 %v5292_v47, %v6855_v10  ;;  %5615 = vmatpush3.bf16.msra.mxu1 %v6135_v37  ;;  %v5316_v2 = vpop.f32.mrb[7].mxu1  ;;  %v6148_v10 = vld [vmem:[%s6534_s4 + $0x948] sm:$0xff]   ;;  %v6176_v52 = vld [vmem:[%s6534_s4 + $0x9b8] sm:$0xff]  }
 0x173   : > { %5616 = vmatprep.subr.bf16.mxu1 %v6138_v46  ;;  %v6173_v46 = vld [vmem:[%s6534_s4 + $0x938] sm:$0xff]   ;;  %v6184_v61 = vld [vmem:[%s6534_s4 + $0xa88] sm:$0xff]  }
 0x174   : > { %v6900_v63 = vadd.f32 %v5314_v57, %v3839_v56  ;;  %5595 = vmatpush3.bf16.msra.mxu0 %v6137_v41  ;;  %v6179_v56 = vld [vmem:[%s6534_s4 + $0xac0] sm:$0xff]   ;;  %v6189_v2 = vld [vmem:[%s6534_s4 + $0xa58] sm:$0xff]  }
 0x175   : > { %5596 = vmatprep.subr.bf16.mxu0 %v6140_v55  ;;  %v6178_v55 = vld [vmem:[%s6534_s4 + $0xa00] sm:$0xff]  }
 0x176   : > { %5617 = vmatpush3.bf16.msra.mxu1 %v6139_v54  ;;  %v6177_v54 = vld [vmem:[%s6534_s4 + $0xa40] sm:$0xff]  }
 0x177   : > { %5618 = vmatprep.subr.bf16.mxu1 %v6142_v60  ;;  %v6180_v57 = vld [vmem:[%s6534_s4 + $0xa80] sm:$0xff]   ;;  %v6182_v60 = vld [vmem:[%s6534_s4 + $0xa08] sm:$0xff]  }
 0x178   : > { %5597 = vmatpush3.bf16.msra.mxu0 %v6141_v58  ;;  %v1257_v58 = vcombine.high %v1241_v53, %v1241_v53 }
 0x179   : > { %5626 = vmatprep.subr.bf16.mxu0 %v6144_v4  ;;  %v6191_v4 = vld [vmem:[%s6534_s4 + $0xad8] sm:$0xff]  }
 0x17a   : > { %5619 = vmatpush3.bf16.msra.mxu1 %v6143_v0  ;;  %v6187_v0 = vld [vmem:[%s6534_s4 + $0xad0] sm:$0xff]  }
 0x17b   : > { %4397 = vmatmul.mubr.bf16.vlgmr.msra.gmra.mrb[32].mxu0 %v1234_v3  ;;  %5648 = vmatprep.subr.bf16.mxu1 %v6146_v7  ;;  %v6190_v3 = vld [vmem:[%s6534_s4 + $0xa18] sm:$0xff]   ;;  %v6194_v7 = vld [vmem:[%s6534_s4 + $0xa20] sm:$0xff]  }
 0x17c   : > { %5627 = vmatpush3.bf16.msra.mxu0 %v6145_v5  ;;  %4476 = vmatprep.mubr.bf16.mxu0 %v1255_v6  ;;  %v6192_v5 = vld [vmem:[%s6534_s4 + $0xa98] sm:$0xff]   ;;  %v6193_v6 = vld [vmem:[%s6534_s4 + $0xa60] sm:$0xff]  }
 0x17d   : > { %4437 = vmatmul.mubr.bf16.vlgmr.msra.gmra.mrb[32].mxu1 %v1256_v9  ;;  %5628 = vmatprep.subr.bf16.mxu0 %v6148_v10  ;;  %v6196_v9 = vld [vmem:[%s6534_s4 + $0xaa0] sm:$0xff]   ;;  %v6197_v10 = vld [vmem:[%s6534_s4 + $0xa68] sm:$0xff]  }
 0x17e   : > { %5649 = vmatpush3.bf16.msra.mxu1 %v6147_v8  ;;  %4516 = vmatprep.mubr.bf16.mxu1 %v1259_v12  ;;  %v6195_v8 = vld [vmem:[%s6534_s4 + $0xae0] sm:$0xff]   ;;  %v6199_v12 = vld [vmem:[%s6534_s4 + $0xae8] sm:$0xff]  }
 0x17f   : > { %5650 = vmatprep.subr.bf16.mxu1 %v6150_v13  ;;  %v6200_v13 = vld [vmem:[%s6534_s4 + $0xaa8] sm:$0xff]  }
 0x180   : > { %5629 = vmatpush3.bf16.msra.mxu0 %v6149_v11  ;;  %v6198_v11 = vld [vmem:[%s6534_s4 + $0xa28] sm:$0xff]  }
 0x181   : > { %5630 = vmatprep.subr.bf16.mxu0 %v6152_v15 }
 0x182   : > { %5651 = vmatpush3.bf16.msra.mxu1 %v6151_v14  ;;  %v6201_v14 = vld [vmem:[%s6534_s4 + $0xa70] sm:$0xff]  }
 0x183   : > { %5652 = vmatprep.subr.bf16.mxu1 %v6154_v17  ;;  %v222_v17 = vld [vmem:[%s6548_s5 + $0x28] sm:$0xff] }
 0x184   : > { %5631 = vmatpush3.bf16.msra.mxu0 %v6153_v16  ;;  %v6202_v16 = vld [vmem:[%s6534_s4 + $0xa30] sm:$0xff]  }
 0x185   : > { %5632 = vmatprep.subr.bf16.mxu0 %v6156_v19  ;;  %v6203_v19 = vld [vmem:[%s6534_s4 + $0xaf0] sm:$0xff]  }
 0x186   : > { %5653 = vmatpush3.bf16.msra.mxu1 %v6155_v18 }
 0x187   : > { %5654 = vmatprep.subr.bf16.mxu1 %v6158_v21  ;;  %v1260_v21 = vcombine.high %v222_v17, %v222_v17 }
 0x188   : > { %5633 = vmatpush3.bf16.msra.mxu0 %v6157_v20  ;;  %v1267_v20 = vrot.slane %v222_v17, %v6587_v42 }
 0x189   : > { %5634 = vmatprep.subr.bf16.mxu0 %v6160_v23 }
 0x18a   : > { %5655 = vmatpush3.bf16.msra.mxu1 %v6159_v22 }
 0x18b   : > { %5656 = vmatprep.subr.bf16.mxu1 %v6162_v25 }
 0x18c   : > { %5635 = vmatpush3.bf16.msra.mxu0 %v6161_v24 }
 0x18d   : > { %5636 = vmatprep.subr.bf16.mxu0 %v6164_v27  ;;  %v6204_v27 = vld [vmem:[%s6534_s4 + $0xab0] sm:$0xff]  }
 0x18e   : > { %v5334_v32 = vpop.f32.mrb[8].mxu0  ;;  %5657 = vmatpush3.bf16.msra.mxu1 %v6163_v26 }
 0x18f   : > { %v5335_v34 = vpop.f32.mrb[9].mxu0  ;;  %5658 = vmatprep.subr.bf16.mxu1 %v6166_v29  ;;  %v1275_v29 = vcombine.high %v1267_v20, %v1267_v20 }
 0x190   : > { %v5336_v36 = vadd.f32 %v5335_v34, %v5334_v32  ;;  %v5337_v37 = vpop.f32.mrb[10].mxu0  ;;  %v5356_v38 = vpop.f32.mrb[8].mxu1  ;;  %5637 = vmatpush3.bf16.msra.mxu0 %v6165_v28  ;;  %v6205_v28 = vld [vmem:[%s6534_s4 + $0xa78] sm:$0xff]  }
 0x191   : > { %v5338_v41 = vpop.f32.mrb[11].mxu0  ;;  %v5357_v43 = vpop.f32.mrb[9].mxu1  ;;  %5638 = vmatprep.subr.bf16.mxu0 %v6168_v31  ;;  %v1297_v34 = vrot.slane %v1275_v29, %v6587_v42  ;;  %v6388_v29 = vmov 0.0  }
 0x192   : > { %v3919_v44 = vadd.f32 %v5336_v36, %v6900_v63  ;;  %v5358_v45 = vadd.f32 %v5357_v43, %v5356_v38  ;;  %5659 = vmatpush3.bf16.msra.mxu1 %v6167_v30  ;;  %v5359_v47 = vpop.f32.mrb[10].mxu1  ;;  %v6186_v63 = vld [vmem:[%s6534_s4 + $0xa10] sm:$0xff]   ;;  %v6974_v30 = vrot.slane %v1260_v21, %v6587_v42  ;;  %v6206_v38 = vld [vmem:[%s6534_s4 + $0xa38] sm:$0xff]   ;;  %v6209_v41 = vld [vmem:[%s6534_s4 + $0xb40] sm:$0xff]  }
 0x193   : > { %5660 = vmatprep.subr.bf16.mxu1 %v6170_v35  ;;  %v5360_v49 = vpop.f32.mrb[11].mxu1  ;;  %v1307_v43 = vcombine.high %v1297_v34, %v1297_v34  ;;  %v6210_v47 = vld [vmem:[%s6534_s4 + $0xb00] sm:$0xff]  }
 0x194   : > { %v6937_v50 = vadd.f32 %v5358_v45, %v3919_v44  ;;  %5639 = vmatpush3.bf16.msra.mxu0 %v6169_v33  ;;  %v6207_v33 = vld [vmem:[%s6534_s4 + $0xaf8] sm:$0xff]   ;;  %v1276_v36 = vcombine.high %v6974_v30, %v6974_v30  ;;  %v6213_v49 = vld [vmem:[%s6534_s4 + $0xb48] sm:$0xff]  }
 0x195   : > { %5640 = vmatprep.subr.bf16.mxu0 %v6172_v40  ;;  %v1283_v40 = vrot.slane %v1267_v20, %v6587_v42  ;;  %v6208_v44 = vld [vmem:[%s6534_s4 + $0xab8] sm:$0xff]   ;;  %v6236_v20 = vld [vmem:[%s6534_s4 + $0xbb0] sm:$0xff]  }
 0x196   : > { %5661 = vmatpush3.bf16.msra.mxu1 %v6171_v39  ;;  %v1304_v45 = vrot.slane %v1276_v36, %v6587_v42 }
 0x197   : > { %5662 = vmatprep.subr.bf16.mxu1 %v6174_v48  ;;  %v1305_v48 = vcombine.high %v1283_v40, %v1283_v40 }
 0x198   : > { %5641 = vmatpush3.bf16.msra.mxu0 %v6173_v46  ;;  %v6211_v46 = vld [vmem:[%s6534_s4 + $0xbc0] sm:$0xff]  }
 0x199   : > { %5670 = vmatprep.subr.bf16.mxu0 %v6177_v54  ;;  %v6214_v54 = vld [vmem:[%s6534_s4 + $0xb08] sm:$0xff]  }
 0x19a   : > { %5663 = vmatpush3.bf16.msra.mxu1 %v6176_v52  ;;  %v1308_v52 = vcombine.high %v1304_v45, %v1304_v45 }
 0x19b   : > { %4477 = vmatmul.mubr.bf16.vlgmr.msra.gmra.mrb[36].mxu0 %v1241_v53  ;;  %5692 = vmatprep.subr.bf16.mxu1 %v6179_v56  ;;  %v6215_v53 = vld [vmem:[%s6534_s4 + $0xbc8] sm:$0xff]  }
 0x19c   : > { %5671 = vmatpush3.bf16.msra.mxu0 %v6178_v55  ;;  %4556 = vmatprep.mubr.bf16.mxu0 %v1297_v34  ;;  %v6217_v55 = vld [vmem:[%s6534_s4 + $0xb50] sm:$0xff]   ;;  %v6216_v56 = vld [vmem:[%s6534_s4 + $0xb88] sm:$0xff]   ;;  %v6246_v34 = vld [vmem:[%s6534_s4 + $0xc20] sm:$0xff]  }
 0x19d   : > { %4517 = vmatmul.mubr.bf16.vlgmr.msra.gmra.mrb[36].mxu1 %v1257_v58  ;;  %5672 = vmatprep.subr.bf16.mxu0 %v6181_v59  ;;  %v6218_v58 = vld [vmem:[%s6534_s4 + $0xb10] sm:$0xff]   ;;  %v6221_v59 = vld [vmem:[%s6534_s4 + $0xb58] sm:$0xff]  }
 0x19e   : > { %5693 = vmatpush3.bf16.msra.mxu1 %v6180_v57  ;;  %4596 = vmatprep.mubr.bf16.mxu1 %v1307_v43  ;;  %v6219_v57 = vld [vmem:[%s6534_s4 + $0xbd0] sm:$0xff]  }
 0x19f   : > { %5694 = vmatprep.subr.bf16.mxu1 %v6183_v51  ;;  %v6223_v51 = vld [vmem:[%s6534_s4 + $0xbd8] sm:$0xff]  }
 0x1a0   : > { %5673 = vmatpush3.bf16.msra.mxu0 %v6182_v60  ;;  %v6220_v60 = vld [vmem:[%s6534_s4 + $0xb90] sm:$0xff]  }
 0x1a1   : > { %5674 = vmatprep.subr.bf16.mxu0 %v6185_v62  ;;  %v6225_v62 = vld [vmem:[%s6534_s4 + $0xb60] sm:$0xff]  }
 0x1a2   : > { %5695 = vmatpush3.bf16.msra.mxu1 %v6184_v61  ;;  %v6222_v61 = vld [vmem:[%s6534_s4 + $0xb18] sm:$0xff]  }
 0x1a3   : > { %5696 = vmatprep.subr.bf16.mxu1 %v6187_v0  ;;  %v6227_v0 = vld [vmem:[%s6534_s4 + $0xbe0] sm:$0xff]  }
 0x1a4   : > { %5675 = vmatpush3.bf16.msra.mxu0 %v6186_v63  ;;  %v6224_v63 = vld [vmem:[%s6534_s4 + $0xb98] sm:$0xff]  }
 0x1a5   : > { %5676 = vmatprep.subr.bf16.mxu0 %v6189_v2  ;;  %v6229_v2 = vld [vmem:[%s6534_s4 + $0xb68] sm:$0xff]  }
 0x1a6   : > { %5697 = vmatpush3.bf16.msra.mxu1 %v6188_v1  ;;  %v6226_v1 = vld [vmem:[%s6534_s4 + $0xb20] sm:$0xff]  }
 0x1a7   : > { %5698 = vmatprep.subr.bf16.mxu1 %v6191_v4  ;;  %v6231_v4 = vld [vmem:[%s6534_s4 + $0xbe8] sm:$0xff]  }
 0x1a8   : > { %5677 = vmatpush3.bf16.msra.mxu0 %v6190_v3  ;;  %v6228_v3 = vld [vmem:[%s6534_s4 + $0xba0] sm:$0xff]  }
 0x1a9   : > { %5678 = vmatprep.subr.bf16.mxu0 %v6193_v6  ;;  %v6233_v6 = vld [vmem:[%s6534_s4 + $0xb70] sm:$0xff]  }
 0x1aa   : > { %5699 = vmatpush3.bf16.msra.mxu1 %v6192_v5  ;;  %v6230_v5 = vld [vmem:[%s6534_s4 + $0xb28] sm:$0xff]  }
 0x1ab   : > { %5700 = vmatprep.subr.bf16.mxu1 %v6195_v8  ;;  %v6232_v8 = vld [vmem:[%s6534_s4 + $0xba8] sm:$0xff]  }
 0x1ac   : > { %5679 = vmatpush3.bf16.msra.mxu0 %v6194_v7 }
 0x1ad   : > { %5680 = vmatprep.subr.bf16.mxu0 %v6197_v10  ;;  %v6235_v10 = vld [vmem:[%s6534_s4 + $0xbf0] sm:$0xff]  }
 0x1ae   : > { %v5378_v15 = vpop.f32.mrb[12].mxu0  ;;  %5701 = vmatpush3.bf16.msra.mxu1 %v6196_v9 }
 0x1af   : > { %v5379_v18 = vpop.f32.mrb[13].mxu0  ;;  %5702 = vmatprep.subr.bf16.mxu1 %v6199_v12 }
 0x1b0   : > { %v5380_v22 = vadd.f32 %v5379_v18, %v5378_v15  ;;  %v5381_v23 = vpop.f32.mrb[14].mxu0  ;;  %v5400_v24 = vpop.f32.mrb[12].mxu1  ;;  %5681 = vmatpush3.bf16.msra.mxu0 %v6198_v11  ;;  %v6237_v15 = vld [vmem:[%s6534_s4 + $0xb78] sm:$0xff]  }
 0x1b1   : > { %v5382_v25 = vpop.f32.mrb[15].mxu0  ;;  %v5401_v26 = vpop.f32.mrb[13].mxu1  ;;  %5682 = vmatprep.subr.bf16.mxu0 %v6201_v14  ;;  %v6234_v14 = vld [vmem:[%s6534_s4 + $0xb30] sm:$0xff]  }
 0x1b2   : > { %v3999_v31 = vadd.f32 %v5380_v22, %v6937_v50  ;;  %v5402_v32 = vadd.f32 %v5401_v26, %v5400_v24  ;;  %5703 = vmatpush3.bf16.msra.mxu1 %v6200_v13  ;;  %v5403_v35 = vpop.f32.mrb[14].mxu1  ;;  %v6212_v50 = vld [vmem:[%s6534_s4 + $0xb80] sm:$0xff]   ;;  %v6239_v22 = vld [vmem:[%s6534_s4 + $0xbf8] sm:$0xff]   ;;  %v1290_v26 = vrot.slane %v6974_v30, %v6587_v42  ;;  %v6244_v30 = vld [vmem:[%s6534_s4 + $0xc10] sm:$0xff]  }
 0x1b3   : > { %5704 = vmatprep.subr.bf16.mxu1 %v6203_v19  ;;  %v5404_v39 = vpop.f32.mrb[15].mxu1  ;;  %v6238_v25 = vld [vmem:[%s6534_s4 + $0xb38] sm:$0xff]   ;;  %v6247_v35 = vld [vmem:[%s6534_s4 + $0xc28] sm:$0xff]  }
 0x1b4   : > { %v6981_v37 = vadd.f32 %v5402_v32, %v3999_v31  ;;  %5683 = vmatpush3.bf16.msra.mxu0 %v6202_v16  ;;  %v1306_v31 = vcombine.high %v1290_v26, %v1290_v26  ;;  %v6243_v32 = vld [vmem:[%s6534_s4 + $0xc08] sm:$0xff]  }
 0x1b5   : > { %5684 = vmatprep.subr.bf16.mxu0 %v6205_v28  ;;  %v6242_v28 = vld [vmem:[%s6534_s4 + $0xc00] sm:$0xff]  }
 0x1b6   : > { %5705 = vmatpush3.bf16.msra.mxu1 %v6204_v27  ;;  %v6241_v27 = vld [vmem:[%s6534_s4 + $0xbb8] sm:$0xff]  }
 0x1b7   : > { %5706 = vmatprep.subr.bf16.mxu1 %v6207_v33  ;;  %v6245_v33 = vld [vmem:[%s6534_s4 + $0xc18] sm:$0xff]  }
 0x1b8   : > { %5685 = vmatpush3.bf16.msra.mxu0 %v6206_v38 }
 0x1b9   : > { %5714 = vmatprep.subr.bf16.mxu0 %v6209_v41  ;;  %v6248_v41 = vld [vmem:[%s6534_s4 + $0xc30] sm:$0xff]  }
 0x1ba   : > { %5707 = vmatpush3.bf16.msra.mxu1 %v6208_v44 }
 0x1bb   : > { %4557 = vmatmul.mubr.bf16.vlgmr.msra.gmra.mrb[40].mxu0 %v1283_v40  ;;  %5736 = vmatprep.subr.bf16.mxu1 %v6211_v46 }
 0x1bc   : > { %5715 = vmatpush3.bf16.msra.mxu0 %v6210_v47  ;;  %4636 = vmatprep.mubr.bf16.mxu0 %v1304_v45 }
 0x1bd   : > { %4597 = vmatmul.mubr.bf16.vlgmr.msra.gmra.mrb[40].mxu1 %v1305_v48  ;;  %5716 = vmatprep.subr.bf16.mxu0 %v6213_v49 }
 0x1be   : > { %5737 = vmatpush3.bf16.msra.mxu1 %v6212_v50  ;;  %4676 = vmatprep.mubr.bf16.mxu1 %v1308_v52  ;;  %v6249_v50 = vld [vmem:[%s6534_s4 + $0xc38] sm:$0xff]   ;;  %v4830_v52 = vld.sshfl [vmem:[%s6548_s5 + $0x30] sm:$0x1 pattern:$0x75316420] }
 0x1bf   : > { %5738 = vmatprep.subr.bf16.mxu1 %v6215_v53  ;;  %v1322_v53 = vrot.slane %v4830_v52, %v6587_v42 }
 0x1c0   : > { %5717 = vmatpush3.bf16.msra.mxu0 %v6214_v54 }
 0x1c1   : > { %5718 = vmatprep.subr.bf16.mxu0 %v6217_v55 }
 0x1c2   : > { %5739 = vmatpush3.bf16.msra.mxu1 %v6216_v56 }
 0x1c3   : > { %5740 = vmatprep.subr.bf16.mxu1 %v6219_v57 }
 0x1c4   : > { %5719 = vmatpush3.bf16.msra.mxu0 %v6218_v58 }
 0x1c5   : > { %5720 = vmatprep.subr.bf16.mxu0 %v6221_v59 }
 0x1c6   : > { %5741 = vmatpush3.bf16.msra.mxu1 %v6220_v60 }
 0x1c7   : > { %5742 = vmatprep.subr.bf16.mxu1 %v6223_v51 }
 0x1c8   : > { %5721 = vmatpush3.bf16.msra.mxu0 %v6222_v61 }
 0x1c9   : > { %5722 = vmatprep.subr.bf16.mxu0 %v6225_v62 }
 0x1ca   : > { %5743 = vmatpush3.bf16.msra.mxu1 %v6224_v63 }
 0x1cb   : > { %5744 = vmatprep.subr.bf16.mxu1 %v6227_v0 }
 0x1cc   : > { %5723 = vmatpush3.bf16.msra.mxu0 %v6226_v1 }
 0x1cd   : > { %5724 = vmatprep.subr.bf16.mxu0 %v6229_v2 }
 0x1ce   : > { %v5422_v7 = vpop.f32.mrb[16].mxu0  ;;  %5745 = vmatpush3.bf16.msra.mxu1 %v6228_v3 }
 0x1cf   : > { %v5423_v9 = vpop.f32.mrb[17].mxu0  ;;  %5746 = vmatprep.subr.bf16.mxu1 %v6231_v4 }
 0x1d0   : > { %v5424_v11 = vadd.f32 %v5423_v9, %v5422_v7  ;;  %v5425_v12 = vpop.f32.mrb[18].mxu0  ;;  %v5444_v13 = vpop.f32.mrb[16].mxu1  ;;  %5725 = vmatpush3.bf16.msra.mxu0 %v6230_v5 }
 0x1d1   : > { %v5426_v16 = vpop.f32.mrb[19].mxu0  ;;  %v5445_v17 = vpop.f32.mrb[17].mxu1  ;;  %5726 = vmatprep.subr.bf16.mxu0 %v6233_v6 }
 0x1d2   : > { %v4079_v18 = vadd.f32 %v5424_v11, %v6981_v37  ;;  %v5446_v19 = vadd.f32 %v5445_v17, %v5444_v13  ;;  %5747 = vmatpush3.bf16.msra.mxu1 %v6232_v8  ;;  %v5447_v21 = vpop.f32.mrb[18].mxu1 }
 0x1d3   : > { %5748 = vmatprep.subr.bf16.mxu1 %v6235_v10  ;;  %v5448_v23 = vpop.f32.mrb[19].mxu1 }
 0x1d4   : > { %v4119_v24 = vadd.f32 %v5446_v19, %v4079_v18  ;;  %5727 = vmatpush3.bf16.msra.mxu0 %v6234_v14 }
 0x1d5   : > { %5728 = vmatprep.subr.bf16.mxu0 %v6237_v15 }
 0x1d6   : > { %5749 = vmatpush3.bf16.msra.mxu1 %v6236_v20 }
 0x1d7   : > { %5750 = vmatprep.subr.bf16.mxu1 %v6239_v22 }
 0x1d8   : > { %5729 = vmatpush3.bf16.msra.mxu0 %v6238_v25 }
 0x1d9   : > { %5767 = vmatprep.subr.bf16.mxu0 %v6388_v29 }
 0x1da   : > { %5751 = vmatpush3.bf16.msra.mxu1 %v6241_v27 }
 0x1db   : > { %4637 = vmatmul.mubr.bf16.vlgmr.msra.gmra.mrb[44].mxu0 %v1290_v26 }
 0x1dc   : > { %5768 = vmatpush3.bf16.msra.mxu0 %v6242_v28  ;;  %5783 = vmatprep.mubr.msk.bf16.mxu0 %vm6389_vm0, %v6388_v29 }
 0x1dd   : > { %4677 = vmatmul.mubr.bf16.vlgmr.msra.gmra.mrb[44].mxu1 %v1306_v31  ;;  %5769 = vmatprep.subr.bf16.mxu0 %v6388_v29 }
 0x1e0   : > { %5770 = vmatpush3.bf16.msra.mxu0 %v6243_v32 }
 0x1e1   : > { %5771 = vmatprep.subr.bf16.mxu0 %v6388_v29 }
 0x1e4   : > { %5772 = vmatpush3.bf16.msra.mxu0 %v6244_v30 }
 0x1e5   : > { %5773 = vmatprep.subr.bf16.mxu0 %v6388_v29 }
 0x1e8   : > { %5774 = vmatpush3.bf16.msra.mxu0 %v6245_v33 }
 0x1e9   : > { %5775 = vmatprep.subr.bf16.mxu0 %v6388_v29 }
 0x1ec   : > { %5776 = vmatpush3.bf16.msra.mxu0 %v6246_v34 }
 0x1ed   : > { %5777 = vmatprep.subr.bf16.mxu0 %v6388_v29 }
 0x1ee   : > { %v5466_v36 = vpop.f32.mrb[20].mxu0 }
 0x1ef   : > { %v5467_v37 = vpop.f32.mrb[21].mxu0 }
 0x1f0   : > { %v5468_v38 = vadd.f32 %v5467_v37, %v5466_v36  ;;  %v5469_v39 = vpop.f32.mrb[22].mxu0  ;;  %v5488_v40 = vpop.f32.mrb[20].mxu1  ;;  %5778 = vmatpush3.bf16.msra.mxu0 %v6247_v35 }
 0x1f1   : > { %v5470_v43 = vpop.f32.mrb[23].mxu0  ;;  %v5489_v44 = vpop.f32.mrb[21].mxu1  ;;  %5779 = vmatprep.subr.bf16.mxu0 %v6388_v29 }
 0x1f2   : > { %v4159_v45 = vadd.f32 %v5468_v38, %v4119_v24  ;;  %v5490_v46 = vadd.f32 %v5489_v44, %v5488_v40  ;;  %v5491_v47 = vpop.f32.mrb[22].mxu1 }
 0x1f3   : > { %v5492_v48 = vpop.f32.mrb[23].mxu1 }
 0x1f4   : > { %v4199_v49 = vadd.f32 %v5490_v46, %v4159_v45  ;;  %5780 = vmatpush3.bf16.msra.mxu0 %v6248_v41 }
 0x1f5   : > { %5781 = vmatprep.subr.bf16.mxu0 %v6388_v29 }
 0x1f8   : > { %5782 = vmatpush3.bf16.msra.mxu0 %v6249_v50 }
 0x1fb   : > { %5784 = vmatmul.mubr.bf16.vlgmr.msra.gmra.mrb[48].mxu0 %v1322_v53 }
 0x20e   : > { %v5510_v54 = vpop.f32.mrb[24].mxu0 }
 0x20f   : > { %v5511_v55 = vpop.f32.mrb[25].mxu0 }
 0x210   : > { %v5512_v56 = vadd.f32 %v5511_v55, %v5510_v54  ;;  %v5513_v57 = vpop.f32.mrb[26].mxu0  ;;  %v5532_v58 = vpop.f32.mrb[24].mxu1 }
 0x211   : > { %v5514_v59 = vpop.f32.mrb[27].mxu0  ;;  %v5533_v60 = vpop.f32.mrb[25].mxu1 }
 0x212   : > { %v4239_v51 = vadd.f32 %v5512_v56, %v4199_v49  ;;  %v5534_v61 = vadd.f32 %v5533_v60, %v5532_v58  ;;  %v5535_v62 = vpop.f32.mrb[26].mxu1 }
 0x213   : > { %v5536_v63 = vpop.f32.mrb[27].mxu1 }
 0x214   : > { %v4279_v0 = vadd.f32 %v5534_v61, %v4239_v51  ;;  %v216_v61 = vld [vmem:[#allocation2] sm:$0x3] }
 0x22e   : > { %v5554_v1 = vpop.f32.mrb[28].mxu0 }
 0x22f   : > { %v5555_v2 = vpop.f32.mrb[29].mxu0 }
 0x230   : > { %v5556_v3 = vadd.f32 %v5555_v2, %v5554_v1  ;;  %v5557_v4 = vpop.f32.mrb[30].mxu0  ;;  %v5576_v5 = vpop.f32.mrb[28].mxu1 }
 0x231   : > { %v5558_v42 = vpop.f32.mrb[31].mxu0  ;;  %v5577_v6 = vpop.f32.mrb[29].mxu1 }
 0x232   : > { %v4319_v7 = vadd.f32 %v5556_v3, %v4279_v0  ;;  %v5578_v8 = vadd.f32 %v5577_v6, %v5576_v5  ;;  %v5579_v9 = vpop.f32.mrb[30].mxu1  ;;  %v5224_v5 = vld [vmem:[#allocation6] ss:$0 sm:$0xff] (!%p5223_p4) }
 0x233   : > { %v5580_v10 = vpop.f32.mrb[31].mxu1 }
 0x234   : > { %v4359_v11 = vadd.f32 %v5578_v8, %v4319_v7 }
 0x24e   : > { %v5598_v12 = vpop.f32.mrb[32].mxu0 }
 0x24f   : > { %v5599_v13 = vpop.f32.mrb[33].mxu0 }
 0x250   : > { %v5600_v14 = vadd.f32 %v5599_v13, %v5598_v12  ;;  %v5601_v15 = vpop.f32.mrb[34].mxu0  ;;  %v5620_v16 = vpop.f32.mrb[32].mxu1 }
 0x251   : > { %v5602_v17 = vpop.f32.mrb[35].mxu0  ;;  %v5621_v18 = vpop.f32.mrb[33].mxu1 }
 0x252   : > { %v4399_v19 = vadd.f32 %v5600_v14, %v4359_v11  ;;  %v5622_v20 = vadd.f32 %v5621_v18, %v5620_v16  ;;  %v5623_v21 = vpop.f32.mrb[34].mxu1 }
 0x253   : > { %v5624_v22 = vpop.f32.mrb[35].mxu1 }
 0x254   : > { %v4439_v23 = vadd.f32 %v5622_v20, %v4399_v19 }
 0x26e   : > { %v5642_v24 = vpop.f32.mrb[36].mxu0 }
 0x26f   : > { %v5643_v25 = vpop.f32.mrb[37].mxu0 }
 0x270   : > { %v5644_v26 = vadd.f32 %v5643_v25, %v5642_v24  ;;  %v5645_v27 = vpop.f32.mrb[38].mxu0  ;;  %v5664_v28 = vpop.f32.mrb[36].mxu1 }
 0x271   : > { %v5646_v29 = vpop.f32.mrb[39].mxu0  ;;  %v5665_v31 = vpop.f32.mrb[37].mxu1 }
 0x272   : > { %v4479_v32 = vadd.f32 %v5644_v26, %v4439_v23  ;;  %v5666_v30 = vadd.f32 %v5665_v31, %v5664_v28  ;;  %v5667_v33 = vpop.f32.mrb[38].mxu1 }
 0x273   : > { %v5668_v34 = vpop.f32.mrb[39].mxu1 }
 0x274   : > { %v4519_v35 = vadd.f32 %v5666_v30, %v4479_v32 }
 0x28e   : > { %v5686_v36 = vpop.f32.mrb[40].mxu0 }
 0x28f   : > { %v5687_v37 = vpop.f32.mrb[41].mxu0 }
 0x290   : > { %v5688_v38 = vadd.f32 %v5687_v37, %v5686_v36  ;;  %v5689_v39 = vpop.f32.mrb[42].mxu0  ;;  %v5708_v40 = vpop.f32.mrb[40].mxu1 }
 0x291   : > { %v5690_v41 = vpop.f32.mrb[43].mxu0  ;;  %v5709_v43 = vpop.f32.mrb[41].mxu1 }
 0x292   : > { %v4559_v44 = vadd.f32 %v5688_v38, %v4519_v35  ;;  %v5710_v45 = vadd.f32 %v5709_v43, %v5708_v40  ;;  %v5711_v46 = vpop.f32.mrb[42].mxu1 }
 0x293   : > { %v5712_v47 = vpop.f32.mrb[43].mxu1 }
 0x294   : > { %v4599_v48 = vadd.f32 %v5710_v45, %v4559_v44 }
 0x2ae   : > { %v5730_v49 = vpop.f32.mrb[44].mxu0 }
 0x2af   : > { %v5731_v50 = vpop.f32.mrb[45].mxu0 }
 0x2b0   : > { %v5732_v52 = vadd.f32 %v5731_v50, %v5730_v49  ;;  %v5733_v53 = vpop.f32.mrb[46].mxu0  ;;  %v5752_v54 = vpop.f32.mrb[44].mxu1 }
 0x2b1   : > { %v5734_v55 = vpop.f32.mrb[47].mxu0  ;;  %v5753_v56 = vpop.f32.mrb[45].mxu1 }
 0x2b2   : > { %v4639_v57 = vadd.f32 %v5732_v52, %v4599_v48  ;;  %v5754_v58 = vadd.f32 %v5753_v56, %v5752_v54  ;;  %v5755_v59 = vpop.f32.mrb[46].mxu1 }
 0x2b3   : > { %v5756_v60 = vpop.f32.mrb[47].mxu1 }
 0x2b4   : > { %v4679_v51 = vadd.f32 %v5754_v58, %v4639_v57 }
 0x2cd   : > { %4729 = sbr.rel (%p5223_p4) target bundleno = 764 (0x2fc), region = 48 }
 0x2ce   : > { %v4718_v62 = vpop.f32.mrb[48].mxu0 }
 0x2cf   : > { %v4719_v63 = vadd.f32 %v4718_v62, %v4679_v51  ;;  %v5785_v0 = vpop.f32.mrb[49].mxu0 }
 0x2d0   : > { %v4721_v1 = vpop.f32.mrb[50].mxu0 }
 0x2d1   : > { %v4724_v2 = vadd.f32 %v4719_v63, %v216_v61  ;;  %v5786_v3 = vpop.f32.mrb[51].mxu0 }
 0x2d3   : > { %4725 = vst [vmem:[#allocation2] sm:$0x3] %v4724_v2 }
 0x2da   : > { %v4730_v4 = vld [vmem:[#allocation2] sm:$0x3] }
 0x2db   : > { %v4738_v42 = vadd.f32 %v5224_v5, %v4730_v4 }
 0x2dd   : > { %v4739_v6 = vsub.f32 0.0, %v4738_v42 }
 0x2df   : > { %v4740_v7 = vmul.f32 1.442695, %v4739_v6 }
 0x2e1   : > { %6250 = vpow2.f32 %v4740_v7 }
 0x2eb   : > { %v6251_v8 = vpop.eup %6250 }
 0x2ec   : > { %v4742_v9 = vadd.f32 1.0, %v6251_v8 }
 0x2ee   : > { %6252 = vrcp.f32 %v4742_v9 }
 0x2f8   : > { %v6253_v10 = vpop.eup %6252 }
 0x2f9   : > { %v4744_v11 = vmin.f32 %v6253_v10, 1.0 }
 0x2fb   : > { %4745 = vst [vmem:[#allocation8] sm:$0x3] %v4744_v11 }
 0x2fc PF: > { %p5810_p7 = scmp.eq.s32.totalorder %s6430_s16, 3  ;;  %s6390_s22 = smov [#allocation8]  }
 0x2fd   : > { %s4753_s27 = sshll.u32 %s6390_s22, 4  ;;  %s4754_s27 = int_to_ptr.vmem [resolvable:$true] %s4753_s27 }
 0x2fe   : > { %s6312_s6 = scalar_lea.vmem %s4754_s27, 32  ;;  %p6319_p10 = scmp.lt.s32.totalorder %s4754_s27, %s4754_s27 }
 0x2ff   : > { %p6313_p11 = scmp.ne.s32.totalorder %s4754_s27, %s6312_s6  ;;  %p6320_p0 = scmp.lt.s32.totalorder %s6312_s6, %s6312_s6 }
 0x301   : > { %p6314_p12 = pnand %p6313_p11, %p5810_p7  ;;  %p6321_p1 = por %p6320_p0, %p6319_p10 }
 0x303   : > { %p6315_p5 = pneg %p6314_p12 }
 0x305   : > { %p6322_p9 = pnand %p6321_p1, %p6315_p5 }
 0x307   : > { %6325 = shalt.err (!%p6322_p9)
}
 0x308   : > { %s6326_s7 = scalar_lea.hbm %s7072_s3, 32 }
 0x309   : > { %p6327_p13 = scmp.ne.s32.totalorder %s7072_s3, %s6326_s7  ;;  %p6332_p3 = scmp.lt.u32.totalorder %s6326_s7, %s7072_s3 }
 0x30b   : > { %p6328_p2 = pnand %p6327_p13, %p5810_p7 }
 0x30d   : > { %p6329_p8 = pneg %p6328_p2 }
 0x30f   : > { %p6334_p6 = pnand %p6332_p3, %p6329_p8 }
 0x311   : > { %6337 = shalt.err (!%p6334_p6)
}
 0x312   : > { %5796 = dma.vmem_to_hbm [thread:$0]  (%p5810_p7), %s4754_s27, 32, %s7072_s3, [#allocation5]  }
 0x313   : > { %6363 = dma.done.wait (%p5810_p7), [#allocation5], 32  }
 0x314   : > { %6365 = vsyncadd (%p5810_p7), [#allocation5], 4294967264 }
 0x315 PF: > { %p15_p4 = scmp.ge.s32.totalorder %s6433_s17, 6   ;;  %s7088_s12 = smov %s6372_s13 }
 0x316   : > { %s7089_s13 = smov %s6376_s14  ;;  %s7090_s14 = smov %s6443_s20 }
 0x317   : > { %s7091_s15 = smov %s6433_s17  ;;  %17 = sbr.rel (!%p15_p4) target bundleno = 5 (0x5), region = 84 }
 0x31e   :  { %4766 = vsyncpa [#allocation4], 1 }
 0x31f   :  { %4768 = vsyncpa [#allocation4 + $0x1], 1 }
 0x320   :  { %4769 = vsyncpa [#allocation7], 1 }
 0x321   :  { %4770 = vsyncpa [#allocation5], 1 }
 0x322   :  { %4772 = vsyncpa [#allocation5 + $0x1], 1 }

</bundles_post_ra>
